<compile_context>
chip_gen: v6e
topology: v6e:2x2x1
jax: 0.10.0
libtpu: 0.0.40
codegen_flags: <defaults>
</compile_context>

<pallas_src>
import numpy as np
import jax
import jax.numpy as jnp
from jax import lax
from jax.experimental import pallas as pl
from jax.experimental.pallas import tpu as pltpu

K = 7            # conv kernel size
PAD = K // 2     # "same" padding
KK = K * K
G = 8            # channel group size = one sublane tile


def _largest_divisor_leq(n, cap):
    for d in range(min(n, cap), 0, -1):
        if n % d == 0:
            return d
    return 1


def _sublane_reduce(v, op):
    """Fold a (G, N) value over its (power-of-two) sublane axis -> (1, N)."""
    g = v.shape[0]
    while g > 1:
        g //= 2
        v = op(v[:g, :], v[g:2 * g, :])
    return v


def _sa_kernel(w_ref, x_ref, o_ref, acc_max_ref, acc_sum_ref,
               pmax_pad_ref, psum_pad_ref):
    # w_ref        : SMEM (2*K*K + 1,) f32   [w_max(49), w_avg*(1/C)(49), bias]
    # x_ref        : VMEM (TB, CC, HW)       lane-dense channel chunk
    # o_ref        : VMEM (TB, 1, H, W)
    # acc_max_ref  : VMEM (TB, G, HW) f32    dense running channel max
    # acc_sum_ref  : VMEM (TB, G, HW) f32    dense running channel sum
    # p*_pad_ref   : VMEM (TB, H+2P, W+2P)   zero-padded conv planes (finalize)
    TB, CC, HW = x_ref.shape
    _, _, H, W = o_ref.shape
    Hp, Wp = H + 2 * PAD, W + 2 * PAD

    c = pl.program_id(1)
    last_c = pl.num_programs(1) - 1

    # ---- init the dense running reductions at the first channel chunk ----
    @pl.when(c == 0)
    def _init():
        acc_max_ref[...] = jnp.full_like(acc_max_ref, -jnp.inf)
        acc_sum_ref[...] = jnp.zeros_like(acc_sum_ref)

    # ---- dense single pass over this chunk's channels -------------------
    ng, rem = divmod(CC, G)
    if rem:
        row0 = lax.broadcasted_iota(jnp.int32, (G, HW), 0) == 0

    for b in range(TB):
        cm8 = acc_max_ref[b]                    # (G, HW) f32
        cs8 = acc_sum_ref[b]

        if 0 < ng <= 16:                        # small chunk: static unroll
            for g in range(ng):
                blk = x_ref[b, g * G:(g + 1) * G, :].astype(jnp.float32)
                cm8 = jnp.maximum(cm8, blk)
                cs8 = cs8 + blk
        elif ng > 16:                           # large chunk: rolled loop
            def body(g, carry, _b=b):
                m, s = carry
                base = pl.multiple_of(g * G, G)
                blk = x_ref[_b, pl.ds(base, G), :].astype(jnp.float32)
                return jnp.maximum(m, blk), s + blk
            cm8, cs8 = lax.fori_loop(0, ng, body, (cm8, cs8), unroll=4)

        # remainder channels (< 8): broadcast for max, masked add for sum
        for j in range(rem):
            ci = ng * G + j
            xc = x_ref[b, ci:ci + 1, :].astype(jnp.float32)     # (1, HW)
            xcb = jnp.broadcast_to(xc, (G, HW))
            cm8 = jnp.maximum(cm8, xcb)
            cs8 = cs8 + jnp.where(row0, xcb, 0.0)

        acc_max_ref[b] = cm8
        acc_sum_ref[b] = cs8

    # ---- finalize at the last chunk: 7x7 conv + bias + sigmoid ----------
    @pl.when(c == last_c)
    def _finalize():
        # (1) fold dense accumulators over sublanes and scatter the rows into
        #     zero-padded (H, W) planes -- one relayout per batch tile,
        #     amortized over all channel chunks.
        pmax_pad_ref[...] = jnp.zeros_like(pmax_pad_ref)
        psum_pad_ref[...] = jnp.zeros_like(psum_pad_ref)
        for b in range(TB):
            cmax = _sublane_reduce(acc_max_ref[b], jnp.maximum)   # (1, HW)
            csum = _sublane_reduce(acc_sum_ref[b], jnp.add)       # (1, HW)
            for h in range(H):
                pmax_pad_ref[b, PAD + h:PAD + h + 1, PAD:PAD + W] = (
                    cmax[:, h * W:(h + 1) * W])
                psum_pad_ref[b, PAD + h:PAD + h + 1, PAD:PAD + W] = (
                    csum[:, h * W:(h + 1) * W])

        # (2) conv in small batch sub-chunks: two accumulators, per-kw windows
        #     sliced straight from the padded refs (low vreg pressure).
        plane_vregs = ((H + 7) // 8) * ((W + 127) // 128)
        SB = 1 if (TB == 1 or plane_vregs > 8) else 2
        bias = w_ref[2 * KK]
        for b0 in range(0, TB, SB):
            sb = min(SB, TB - b0)
            acc_m = jnp.zeros((sb, H, W), jnp.float32)
            acc_a = jnp.zeros((sb, H, W), jnp.float32)
            for kw in range(K):
                win_m = pmax_pad_ref[b0:b0 + sb, :, kw:kw + W]   # (sb, Hp, W)
                win_a = psum_pad_ref[b0:b0 + sb, :, kw:kw + W]
                for kh in range(K):
                    w_m = w_ref[kh * K + kw]              # SMEM scalar, in-loop
                    w_a = w_ref[KK + kh * K + kw]
                    acc_m = acc_m + w_m * win_m[:, kh:kh + H, :]
                    acc_a = acc_a + w_a * win_a[:, kh:kh + H, :]
            out = jax.nn.sigmoid(acc_m + acc_a + bias)
            o_ref[b0:b0 + sb, 0, :, :] = out.astype(o_ref.dtype)


def spatial_attention(x, conv_w, conv_b, *, batch_tile=None, c_chunk=None):
    """x: (B, C, H, W); conv_w: (1, 2, K, K); conv_b: (1,). Returns (B,1,H,W)."""
    B, C, H, W = x.shape
    HW = H * W

    # Batch tile: keep >= 2 batch tiles when B >= 2 so the "parallel" axis
    # feeds both v7x TensorCores; cap at 8 to bound finalize register pressure.
    if batch_tile is None:
        TB = _largest_divisor_leq(B, max(1, min(8, B // 2))) if B >= 2 else 1
    else:
        TB = int(batch_tile)
    assert B % TB == 0

    # Channel chunk: ~6 MiB input blocks (12 MiB double-buffered) amortize the
    # per-step pipeline overhead.  CC must divide C and be either C itself or
    # a multiple of 8 (sublane tiling of the block's second-minor dim).
    bytes_per_channel = TB * HW * x.dtype.itemsize
    cap_c = max(1, (6 * 1024 * 1024) // int(bytes_per_channel))
    if c_chunk is not None:
        CC = int(c_chunk)
    elif C <= cap_c:
        CC = C
    else:
        CC = C                               # fallback: whole channel axis
        for d in range(8, cap_c + 1, 8):
            if C % d == 0:
                CC = d                       # largest multiple-of-8 divisor
    assert C % CC == 0 and (CC == C or CC % 8 == 0)

    # Fold the mean's 1/C into the avg-channel weights (the conv is linear).
    w = conv_w.astype(jnp.float32)
    w = w.at[:, 1, :, :].multiply(1.0 / C)
    w_flat = jnp.concatenate(
        [w.reshape(-1), conv_b.reshape(-1).astype(jnp.float32)])   # (2*K*K+1,)

    x_flat = x.reshape(B, C, HW)             # free: contiguous reshape
    Hp, Wp = H + 2 * PAD, W + 2 * PAD

    block_bytes = TB * CC * HW * x.dtype.itemsize
    vmem_limit = int(min(48 * 1024 * 1024,
                         max(32 * 1024 * 1024, 2 * block_bytes + (8 << 20))))

    cost = pl.CostEstimate(
        flops=int(2 * B * C * HW + 2 * B * 2 * KK * HW),
        transcendentals=int(B * HW),
        bytes_accessed=int(x.size * x.dtype.itemsize
                           + B * HW * x.dtype.itemsize + w_flat.size * 4),
    )

    return pl.pallas_call(
        _sa_kernel,
        out_shape=jax.ShapeDtypeStruct((B, 1, H, W), x.dtype),
        grid_spec=pltpu.PrefetchScalarGridSpec(
            num_scalar_prefetch=1,                      # weights+bias -> SMEM once
            grid=(B // TB, C // CC),
            in_specs=[
                pl.BlockSpec((TB, CC, HW), lambda b, c, w_s: (b, c, 0)),
            ],
            out_specs=pl.BlockSpec((TB, 1, H, W), lambda b, c, w_s: (b, 0, 0, 0)),
            scratch_shapes=[
                pltpu.VMEM((TB, G, HW), jnp.float32),    # dense running max
                pltpu.VMEM((TB, G, HW), jnp.float32),    # dense running sum
                pltpu.VMEM((TB, Hp, Wp), jnp.float32),   # padded max plane
                pltpu.VMEM((TB, Hp, Wp), jnp.float32),   # padded sum plane
            ],
        ),
        compiler_params=pltpu.CompilerParams(
            dimension_semantics=("parallel", "arbitrary"),
            vmem_limit_bytes=vmem_limit),
        cost_estimate=cost,
    )(w_flat, x_flat)


def spatial_attention_ref(x, conv_w, conv_b):
    mx = jnp.max(x, axis=1, keepdims=True)
    av = jnp.mean(x, axis=1, keepdims=True)
    r = jnp.concatenate([mx, av], axis=1)
    out = lax.conv_general_dilated(
        r, conv_w, window_strides=(1, 1), padding=[(PAD, PAD), (PAD, PAD)],
        dimension_numbers=("NCHW", "OIHW", "NCHW"))
    out = out + conv_b.reshape(1, -1, 1, 1)
    return jax.nn.sigmoid(out)


if __name__ == "__main__":
    key = jax.random.PRNGKey(0)
    kx, kw_key = jax.random.split(key)

    B, C, H, W = 2, 4, 16, 16
    x = jax.random.normal(kx, (B, C, H, W), dtype=jnp.float32)

    # Deterministic kaiming_normal_(mode='fan_out'): std = sqrt(2 / (O*Kh*Kw))
    fan_out = 1 * K * K
    conv_w = jax.random.normal(kw_key, (1, 2, K, K), dtype=jnp.float32) * jnp.sqrt(2.0 / fan_out)
    conv_b = jnp.zeros((1,), dtype=jnp.float32)

    out = spatial_attention(x, conv_w, conv_b)
    out = jax.block_until_ready(out)

    ref = spatial_attention_ref(x, conv_w, conv_b)
    np.testing.assert_allclose(np.asarray(out), np.asarray(ref), atol=1e-5, rtol=1e-5)

    print("KERNEL_OK")
</pallas_src>

<mosaic_0001>
module attributes {stable_mosaic.version = 11 : i64} {
  func.func @_sa_kernel(%arg0: i32, %arg1: i32, %arg2: memref<99xf32, #tpu.memory_space<smem>>, %arg3: memref<1x4x256xf32, #tpu.memory_space<vmem>>, %arg4: memref<1x1x16x16xf32, #tpu.memory_space<vmem>>, %arg5: memref<1x8x256xf32, #tpu.memory_space<vmem>>, %arg6: memref<1x8x256xf32, #tpu.memory_space<vmem>>, %arg7: memref<1x22x22xf32, #tpu.memory_space<vmem>>, %arg8: memref<1x22x22xf32, #tpu.memory_space<vmem>>) attributes {dimension_semantics = [#tpu.dimension_semantics<parallel>, #tpu.dimension_semantics<arbitrary>], iteration_bounds = array<i64: 2, 1>, scalar_prefetch = 1 : i64, scratch_operands = 4 : i64, tpu.core_type = #tpu.core_type<tc>, window_params = [{transform_indices = @transform_0, window_bounds = array<i64: 1, 4, 256>}, {transform_indices = @transform_1, window_bounds = array<i64: 1, 1, 16, 16>}]} {
    %c0_i32 = arith.constant 0 : i32
    %0 = arith.cmpi eq, %arg1, %c0_i32 : i32
    %1 = arith.extui %0 : i1 to i32
    %c0_i32_0 = arith.constant 0 : i32
    %2 = arith.cmpi ne, %1, %c0_i32_0 : i32
    scf.if %2 {
      %cst_27 = arith.constant 0xFF800000 : f32
      %51 = vector.broadcast %cst_27 : f32 to vector<1x8x256xf32>
      %c0_28 = arith.constant 0 : index
      %c0_29 = arith.constant 0 : index
      %c0_30 = arith.constant 0 : index
      %52 = vector.load %arg5[%c0_28, %c0_29, %c0_30] : memref<1x8x256xf32, #tpu.memory_space<vmem>>, vector<1x8x256xf32>
      tpu.vector_store %arg5[%c0_28, %c0_29, %c0_30], %51 {strides = array<i32>} : memref<1x8x256xf32, #tpu.memory_space<vmem>>, vector<1x8x256xf32>,
      %cst_31 = arith.constant 0.000000e+00 : f32
      %53 = vector.broadcast %cst_31 : f32 to vector<1x8x256xf32>
      %c0_32 = arith.constant 0 : index
      %c0_33 = arith.constant 0 : index
      %c0_34 = arith.constant 0 : index
      %54 = vector.load %arg6[%c0_32, %c0_33, %c0_34] : memref<1x8x256xf32, #tpu.memory_space<vmem>>, vector<1x8x256xf32>
      tpu.vector_store %arg6[%c0_32, %c0_33, %c0_34], %53 {strides = array<i32>} : memref<1x8x256xf32, #tpu.memory_space<vmem>>, vector<1x8x256xf32>,
    } else {
    }
    %3 = tpu.iota {dimensions = array<i32: 0>} : vector<8x256xi32>
    %c0_i32_1 = arith.constant 0 : i32
    %4 = vector.broadcast %c0_i32_1 : i32 to vector<8x256xi32>
    %5 = arith.cmpi eq, %3, %4 : vector<8x256xi32>
    %c0 = arith.constant 0 : index
    %c0_2 = arith.constant 0 : index
    %c0_3 = arith.constant 0 : index
    %6 = vector.load %arg5[%c0, %c0_2, %c0_3] : memref<1x8x256xf32, #tpu.memory_space<vmem>>, vector<1x8x256xf32>
    %7 = vector.shape_cast %6 : vector<1x8x256xf32> to vector<8x256xf32>
    %c0_4 = arith.constant 0 : index
    %c0_5 = arith.constant 0 : index
    %c0_6 = arith.constant 0 : index
    %8 = vector.load %arg6[%c0_4, %c0_5, %c0_6] : memref<1x8x256xf32, #tpu.memory_space<vmem>>, vector<1x8x256xf32>
    %9 = vector.shape_cast %8 : vector<1x8x256xf32> to vector<8x256xf32>
    %c0_7 = arith.constant 0 : index
    %c0_8 = arith.constant 0 : index
    %c0_9 = arith.constant 0 : index
    %10 = vector.load %arg3[%c0_7, %c0_8, %c0_9] : memref<1x4x256xf32, #tpu.memory_space<vmem>>, vector<1x1x256xf32>
    %11 = vector.shape_cast %10 : vector<1x1x256xf32> to vector<1x256xf32>
    %12 = vector.shape_cast %11 : vector<1x256xf32> to vector<1x256xf32>
    %13 = vector.broadcast %12 : vector<1x256xf32> to vector<8x256xf32>
    %14 = arith.maximumf %7, %13 : vector<8x256xf32>
    %cst = arith.constant 0.000000e+00 : f32
    %15 = vector.broadcast %cst : f32 to vector<8x256xf32>
    %16 = arith.select %5, %13, %15 : vector<8x256xi1>, vector<8x256xf32>
    %17 = arith.addf %9, %16 : vector<8x256xf32>
    %c0_10 = arith.constant 0 : index
    %c1 = arith.constant 1 : index
    %c0_11 = arith.constant 0 : index
    %18 = vector.load %arg3[%c0_10, %c1, %c0_11] : memref<1x4x256xf32, #tpu.memory_space<vmem>>, vector<1x1x256xf32>
    %19 = vector.shape_cast %18 : vector<1x1x256xf32> to vector<1x256xf32>
    %20 = vector.shape_cast %19 : vector<1x256xf32> to vector<1x256xf32>
    %21 = vector.broadcast %20 : vector<1x256xf32> to vector<8x256xf32>
    %22 = arith.maximumf %14, %21 : vector<8x256xf32>
    %cst_12 = arith.constant 0.000000e+00 : f32
    %23 = vector.broadcast %cst_12 : f32 to vector<8x256xf32>
    %24 = arith.select %5, %21, %23 : vector<8x256xi1>, vector<8x256xf32>
    %25 = arith.addf %17, %24 : vector<8x256xf32>
    %c0_13 = arith.constant 0 : index
    %c2 = arith.constant 2 : index
    %c0_14 = arith.constant 0 : index
    %26 = vector.load %arg3[%c0_13, %c2, %c0_14] : memref<1x4x256xf32, #tpu.memory_space<vmem>>, vector<1x1x256xf32>
    %27 = vector.shape_cast %26 : vector<1x1x256xf32> to vector<1x256xf32>
    %28 = vector.shape_cast %27 : vector<1x256xf32> to vector<1x256xf32>
    %29 = vector.broadcast %28 : vector<1x256xf32> to vector<8x256xf32>
    %30 = arith.maximumf %22, %29 : vector<8x256xf32>
    %cst_15 = arith.constant 0.000000e+00 : f32
    %31 = vector.broadcast %cst_15 : f32 to vector<8x256xf32>
    %32 = arith.select %5, %29, %31 : vector<8x256xi1>, vector<8x256xf32>
    %33 = arith.addf %25, %32 : vector<8x256xf32>
    %c0_16 = arith.constant 0 : index
    %c3 = arith.constant 3 : index
    %c0_17 = arith.constant 0 : index
    %34 = vector.load %arg3[%c0_16, %c3, %c0_17] : memref<1x4x256xf32, #tpu.memory_space<vmem>>, vector<1x1x256xf32>
    %35 = vector.shape_cast %34 : vector<1x1x256xf32> to vector<1x256xf32>
    %36 = vector.shape_cast %35 : vector<1x256xf32> to vector<1x256xf32>
    %37 = vector.broadcast %36 : vector<1x256xf32> to vector<8x256xf32>
    %38 = arith.maximumf %30, %37 : vector<8x256xf32>
    %cst_18 = arith.constant 0.000000e+00 : f32
    %39 = vector.broadcast %cst_18 : f32 to vector<8x256xf32>
    %40 = arith.select %5, %37, %39 : vector<8x256xi1>, vector<8x256xf32>
    %41 = arith.addf %33, %40 : vector<8x256xf32>
    %c0_19 = arith.constant 0 : index
    %c0_20 = arith.constant 0 : index
    %c0_21 = arith.constant 0 : index
    %42 = vector.load %arg5[%c0_19, %c0_20, %c0_21] : memref<1x8x256xf32, #tpu.memory_space<vmem>>, vector<1x8x256xf32>
    %43 = vector.shape_cast %42 : vector<1x8x256xf32> to vector<8x256xf32>
    %44 = vector.shape_cast %38 : vector<8x256xf32> to vector<1x8x256xf32>
    tpu.vector_store %arg5[%c0_19, %c0_20, %c0_21], %44 {strides = array<i32>} : memref<1x8x256xf32, #tpu.memory_space<vmem>>, vector<1x8x256xf32>,
    %c0_22 = arith.constant 0 : index
    %c0_23 = arith.constant 0 : index
    %c0_24 = arith.constant 0 : index
    %45 = vector.load %arg6[%c0_22, %c0_23, %c0_24] : memref<1x8x256xf32, #tpu.memory_space<vmem>>, vector<1x8x256xf32>
    %46 = vector.shape_cast %45 : vector<1x8x256xf32> to vector<8x256xf32>
    %47 = vector.shape_cast %41 : vector<8x256xf32> to vector<1x8x256xf32>
    tpu.vector_store %arg6[%c0_22, %c0_23, %c0_24], %47 {strides = array<i32>} : memref<1x8x256xf32, #tpu.memory_space<vmem>>, vector<1x8x256xf32>,
    %c0_i32_25 = arith.constant 0 : i32
    %48 = arith.cmpi eq, %arg1, %c0_i32_25 : i32
    %49 = arith.extui %48 : i1 to i32
    %c0_i32_26 = arith.constant 0 : i32
    %50 = arith.cmpi ne, %49, %c0_i32_26 : i32
    scf.if %50 {
      %cst_27 = arith.constant 0.000000e+00 : f32
      %51 = vector.broadcast %cst_27 : f32 to vector<1x22x22xf32>
      %c0_28 = arith.constant 0 : index
      %c0_29 = arith.constant 0 : index
      %c0_30 = arith.constant 0 : index
      %52 = vector.load %arg7[%c0_28, %c0_29, %c0_30] : memref<1x22x22xf32, #tpu.memory_space<vmem>>, vector<1x22x22xf32>
      tpu.vector_store %arg7[%c0_28, %c0_29, %c0_30], %51 {strides = array<i32>} : memref<1x22x22xf32, #tpu.memory_space<vmem>>, vector<1x22x22xf32>,
      %cst_31 = arith.constant 0.000000e+00 : f32
      %53 = vector.broadcast %cst_31 : f32 to vector<1x22x22xf32>
      %c0_32 = arith.constant 0 : index
      %c0_33 = arith.constant 0 : index
      %c0_34 = arith.constant 0 : index
      %54 = vector.load %arg8[%c0_32, %c0_33, %c0_34] : memref<1x22x22xf32, #tpu.memory_space<vmem>>, vector<1x22x22xf32>
      tpu.vector_store %arg8[%c0_32, %c0_33, %c0_34], %53 {strides = array<i32>} : memref<1x22x22xf32, #tpu.memory_space<vmem>>, vector<1x22x22xf32>,
      %c0_35 = arith.constant 0 : index
      %c0_36 = arith.constant 0 : index
      %c0_37 = arith.constant 0 : index
      %55 = vector.load %arg5[%c0_35, %c0_36, %c0_37] : memref<1x8x256xf32, #tpu.memory_space<vmem>>, vector<1x8x256xf32>
      %56 = vector.shape_cast %55 : vector<1x8x256xf32> to vector<8x256xf32>
      %57 = vector.extract_strided_slice %56 {offsets = [0, 0], sizes = [4, 256], strides = [1, 1]} : vector<8x256xf32> to vector<4x256xf32>
      %58 = vector.extract_strided_slice %56 {offsets = [4, 0], sizes = [4, 256], strides = [1, 1]} : vector<8x256xf32> to vector<4x256xf32>
      %59 = arith.maximumf %57, %58 : vector<4x256xf32>
      %60 = vector.extract_strided_slice %59 {offsets = [0, 0], sizes = [2, 256], strides = [1, 1]} : vector<4x256xf32> to vector<2x256xf32>
      %61 = vector.extract_strided_slice %59 {offsets = [2, 0], sizes = [2, 256], strides = [1, 1]} : vector<4x256xf32> to vector<2x256xf32>
      %62 = arith.maximumf %60, %61 : vector<2x256xf32>
      %63 = vector.extract_strided_slice %62 {offsets = [0, 0], sizes = [1, 256], strides = [1, 1]} : vector<2x256xf32> to vector<1x256xf32>
      %64 = vector.extract_strided_slice %62 {offsets = [1, 0], sizes = [1, 256], strides = [1, 1]} : vector<2x256xf32> to vector<1x256xf32>
      %65 = arith.maximumf %63, %64 : vector<1x256xf32>
      %c0_38 = arith.constant 0 : index
      %c0_39 = arith.constant 0 : index
      %c0_40 = arith.constant 0 : index
      %66 = vector.load %arg6[%c0_38, %c0_39, %c0_40] : memref<1x8x256xf32, #tpu.memory_space<vmem>>, vector<1x8x256xf32>
      %67 = vector.shape_cast %66 : vector<1x8x256xf32> to vector<8x256xf32>
      %68 = vector.extract_strided_slice %67 {offsets = [0, 0], sizes = [4, 256], strides = [1, 1]} : vector<8x256xf32> to vector<4x256xf32>
      %69 = vector.extract_strided_slice %67 {offsets = [4, 0], sizes = [4, 256], strides = [1, 1]} : vector<8x256xf32> to vector<4x256xf32>
      %70 = arith.addf %68, %69 : vector<4x256xf32>
      %71 = vector.extract_strided_slice %70 {offsets = [0, 0], sizes = [2, 256], strides = [1, 1]} : vector<4x256xf32> to vector<2x256xf32>
      %72 = vector.extract_strided_slice %70 {offsets = [2, 0], sizes = [2, 256], strides = [1, 1]} : vector<4x256xf32> to vector<2x256xf32>
      %73 = arith.addf %71, %72 : vector<2x256xf32>
      %74 = vector.extract_strided_slice %73 {offsets = [0, 0], sizes = [1, 256], strides = [1, 1]} : vector<2x256xf32> to vector<1x256xf32>
      %75 = vector.extract_strided_slice %73 {offsets = [1, 0], sizes = [1, 256], strides = [1, 1]} : vector<2x256xf32> to vector<1x256xf32>
      %76 = arith.addf %74, %75 : vector<1x256xf32>
      %77 = vector.extract_strided_slice %65 {offsets = [0, 0], sizes = [1, 16], strides = [1, 1]} : vector<1x256xf32> to vector<1x16xf32>
      %c0_41 = arith.constant 0 : index
      %c3_42 = arith.constant 3 : index
      %c3_43 = arith.constant 3 : index
      %78 = vector.load %arg7[%c0_41, %c3_42, %c3_43] : memref<1x22x22xf32, #tpu.memory_space<vmem>>, vector<1x1x16xf32>
      %79 = vector.shape_cast %78 : vector<1x1x16xf32> to vector<1x16xf32>
      %80 = vector.shape_cast %77 : vector<1x16xf32> to vector<1x1x16xf32>
      tpu.vector_store %arg7[%c0_41, %c3_42, %c3_43], %80 {strides = array<i32>} : memref<1x22x22xf32, #tpu.memory_space<vmem>>, vector<1x1x16xf32>,
      %81 = vector.extract_strided_slice %76 {offsets = [0, 0], sizes = [1, 16], strides = [1, 1]} : vector<1x256xf32> to vector<1x16xf32>
      %c0_44 = arith.constant 0 : index
      %c3_45 = arith.constant 3 : index
      %c3_46 = arith.constant 3 : index
      %82 = vector.load %arg8[%c0_44, %c3_45, %c3_46] : memref<1x22x22xf32, #tpu.memory_space<vmem>>, vector<1x1x16xf32>
      %83 = vector.shape_cast %82 : vector<1x1x16xf32> to vector<1x16xf32>
      %84 = vector.shape_cast %81 : vector<1x16xf32> to vector<1x1x16xf32>
      tpu.vector_store %arg8[%c0_44, %c3_45, %c3_46], %84 {strides = array<i32>} : memref<1x22x22xf32, #tpu.memory_space<vmem>>, vector<1x1x16xf32>,
      %85 = vector.extract_strided_slice %65 {offsets = [0, 16], sizes = [1, 16], strides = [1, 1]} : vector<1x256xf32> to vector<1x16xf32>
      %c0_47 = arith.constant 0 : index
      %c4 = arith.constant 4 : index
      %c3_48 = arith.constant 3 : index
      %86 = vector.load %arg7[%c0_47, %c4, %c3_48] : memref<1x22x22xf32, #tpu.memory_space<vmem>>, vector<1x1x16xf32>
      %87 = vector.shape_cast %86 : vector<1x1x16xf32> to vector<1x16xf32>
      %88 = vector.shape_cast %85 : vector<1x16xf32> to vector<1x1x16xf32>
      tpu.vector_store %arg7[%c0_47, %c4, %c3_48], %88 {strides = array<i32>} : memref<1x22x22xf32, #tpu.memory_space<vmem>>, vector<1x1x16xf32>,
      %89 = vector.extract_strided_slice %76 {offsets = [0, 16], sizes = [1, 16], strides = [1, 1]} : vector<1x256xf32> to vector<1x16xf32>
      %c0_49 = arith.constant 0 : index
      %c4_50 = arith.constant 4 : index
      %c3_51 = arith.constant 3 : index
      %90 = vector.load %arg8[%c0_49, %c4_50, %c3_51] : memref<1x22x22xf32, #tpu.memory_space<vmem>>, vector<1x1x16xf32>
      %91 = vector.shape_cast %90 : vector<1x1x16xf32> to vector<1x16xf32>
      %92 = vector.shape_cast %89 : vector<1x16xf32> to vector<1x1x16xf32>
      tpu.vector_store %arg8[%c0_49, %c4_50, %c3_51], %92 {strides = array<i32>} : memref<1x22x22xf32, #tpu.memory_space<vmem>>, vector<1x1x16xf32>,
      %93 = vector.extract_strided_slice %65 {offsets = [0, 32], sizes = [1, 16], strides = [1, 1]} : vector<1x256xf32> to vector<1x16xf32>
      %c0_52 = arith.constant 0 : index
      %c5 = arith.constant 5 : index
      %c3_53 = arith.constant 3 : index
      %94 = vector.load %arg7[%c0_52, %c5, %c3_53] : memref<1x22x22xf32, #tpu.memory_space<vmem>>, vector<1x1x16xf32>
      %95 = vector.shape_cast %94 : vector<1x1x16xf32> to vector<1x16xf32>
      %96 = vector.shape_cast %93 : vector<1x16xf32> to vector<1x1x16xf32>
      tpu.vector_store %arg7[%c0_52, %c5, %c3_53], %96 {strides = array<i32>} : memref<1x22x22xf32, #tpu.memory_space<vmem>>, vector<1x1x16xf32>,
      %97 = vector.extract_strided_slice %76 {offsets = [0, 32], sizes = [1, 16], strides = [1, 1]} : vector<1x256xf32> to vector<1x16xf32>
      %c0_54 = arith.constant 0 : index
      %c5_55 = arith.constant 5 : index
      %c3_56 = arith.constant 3 : index
      %98 = vector.load %arg8[%c0_54, %c5_55, %c3_56] : memref<1x22x22xf32, #tpu.memory_space<vmem>>, vector<1x1x16xf32>
      %99 = vector.shape_cast %98 : vector<1x1x16xf32> to vector<1x16xf32>
      %100 = vector.shape_cast %97 : vector<1x16xf32> to vector<1x1x16xf32>
      tpu.vector_store %arg8[%c0_54, %c5_55, %c3_56], %100 {strides = array<i32>} : memref<1x22x22xf32, #tpu.memory_space<vmem>>, vector<1x1x16xf32>,
      %101 = vector.extract_strided_slice %65 {offsets = [0, 48], sizes = [1, 16], strides = [1, 1]} : vector<1x256xf32> to vector<1x16xf32>
      %c0_57 = arith.constant 0 : index
      %c6 = arith.constant 6 : index
      %c3_58 = arith.constant 3 : index
      %102 = vector.load %arg7[%c0_57, %c6, %c3_58] : memref<1x22x22xf32, #tpu.memory_space<vmem>>, vector<1x1x16xf32>
      %103 = vector.shape_cast %102 : vector<1x1x16xf32> to vector<1x16xf32>
      %104 = vector.shape_cast %101 : vector<1x16xf32> to vector<1x1x16xf32>
      tpu.vector_store %arg7[%c0_57, %c6, %c3_58], %104 {strides = array<i32>} : memref<1x22x22xf32, #tpu.memory_space<vmem>>, vector<1x1x16xf32>,
      %105 = vector.extract_strided_slice %76 {offsets = [0, 48], sizes = [1, 16], strides = [1, 1]} : vector<1x256xf32> to vector<1x16xf32>
      %c0_59 = arith.constant 0 : index
      %c6_60 = arith.constant 6 : index
      %c3_61 = arith.constant 3 : index
      %106 = vector.load %arg8[%c0_59, %c6_60, %c3_61] : memref<1x22x22xf32, #tpu.memory_space<vmem>>, vector<1x1x16xf32>
      %107 = vector.shape_cast %106 : vector<1x1x16xf32> to vector<1x16xf32>
      %108 = vector.shape_cast %105 : vector<1x16xf32> to vector<1x1x16xf32>
      tpu.vector_store %arg8[%c0_59, %c6_60, %c3_61], %108 {strides = array<i32>} : memref<1x22x22xf32, #tpu.memory_space<vmem>>, vector<1x1x16xf32>,
      %109 = vector.extract_strided_slice %65 {offsets = [0, 64], sizes = [1, 16], strides = [1, 1]} : vector<1x256xf32> to vector<1x16xf32>
      %c0_62 = arith.constant 0 : index
      %c7 = arith.constant 7 : index
      %c3_63 = arith.constant 3 : index
      %110 = vector.load %arg7[%c0_62, %c7, %c3_63] : memref<1x22x22xf32, #tpu.memory_space<vmem>>, vector<1x1x16xf32>
      %111 = vector.shape_cast %110 : vector<1x1x16xf32> to vector<1x16xf32>
      %112 = vector.shape_cast %109 : vector<1x16xf32> to vector<1x1x16xf32>
      tpu.vector_store %arg7[%c0_62, %c7, %c3_63], %112 {strides = array<i32>} : memref<1x22x22xf32, #tpu.memory_space<vmem>>, vector<1x1x16xf32>,
      %113 = vector.extract_strided_slice %76 {offsets = [0, 64], sizes = [1, 16], strides = [1, 1]} : vector<1x256xf32> to vector<1x16xf32>
      %c0_64 = arith.constant 0 : index
      %c7_65 = arith.constant 7 : index
      %c3_66 = arith.constant 3 : index
      %114 = vector.load %arg8[%c0_64, %c7_65, %c3_66] : memref<1x22x22xf32, #tpu.memory_space<vmem>>, vector<1x1x16xf32>
      %115 = vector.shape_cast %114 : vector<1x1x16xf32> to vector<1x16xf32>
      %116 = vector.shape_cast %113 : vector<1x16xf32> to vector<1x1x16xf32>
      tpu.vector_store %arg8[%c0_64, %c7_65, %c3_66], %116 {strides = array<i32>} : memref<1x22x22xf32, #tpu.memory_space<vmem>>, vector<1x1x16xf32>,
      %117 = vector.extract_strided_slice %65 {offsets = [0, 80], sizes = [1, 16], strides = [1, 1]} : vector<1x256xf32> to vector<1x16xf32>
      %c0_67 = arith.constant 0 : index
      %c8 = arith.constant 8 : index
      %c3_68 = arith.constant 3 : index
      %118 = vector.load %arg7[%c0_67, %c8, %c3_68] : memref<1x22x22xf32, #tpu.memory_space<vmem>>, vector<1x1x16xf32>
      %119 = vector.shape_cast %118 : vector<1x1x16xf32> to vector<1x16xf32>
      %120 = vector.shape_cast %117 : vector<1x16xf32> to vector<1x1x16xf32>
      tpu.vector_store %arg7[%c0_67, %c8, %c3_68], %120 {strides = array<i32>} : memref<1x22x22xf32, #tpu.memory_space<vmem>>, vector<1x1x16xf32>,
      %121 = vector.extract_strided_slice %76 {offsets = [0, 80], sizes = [1, 16], strides = [1, 1]} : vector<1x256xf32> to vector<1x16xf32>
      %c0_69 = arith.constant 0 : index
      %c8_70 = arith.constant 8 : index
      %c3_71 = arith.constant 3 : index
      %122 = vector.load %arg8[%c0_69, %c8_70, %c3_71] : memref<1x22x22xf32, #tpu.memory_space<vmem>>, vector<1x1x16xf32>
      %123 = vector.shape_cast %122 : vector<1x1x16xf32> to vector<1x16xf32>
      %124 = vector.shape_cast %121 : vector<1x16xf32> to vector<1x1x16xf32>
      tpu.vector_store %arg8[%c0_69, %c8_70, %c3_71], %124 {strides = array<i32>} : memref<1x22x22xf32, #tpu.memory_space<vmem>>, vector<1x1x16xf32>,
      %125 = vector.extract_strided_slice %65 {offsets = [0, 96], sizes = [1, 16], strides = [1, 1]} : vector<1x256xf32> to vector<1x16xf32>
      %c0_72 = arith.constant 0 : index
      %c9 = arith.constant 9 : index
      %c3_73 = arith.constant 3 : index
      %126 = vector.load %arg7[%c0_72, %c9, %c3_73] : memref<1x22x22xf32, #tpu.memory_space<vmem>>, vector<1x1x16xf32>
      %127 = vector.shape_cast %126 : vector<1x1x16xf32> to vector<1x16xf32>
      %128 = vector.shape_cast %125 : vector<1x16xf32> to vector<1x1x16xf32>
      tpu.vector_store %arg7[%c0_72, %c9, %c3_73], %128 {strides = array<i32>} : memref<1x22x22xf32, #tpu.memory_space<vmem>>, vector<1x1x16xf32>,
      %129 = vector.extract_strided_slice %76 {offsets = [0, 96], sizes = [1, 16], strides = [1, 1]} : vector<1x256xf32> to vector<1x16xf32>
      %c0_74 = arith.constant 0 : index
      %c9_75 = arith.constant 9 : index
      %c3_76 = arith.constant 3 : index
      %130 = vector.load %arg8[%c0_74, %c9_75, %c3_76] : memref<1x22x22xf32, #tpu.memory_space<vmem>>, vector<1x1x16xf32>
      %131 = vector.shape_cast %130 : vector<1x1x16xf32> to vector<1x16xf32>
      %132 = vector.shape_cast %129 : vector<1x16xf32> to vector<1x1x16xf32>
      tpu.vector_store %arg8[%c0_74, %c9_75, %c3_76], %132 {strides = array<i32>} : memref<1x22x22xf32, #tpu.memory_space<vmem>>, vector<1x1x16xf32>,
      %133 = vector.extract_strided_slice %65 {offsets = [0, 112], sizes = [1, 16], strides = [1, 1]} : vector<1x256xf32> to vector<1x16xf32>
      %c0_77 = arith.constant 0 : index
      %c10 = arith.constant 10 : index
      %c3_78 = arith.constant 3 : index
      %134 = vector.load %arg7[%c0_77, %c10, %c3_78] : memref<1x22x22xf32, #tpu.memory_space<vmem>>, vector<1x1x16xf32>
      %135 = vector.shape_cast %134 : vector<1x1x16xf32> to vector<1x16xf32>
      %136 = vector.shape_cast %133 : vector<1x16xf32> to vector<1x1x16xf32>
      tpu.vector_store %arg7[%c0_77, %c10, %c3_78], %136 {strides = array<i32>} : memref<1x22x22xf32, #tpu.memory_space<vmem>>, vector<1x1x16xf32>,
      %137 = vector.extract_strided_slice %76 {offsets = [0, 112], sizes = [1, 16], strides = [1, 1]} : vector<1x256xf32> to vector<1x16xf32>
      %c0_79 = arith.constant 0 : index
      %c10_80 = arith.constant 10 : index
      %c3_81 = arith.constant 3 : index
      %138 = vector.load %arg8[%c0_79, %c10_80, %c3_81] : memref<1x22x22xf32, #tpu.memory_space<vmem>>, vector<1x1x16xf32>
      %139 = vector.shape_cast %138 : vector<1x1x16xf32> to vector<1x16xf32>
      %140 = vector.shape_cast %137 : vector<1x16xf32> to vector<1x1x16xf32>
      tpu.vector_store %arg8[%c0_79, %c10_80, %c3_81], %140 {strides = array<i32>} : memref<1x22x22xf32, #tpu.memory_space<vmem>>, vector<1x1x16xf32>,
      %141 = vector.extract_strided_slice %65 {offsets = [0, 128], sizes = [1, 16], strides = [1, 1]} : vector<1x256xf32> to vector<1x16xf32>
      %c0_82 = arith.constant 0 : index
      %c11 = arith.constant 11 : index
      %c3_83 = arith.constant 3 : index
      %142 = vector.load %arg7[%c0_82, %c11, %c3_83] : memref<1x22x22xf32, #tpu.memory_space<vmem>>, vector<1x1x16xf32>
      %143 = vector.shape_cast %142 : vector<1x1x16xf32> to vector<1x16xf32>
      %144 = vector.shape_cast %141 : vector<1x16xf32> to vector<1x1x16xf32>
      tpu.vector_store %arg7[%c0_82, %c11, %c3_83], %144 {strides = array<i32>} : memref<1x22x22xf32, #tpu.memory_space<vmem>>, vector<1x1x16xf32>,
      %145 = vector.extract_strided_slice %76 {offsets = [0, 128], sizes = [1, 16], strides = [1, 1]} : vector<1x256xf32> to vector<1x16xf32>
      %c0_84 = arith.constant 0 : index
      %c11_85 = arith.constant 11 : index
      %c3_86 = arith.constant 3 : index
      %146 = vector.load %arg8[%c0_84, %c11_85, %c3_86] : memref<1x22x22xf32, #tpu.memory_space<vmem>>, vector<1x1x16xf32>
      %147 = vector.shape_cast %146 : vector<1x1x16xf32> to vector<1x16xf32>
      %148 = vector.shape_cast %145 : vector<1x16xf32> to vector<1x1x16xf32>
      tpu.vector_store %arg8[%c0_84, %c11_85, %c3_86], %148 {strides = array<i32>} : memref<1x22x22xf32, #tpu.memory_space<vmem>>, vector<1x1x16xf32>,
      %149 = vector.extract_strided_slice %65 {offsets = [0, 144], sizes = [1, 16], strides = [1, 1]} : vector<1x256xf32> to vector<1x16xf32>
      %c0_87 = arith.constant 0 : index
      %c12 = arith.constant 12 : index
      %c3_88 = arith.constant 3 : index
      %150 = vector.load %arg7[%c0_87, %c12, %c3_88] : memref<1x22x22xf32, #tpu.memory_space<vmem>>, vector<1x1x16xf32>
      %151 = vector.shape_cast %150 : vector<1x1x16xf32> to vector<1x16xf32>
      %152 = vector.shape_cast %149 : vector<1x16xf32> to vector<1x1x16xf32>
      tpu.vector_store %arg7[%c0_87, %c12, %c3_88], %152 {strides = array<i32>} : memref<1x22x22xf32, #tpu.memory_space<vmem>>, vector<1x1x16xf32>,
      %153 = vector.extract_strided_slice %76 {offsets = [0, 144], sizes = [1, 16], strides = [1, 1]} : vector<1x256xf32> to vector<1x16xf32>
      %c0_89 = arith.constant 0 : index
      %c12_90 = arith.constant 12 : index
      %c3_91 = arith.constant 3 : index
      %154 = vector.load %arg8[%c0_89, %c12_90, %c3_91] : memref<1x22x22xf32, #tpu.memory_space<vmem>>, vector<1x1x16xf32>
      %155 = vector.shape_cast %154 : vector<1x1x16xf32> to vector<1x16xf32>
      %156 = vector.shape_cast %153 : vector<1x16xf32> to vector<1x1x16xf32>
      tpu.vector_store %arg8[%c0_89, %c12_90, %c3_91], %156 {strides = array<i32>} : memref<1x22x22xf32, #tpu.memory_space<vmem>>, vector<1x1x16xf32>,
      %157 = vector.extract_strided_slice %65 {offsets = [0, 160], sizes = [1, 16], strides = [1, 1]} : vector<1x256xf32> to vector<1x16xf32>
      %c0_92 = arith.constant 0 : index
      %c13 = arith.constant 13 : index
      %c3_93 = arith.constant 3 : index
      %158 = vector.load %arg7[%c0_92, %c13, %c3_93] : memref<1x22x22xf32, #tpu.memory_space<vmem>>, vector<1x1x16xf32>
      %159 = vector.shape_cast %158 : vector<1x1x16xf32> to vector<1x16xf32>
      %160 = vector.shape_cast %157 : vector<1x16xf32> to vector<1x1x16xf32>
      tpu.vector_store %arg7[%c0_92, %c13, %c3_93], %160 {strides = array<i32>} : memref<1x22x22xf32, #tpu.memory_space<vmem>>, vector<1x1x16xf32>,
      %161 = vector.extract_strided_slice %76 {offsets = [0, 160], sizes = [1, 16], strides = [1, 1]} : vector<1x256xf32> to vector<1x16xf32>
      %c0_94 = arith.constant 0 : index
      %c13_95 = arith.constant 13 : index
      %c3_96 = arith.constant 3 : index
      %162 = vector.load %arg8[%c0_94, %c13_95, %c3_96] : memref<1x22x22xf32, #tpu.memory_space<vmem>>, vector<1x1x16xf32>
      %163 = vector.shape_cast %162 : vector<1x1x16xf32> to vector<1x16xf32>
      %164 = vector.shape_cast %161 : vector<1x16xf32> to vector<1x1x16xf32>
      tpu.vector_store %arg8[%c0_94, %c13_95, %c3_96], %164 {strides = array<i32>} : memref<1x22x22xf32, #tpu.memory_space<vmem>>, vector<1x1x16xf32>,
      %165 = vector.extract_strided_slice %65 {offsets = [0, 176], sizes = [1, 16], strides = [1, 1]} : vector<1x256xf32> to vector<1x16xf32>
      %c0_97 = arith.constant 0 : index
      %c14 = arith.constant 14 : index
      %c3_98 = arith.constant 3 : index
      %166 = vector.load %arg7[%c0_97, %c14, %c3_98] : memref<1x22x22xf32, #tpu.memory_space<vmem>>, vector<1x1x16xf32>
      %167 = vector.shape_cast %166 : vector<1x1x16xf32> to vector<1x16xf32>
      %168 = vector.shape_cast %165 : vector<1x16xf32> to vector<1x1x16xf32>
      tpu.vector_store %arg7[%c0_97, %c14, %c3_98], %168 {strides = array<i32>} : memref<1x22x22xf32, #tpu.memory_space<vmem>>, vector<1x1x16xf32>,
      %169 = vector.extract_strided_slice %76 {offsets = [0, 176], sizes = [1, 16], strides = [1, 1]} : vector<1x256xf32> to vector<1x16xf32>
      %c0_99 = arith.constant 0 : index
      %c14_100 = arith.constant 14 : index
      %c3_101 = arith.constant 3 : index
      %170 = vector.load %arg8[%c0_99, %c14_100, %c3_101] : memref<1x22x22xf32, #tpu.memory_space<vmem>>, vector<1x1x16xf32>
      %171 = vector.shape_cast %170 : vector<1x1x16xf32> to vector<1x16xf32>
      %172 = vector.shape_cast %169 : vector<1x16xf32> to vector<1x1x16xf32>
      tpu.vector_store %arg8[%c0_99, %c14_100, %c3_101], %172 {strides = array<i32>} : memref<1x22x22xf32, #tpu.memory_space<vmem>>, vector<1x1x16xf32>,
      %173 = vector.extract_strided_slice %65 {offsets = [0, 192], sizes = [1, 16], strides = [1, 1]} : vector<1x256xf32> to vector<1x16xf32>
      %c0_102 = arith.constant 0 : index
      %c15 = arith.constant 15 : index
      %c3_103 = arith.constant 3 : index
      %174 = vector.load %arg7[%c0_102, %c15, %c3_103] : memref<1x22x22xf32, #tpu.memory_space<vmem>>, vector<1x1x16xf32>
      %175 = vector.shape_cast %174 : vector<1x1x16xf32> to vector<1x16xf32>
      %176 = vector.shape_cast %173 : vector<1x16xf32> to vector<1x1x16xf32>
      tpu.vector_store %arg7[%c0_102, %c15, %c3_103], %176 {strides = array<i32>} : memref<1x22x22xf32, #tpu.memory_space<vmem>>, vector<1x1x16xf32>,
      %177 = vector.extract_strided_slice %76 {offsets = [0, 192], sizes = [1, 16], strides = [1, 1]} : vector<1x256xf32> to vector<1x16xf32>
      %c0_104 = arith.constant 0 : index
      %c15_105 = arith.constant 15 : index
      %c3_106 = arith.constant 3 : index
      %178 = vector.load %arg8[%c0_104, %c15_105, %c3_106] : memref<1x22x22xf32, #tpu.memory_space<vmem>>, vector<1x1x16xf32>
      %179 = vector.shape_cast %178 : vector<1x1x16xf32> to vector<1x16xf32>
      %180 = vector.shape_cast %177 : vector<1x16xf32> to vector<1x1x16xf32>
      tpu.vector_store %arg8[%c0_104, %c15_105, %c3_106], %180 {strides = array<i32>} : memref<1x22x22xf32, #tpu.memory_space<vmem>>, vector<1x1x16xf32>,
      %181 = vector.extract_strided_slice %65 {offsets = [0, 208], sizes = [1, 16], strides = [1, 1]} : vector<1x256xf32> to vector<1x16xf32>
      %c0_107 = arith.constant 0 : index
      %c16 = arith.constant 16 : index
      %c3_108 = arith.constant 3 : index
      %182 = vector.load %arg7[%c0_107, %c16, %c3_108] : memref<1x22x22xf32, #tpu.memory_space<vmem>>, vector<1x1x16xf32>
      %183 = vector.shape_cast %182 : vector<1x1x16xf32> to vector<1x16xf32>
      %184 = vector.shape_cast %181 : vector<1x16xf32> to vector<1x1x16xf32>
      tpu.vector_store %arg7[%c0_107, %c16, %c3_108], %184 {strides = array<i32>} : memref<1x22x22xf32, #tpu.memory_space<vmem>>, vector<1x1x16xf32>,
      %185 = vector.extract_strided_slice %76 {offsets = [0, 208], sizes = [1, 16], strides = [1, 1]} : vector<1x256xf32> to vector<1x16xf32>
      %c0_109 = arith.constant 0 : index
      %c16_110 = arith.constant 16 : index
      %c3_111 = arith.constant 3 : index
      %186 = vector.load %arg8[%c0_109, %c16_110, %c3_111] : memref<1x22x22xf32, #tpu.memory_space<vmem>>, vector<1x1x16xf32>
      %187 = vector.shape_cast %186 : vector<1x1x16xf32> to vector<1x16xf32>
      %188 = vector.shape_cast %185 : vector<1x16xf32> to vector<1x1x16xf32>
      tpu.vector_store %arg8[%c0_109, %c16_110, %c3_111], %188 {strides = array<i32>} : memref<1x22x22xf32, #tpu.memory_space<vmem>>, vector<1x1x16xf32>,
      %189 = vector.extract_strided_slice %65 {offsets = [0, 224], sizes = [1, 16], strides = [1, 1]} : vector<1x256xf32> to vector<1x16xf32>
      %c0_112 = arith.constant 0 : index
      %c17 = arith.constant 17 : index
      %c3_113 = arith.constant 3 : index
      %190 = vector.load %arg7[%c0_112, %c17, %c3_113] : memref<1x22x22xf32, #tpu.memory_space<vmem>>, vector<1x1x16xf32>
      %191 = vector.shape_cast %190 : vector<1x1x16xf32> to vector<1x16xf32>
      %192 = vector.shape_cast %189 : vector<1x16xf32> to vector<1x1x16xf32>
      tpu.vector_store %arg7[%c0_112, %c17, %c3_113], %192 {strides = array<i32>} : memref<1x22x22xf32, #tpu.memory_space<vmem>>, vector<1x1x16xf32>,
      %193 = vector.extract_strided_slice %76 {offsets = [0, 224], sizes = [1, 16], strides = [1, 1]} : vector<1x256xf32> to vector<1x16xf32>
      %c0_114 = arith.constant 0 : index
      %c17_115 = arith.constant 17 : index
      %c3_116 = arith.constant 3 : index
      %194 = vector.load %arg8[%c0_114, %c17_115, %c3_116] : memref<1x22x22xf32, #tpu.memory_space<vmem>>, vector<1x1x16xf32>
      %195 = vector.shape_cast %194 : vector<1x1x16xf32> to vector<1x16xf32>
      %196 = vector.shape_cast %193 : vector<1x16xf32> to vector<1x1x16xf32>
      tpu.vector_store %arg8[%c0_114, %c17_115, %c3_116], %196 {strides = array<i32>} : memref<1x22x22xf32, #tpu.memory_space<vmem>>, vector<1x1x16xf32>,
      %197 = vector.extract_strided_slice %65 {offsets = [0, 240], sizes = [1, 16], strides = [1, 1]} : vector<1x256xf32> to vector<1x16xf32>
      %c0_117 = arith.constant 0 : index
      %c18 = arith.constant 18 : index
      %c3_118 = arith.constant 3 : index
      %198 = vector.load %arg7[%c0_117, %c18, %c3_118] : memref<1x22x22xf32, #tpu.memory_space<vmem>>, vector<1x1x16xf32>
      %199 = vector.shape_cast %198 : vector<1x1x16xf32> to vector<1x16xf32>
      %200 = vector.shape_cast %197 : vector<1x16xf32> to vector<1x1x16xf32>
      tpu.vector_store %arg7[%c0_117, %c18, %c3_118], %200 {strides = array<i32>} : memref<1x22x22xf32, #tpu.memory_space<vmem>>, vector<1x1x16xf32>,
      %201 = vector.extract_strided_slice %76 {offsets = [0, 240], sizes = [1, 16], strides = [1, 1]} : vector<1x256xf32> to vector<1x16xf32>
      %c0_119 = arith.constant 0 : index
      %c18_120 = arith.constant 18 : index
      %c3_121 = arith.constant 3 : index
      %202 = vector.load %arg8[%c0_119, %c18_120, %c3_121] : memref<1x22x22xf32, #tpu.memory_space<vmem>>, vector<1x1x16xf32>
      %203 = vector.shape_cast %202 : vector<1x1x16xf32> to vector<1x16xf32>
      %204 = vector.shape_cast %201 : vector<1x16xf32> to vector<1x1x16xf32>
      tpu.vector_store %arg8[%c0_119, %c18_120, %c3_121], %204 {strides = array<i32>} : memref<1x22x22xf32, #tpu.memory_space<vmem>>, vector<1x1x16xf32>,
      %c98 = arith.constant 98 : index
      %205 = memref.load %arg2[%c98] : memref<99xf32, #tpu.memory_space<smem>>
      %cst_122 = arith.constant 0.000000e+00 : f32
      %206 = vector.broadcast %cst_122 : f32 to vector<1x16x16xf32>
      %cst_123 = arith.constant 0.000000e+00 : f32
      %207 = vector.broadcast %cst_123 : f32 to vector<1x16x16xf32>
      %c0_124 = arith.constant 0 : index
      %c0_125 = arith.constant 0 : index
      %c0_126 = arith.constant 0 : index
      %208 = vector.load %arg7[%c0_124, %c0_125, %c0_126] : memref<1x22x22xf32, #tpu.memory_space<vmem>>, vector<1x22x16xf32>
      %c0_127 = arith.constant 0 : index
      %c0_128 = arith.constant 0 : index
      %c0_129 = arith.constant 0 : index
      %209 = vector.load %arg8[%c0_127, %c0_128, %c0_129] : memref<1x22x22xf32, #tpu.memory_space<vmem>>, vector<1x22x16xf32>
      %c0_130 = arith.constant 0 : index
      %210 = memref.load %arg2[%c0_130] : memref<99xf32, #tpu.memory_space<smem>>
      %c49 = arith.constant 49 : index
      %211 = memref.load %arg2[%c49] : memref<99xf32, #tpu.memory_space<smem>>
      %212 = vector.extract_strided_slice %208 {offsets = [0, 0, 0], sizes = [1, 16, 16], strides = [1, 1, 1]} : vector<1x22x16xf32> to vector<1x16x16xf32>
      %213 = vector.broadcast %210 : f32 to vector<1x16x16xf32>
      %214 = arith.mulf %213, %212 : vector<1x16x16xf32>
      %215 = arith.addf %206, %214 : vector<1x16x16xf32>
      %216 = vector.extract_strided_slice %209 {offsets = [0, 0, 0], sizes = [1, 16, 16], strides = [1, 1, 1]} : vector<1x22x16xf32> to vector<1x16x16xf32>
      %217 = vector.broadcast %211 : f32 to vector<1x16x16xf32>
      %218 = arith.mulf %217, %216 : vector<1x16x16xf32>
      %219 = arith.addf %207, %218 : vector<1x16x16xf32>
      %c7_131 = arith.constant 7 : index
      %220 = memref.load %arg2[%c7_131] : memref<99xf32, #tpu.memory_space<smem>>
      %c56 = arith.constant 56 : index
      %221 = memref.load %arg2[%c56] : memref<99xf32, #tpu.memory_space<smem>>
      %222 = vector.extract_strided_slice %208 {offsets = [0, 1, 0], sizes = [1, 16, 16], strides = [1, 1, 1]} : vector<1x22x16xf32> to vector<1x16x16xf32>
      %223 = vector.broadcast %220 : f32 to vector<1x16x16xf32>
      %224 = arith.mulf %223, %222 : vector<1x16x16xf32>
      %225 = arith.addf %215, %224 : vector<1x16x16xf32>
      %226 = vector.extract_strided_slice %209 {offsets = [0, 1, 0], sizes = [1, 16, 16], strides = [1, 1, 1]} : vector<1x22x16xf32> to vector<1x16x16xf32>
      %227 = vector.broadcast %221 : f32 to vector<1x16x16xf32>
      %228 = arith.mulf %227, %226 : vector<1x16x16xf32>
      %229 = arith.addf %219, %228 : vector<1x16x16xf32>
      %c14_132 = arith.constant 14 : index
      %230 = memref.load %arg2[%c14_132] : memref<99xf32, #tpu.memory_space<smem>>
      %c63 = arith.constant 63 : index
      %231 = memref.load %arg2[%c63] : memref<99xf32, #tpu.memory_space<smem>>
      %232 = vector.extract_strided_slice %208 {offsets = [0, 2, 0], sizes = [1, 16, 16], strides = [1, 1, 1]} : vector<1x22x16xf32> to vector<1x16x16xf32>
      %233 = vector.broadcast %230 : f32 to vector<1x16x16xf32>
      %234 = arith.mulf %233, %232 : vector<1x16x16xf32>
      %235 = arith.addf %225, %234 : vector<1x16x16xf32>
      %236 = vector.extract_strided_slice %209 {offsets = [0, 2, 0], sizes = [1, 16, 16], strides = [1, 1, 1]} : vector<1x22x16xf32> to vector<1x16x16xf32>
      %237 = vector.broadcast %231 : f32 to vector<1x16x16xf32>
      %238 = arith.mulf %237, %236 : vector<1x16x16xf32>
      %239 = arith.addf %229, %238 : vector<1x16x16xf32>
      %c21 = arith.constant 21 : index
      %240 = memref.load %arg2[%c21] : memref<99xf32, #tpu.memory_space<smem>>
      %c70 = arith.constant 70 : index
      %241 = memref.load %arg2[%c70] : memref<99xf32, #tpu.memory_space<smem>>
      %242 = vector.extract_strided_slice %208 {offsets = [0, 3, 0], sizes = [1, 16, 16], strides = [1, 1, 1]} : vector<1x22x16xf32> to vector<1x16x16xf32>
      %243 = vector.broadcast %240 : f32 to vector<1x16x16xf32>
      %244 = arith.mulf %243, %242 : vector<1x16x16xf32>
      %245 = arith.addf %235, %244 : vector<1x16x16xf32>
      %246 = vector.extract_strided_slice %209 {offsets = [0, 3, 0], sizes = [1, 16, 16], strides = [1, 1, 1]} : vector<1x22x16xf32> to vector<1x16x16xf32>
      %247 = vector.broadcast %241 : f32 to vector<1x16x16xf32>
      %248 = arith.mulf %247, %246 : vector<1x16x16xf32>
      %249 = arith.addf %239, %248 : vector<1x16x16xf32>
      %c28 = arith.constant 28 : index
      %250 = memref.load %arg2[%c28] : memref<99xf32, #tpu.memory_space<smem>>
      %c77 = arith.constant 77 : index
      %251 = memref.load %arg2[%c77] : memref<99xf32, #tpu.memory_space<smem>>
      %252 = vector.extract_strided_slice %208 {offsets = [0, 4, 0], sizes = [1, 16, 16], strides = [1, 1, 1]} : vector<1x22x16xf32> to vector<1x16x16xf32>
      %253 = vector.broadcast %250 : f32 to vector<1x16x16xf32>
      %254 = arith.mulf %253, %252 : vector<1x16x16xf32>
      %255 = arith.addf %245, %254 : vector<1x16x16xf32>
      %256 = vector.extract_strided_slice %209 {offsets = [0, 4, 0], sizes = [1, 16, 16], strides = [1, 1, 1]} : vector<1x22x16xf32> to vector<1x16x16xf32>
      %257 = vector.broadcast %251 : f32 to vector<1x16x16xf32>
      %258 = arith.mulf %257, %256 : vector<1x16x16xf32>
      %259 = arith.addf %249, %258 : vector<1x16x16xf32>
      %c35 = arith.constant 35 : index
      %260 = memref.load %arg2[%c35] : memref<99xf32, #tpu.memory_space<smem>>
      %c84 = arith.constant 84 : index
      %261 = memref.load %arg2[%c84] : memref<99xf32, #tpu.memory_space<smem>>
      %262 = vector.extract_strided_slice %208 {offsets = [0, 5, 0], sizes = [1, 16, 16], strides = [1, 1, 1]} : vector<1x22x16xf32> to vector<1x16x16xf32>
      %263 = vector.broadcast %260 : f32 to vector<1x16x16xf32>
      %264 = arith.mulf %263, %262 : vector<1x16x16xf32>
      %265 = arith.addf %255, %264 : vector<1x16x16xf32>
      %266 = vector.extract_strided_slice %209 {offsets = [0, 5, 0], sizes = [1, 16, 16], strides = [1, 1, 1]} : vector<1x22x16xf32> to vector<1x16x16xf32>
      %267 = vector.broadcast %261 : f32 to vector<1x16x16xf32>
      %268 = arith.mulf %267, %266 : vector<1x16x16xf32>
      %269 = arith.addf %259, %268 : vector<1x16x16xf32>
      %c42 = arith.constant 42 : index
      %270 = memref.load %arg2[%c42] : memref<99xf32, #tpu.memory_space<smem>>
      %c91 = arith.constant 91 : index
      %271 = memref.load %arg2[%c91] : memref<99xf32, #tpu.memory_space<smem>>
      %272 = vector.extract_strided_slice %208 {offsets = [0, 6, 0], sizes = [1, 16, 16], strides = [1, 1, 1]} : vector<1x22x16xf32> to vector<1x16x16xf32>
      %273 = vector.broadcast %270 : f32 to vector<1x16x16xf32>
      %274 = arith.mulf %273, %272 : vector<1x16x16xf32>
      %275 = arith.addf %265, %274 : vector<1x16x16xf32>
      %276 = vector.extract_strided_slice %209 {offsets = [0, 6, 0], sizes = [1, 16, 16], strides = [1, 1, 1]} : vector<1x22x16xf32> to vector<1x16x16xf32>
      %277 = vector.broadcast %271 : f32 to vector<1x16x16xf32>
      %278 = arith.mulf %277, %276 : vector<1x16x16xf32>
      %279 = arith.addf %269, %278 : vector<1x16x16xf32>
      %c0_133 = arith.constant 0 : index
      %c0_134 = arith.constant 0 : index
      %c1_135 = arith.constant 1 : index
      %280 = vector.load %arg7[%c0_133, %c0_134, %c1_135] : memref<1x22x22xf32, #tpu.memory_space<vmem>>, vector<1x22x16xf32>
      %c0_136 = arith.constant 0 : index
      %c0_137 = arith.constant 0 : index
      %c1_138 = arith.constant 1 : index
      %281 = vector.load %arg8[%c0_136, %c0_137, %c1_138] : memref<1x22x22xf32, #tpu.memory_space<vmem>>, vector<1x22x16xf32>
      %c1_139 = arith.constant 1 : index
      %282 = memref.load %arg2[%c1_139] : memref<99xf32, #tpu.memory_space<smem>>
      %c50 = arith.constant 50 : index
      %283 = memref.load %arg2[%c50] : memref<99xf32, #tpu.memory_space<smem>>
      %284 = vector.extract_strided_slice %280 {offsets = [0, 0, 0], sizes = [1, 16, 16], strides = [1, 1, 1]} : vector<1x22x16xf32> to vector<1x16x16xf32>
      %285 = vector.broadcast %282 : f32 to vector<1x16x16xf32>
      %286 = arith.mulf %285, %284 : vector<1x16x16xf32>
      %287 = arith.addf %275, %286 : vector<1x16x16xf32>
      %288 = vector.extract_strided_slice %281 {offsets = [0, 0, 0], sizes = [1, 16, 16], strides = [1, 1, 1]} : vector<1x22x16xf32> to vector<1x16x16xf32>
      %289 = vector.broadcast %283 : f32 to vector<1x16x16xf32>
      %290 = arith.mulf %289, %288 : vector<1x16x16xf32>
      %291 = arith.addf %279, %290 : vector<1x16x16xf32>
      %c8_140 = arith.constant 8 : index
      %292 = memref.load %arg2[%c8_140] : memref<99xf32, #tpu.memory_space<smem>>
      %c57 = arith.constant 57 : index
      %293 = memref.load %arg2[%c57] : memref<99xf32, #tpu.memory_space<smem>>
      %294 = vector.extract_strided_slice %280 {offsets = [0, 1, 0], sizes = [1, 16, 16], strides = [1, 1, 1]} : vector<1x22x16xf32> to vector<1x16x16xf32>
      %295 = vector.broadcast %292 : f32 to vector<1x16x16xf32>
      %296 = arith.mulf %295, %294 : vector<1x16x16xf32>
      %297 = arith.addf %287, %296 : vector<1x16x16xf32>
      %298 = vector.extract_strided_slice %281 {offsets = [0, 1, 0], sizes = [1, 16, 16], strides = [1, 1, 1]} : vector<1x22x16xf32> to vector<1x16x16xf32>
      %299 = vector.broadcast %293 : f32 to vector<1x16x16xf32>
      %300 = arith.mulf %299, %298 : vector<1x16x16xf32>
      %301 = arith.addf %291, %300 : vector<1x16x16xf32>
      %c15_141 = arith.constant 15 : index
      %302 = memref.load %arg2[%c15_141] : memref<99xf32, #tpu.memory_space<smem>>
      %c64 = arith.constant 64 : index
      %303 = memref.load %arg2[%c64] : memref<99xf32, #tpu.memory_space<smem>>
      %304 = vector.extract_strided_slice %280 {offsets = [0, 2, 0], sizes = [1, 16, 16], strides = [1, 1, 1]} : vector<1x22x16xf32> to vector<1x16x16xf32>
      %305 = vector.broadcast %302 : f32 to vector<1x16x16xf32>
      %306 = arith.mulf %305, %304 : vector<1x16x16xf32>
      %307 = arith.addf %297, %306 : vector<1x16x16xf32>
      %308 = vector.extract_strided_slice %281 {offsets = [0, 2, 0], sizes = [1, 16, 16], strides = [1, 1, 1]} : vector<1x22x16xf32> to vector<1x16x16xf32>
      %309 = vector.broadcast %303 : f32 to vector<1x16x16xf32>
      %310 = arith.mulf %309, %308 : vector<1x16x16xf32>
      %311 = arith.addf %301, %310 : vector<1x16x16xf32>
      %c22 = arith.constant 22 : index
      %312 = memref.load %arg2[%c22] : memref<99xf32, #tpu.memory_space<smem>>
      %c71 = arith.constant 71 : index
      %313 = memref.load %arg2[%c71] : memref<99xf32, #tpu.memory_space<smem>>
      %314 = vector.extract_strided_slice %280 {offsets = [0, 3, 0], sizes = [1, 16, 16], strides = [1, 1, 1]} : vector<1x22x16xf32> to vector<1x16x16xf32>
      %315 = vector.broadcast %312 : f32 to vector<1x16x16xf32>
      %316 = arith.mulf %315, %314 : vector<1x16x16xf32>
      %317 = arith.addf %307, %316 : vector<1x16x16xf32>
      %318 = vector.extract_strided_slice %281 {offsets = [0, 3, 0], sizes = [1, 16, 16], strides = [1, 1, 1]} : vector<1x22x16xf32> to vector<1x16x16xf32>
      %319 = vector.broadcast %313 : f32 to vector<1x16x16xf32>
      %320 = arith.mulf %319, %318 : vector<1x16x16xf32>
      %321 = arith.addf %311, %320 : vector<1x16x16xf32>
      %c29 = arith.constant 29 : index
      %322 = memref.load %arg2[%c29] : memref<99xf32, #tpu.memory_space<smem>>
      %c78 = arith.constant 78 : index
      %323 = memref.load %arg2[%c78] : memref<99xf32, #tpu.memory_space<smem>>
      %324 = vector.extract_strided_slice %280 {offsets = [0, 4, 0], sizes = [1, 16, 16], strides = [1, 1, 1]} : vector<1x22x16xf32> to vector<1x16x16xf32>
      %325 = vector.broadcast %322 : f32 to vector<1x16x16xf32>
      %326 = arith.mulf %325, %324 : vector<1x16x16xf32>
      %327 = arith.addf %317, %326 : vector<1x16x16xf32>
      %328 = vector.extract_strided_slice %281 {offsets = [0, 4, 0], sizes = [1, 16, 16], strides = [1, 1, 1]} : vector<1x22x16xf32> to vector<1x16x16xf32>
      %329 = vector.broadcast %323 : f32 to vector<1x16x16xf32>
      %330 = arith.mulf %329, %328 : vector<1x16x16xf32>
      %331 = arith.addf %321, %330 : vector<1x16x16xf32>
      %c36 = arith.constant 36 : index
      %332 = memref.load %arg2[%c36] : memref<99xf32, #tpu.memory_space<smem>>
      %c85 = arith.constant 85 : index
      %333 = memref.load %arg2[%c85] : memref<99xf32, #tpu.memory_space<smem>>
      %334 = vector.extract_strided_slice %280 {offsets = [0, 5, 0], sizes = [1, 16, 16], strides = [1, 1, 1]} : vector<1x22x16xf32> to vector<1x16x16xf32>
      %335 = vector.broadcast %332 : f32 to vector<1x16x16xf32>
      %336 = arith.mulf %335, %334 : vector<1x16x16xf32>
      %337 = arith.addf %327, %336 : vector<1x16x16xf32>
      %338 = vector.extract_strided_slice %281 {offsets = [0, 5, 0], sizes = [1, 16, 16], strides = [1, 1, 1]} : vector<1x22x16xf32> to vector<1x16x16xf32>
      %339 = vector.broadcast %333 : f32 to vector<1x16x16xf32>
      %340 = arith.mulf %339, %338 : vector<1x16x16xf32>
      %341 = arith.addf %331, %340 : vector<1x16x16xf32>
      %c43 = arith.constant 43 : index
      %342 = memref.load %arg2[%c43] : memref<99xf32, #tpu.memory_space<smem>>
      %c92 = arith.constant 92 : index
      %343 = memref.load %arg2[%c92] : memref<99xf32, #tpu.memory_space<smem>>
      %344 = vector.extract_strided_slice %280 {offsets = [0, 6, 0], sizes = [1, 16, 16], strides = [1, 1, 1]} : vector<1x22x16xf32> to vector<1x16x16xf32>
      %345 = vector.broadcast %342 : f32 to vector<1x16x16xf32>
      %346 = arith.mulf %345, %344 : vector<1x16x16xf32>
      %347 = arith.addf %337, %346 : vector<1x16x16xf32>
      %348 = vector.extract_strided_slice %281 {offsets = [0, 6, 0], sizes = [1, 16, 16], strides = [1, 1, 1]} : vector<1x22x16xf32> to vector<1x16x16xf32>
      %349 = vector.broadcast %343 : f32 to vector<1x16x16xf32>
      %350 = arith.mulf %349, %348 : vector<1x16x16xf32>
      %351 = arith.addf %341, %350 : vector<1x16x16xf32>
      %c0_142 = arith.constant 0 : index
      %c0_143 = arith.constant 0 : index
      %c2_144 = arith.constant 2 : index
      %352 = vector.load %arg7[%c0_142, %c0_143, %c2_144] : memref<1x22x22xf32, #tpu.memory_space<vmem>>, vector<1x22x16xf32>
      %c0_145 = arith.constant 0 : index
      %c0_146 = arith.constant 0 : index
      %c2_147 = arith.constant 2 : index
      %353 = vector.load %arg8[%c0_145, %c0_146, %c2_147] : memref<1x22x22xf32, #tpu.memory_space<vmem>>, vector<1x22x16xf32>
      %c2_148 = arith.constant 2 : index
      %354 = memref.load %arg2[%c2_148] : memref<99xf32, #tpu.memory_space<smem>>
      %c51 = arith.constant 51 : index
      %355 = memref.load %arg2[%c51] : memref<99xf32, #tpu.memory_space<smem>>
      %356 = vector.extract_strided_slice %352 {offsets = [0, 0, 0], sizes = [1, 16, 16], strides = [1, 1, 1]} : vector<1x22x16xf32> to vector<1x16x16xf32>
      %357 = vector.broadcast %354 : f32 to vector<1x16x16xf32>
      %358 = arith.mulf %357, %356 : vector<1x16x16xf32>
      %359 = arith.addf %347, %358 : vector<1x16x16xf32>
      %360 = vector.extract_strided_slice %353 {offsets = [0, 0, 0], sizes = [1, 16, 16], strides = [1, 1, 1]} : vector<1x22x16xf32> to vector<1x16x16xf32>
      %361 = vector.broadcast %355 : f32 to vector<1x16x16xf32>
      %362 = arith.mulf %361, %360 : vector<1x16x16xf32>
      %363 = arith.addf %351, %362 : vector<1x16x16xf32>
      %c9_149 = arith.constant 9 : index
      %364 = memref.load %arg2[%c9_149] : memref<99xf32, #tpu.memory_space<smem>>
      %c58 = arith.constant 58 : index
      %365 = memref.load %arg2[%c58] : memref<99xf32, #tpu.memory_space<smem>>
      %366 = vector.extract_strided_slice %352 {offsets = [0, 1, 0], sizes = [1, 16, 16], strides = [1, 1, 1]} : vector<1x22x16xf32> to vector<1x16x16xf32>
      %367 = vector.broadcast %364 : f32 to vector<1x16x16xf32>
      %368 = arith.mulf %367, %366 : vector<1x16x16xf32>
      %369 = arith.addf %359, %368 : vector<1x16x16xf32>
      %370 = vector.extract_strided_slice %353 {offsets = [0, 1, 0], sizes = [1, 16, 16], strides = [1, 1, 1]} : vector<1x22x16xf32> to vector<1x16x16xf32>
      %371 = vector.broadcast %365 : f32 to vector<1x16x16xf32>
      %372 = arith.mulf %371, %370 : vector<1x16x16xf32>
      %373 = arith.addf %363, %372 : vector<1x16x16xf32>
      %c16_150 = arith.constant 16 : index
      %374 = memref.load %arg2[%c16_150] : memref<99xf32, #tpu.memory_space<smem>>
      %c65 = arith.constant 65 : index
      %375 = memref.load %arg2[%c65] : memref<99xf32, #tpu.memory_space<smem>>
      %376 = vector.extract_strided_slice %352 {offsets = [0, 2, 0], sizes = [1, 16, 16], strides = [1, 1, 1]} : vector<1x22x16xf32> to vector<1x16x16xf32>
      %377 = vector.broadcast %374 : f32 to vector<1x16x16xf32>
      %378 = arith.mulf %377, %376 : vector<1x16x16xf32>
      %379 = arith.addf %369, %378 : vector<1x16x16xf32>
      %380 = vector.extract_strided_slice %353 {offsets = [0, 2, 0], sizes = [1, 16, 16], strides = [1, 1, 1]} : vector<1x22x16xf32> to vector<1x16x16xf32>
      %381 = vector.broadcast %375 : f32 to vector<1x16x16xf32>
      %382 = arith.mulf %381, %380 : vector<1x16x16xf32>
      %383 = arith.addf %373, %382 : vector<1x16x16xf32>
      %c23 = arith.constant 23 : index
      %384 = memref.load %arg2[%c23] : memref<99xf32, #tpu.memory_space<smem>>
      %c72 = arith.constant 72 : index
      %385 = memref.load %arg2[%c72] : memref<99xf32, #tpu.memory_space<smem>>
      %386 = vector.extract_strided_slice %352 {offsets = [0, 3, 0], sizes = [1, 16, 16], strides = [1, 1, 1]} : vector<1x22x16xf32> to vector<1x16x16xf32>
      %387 = vector.broadcast %384 : f32 to vector<1x16x16xf32>
      %388 = arith.mulf %387, %386 : vector<1x16x16xf32>
      %389 = arith.addf %379, %388 : vector<1x16x16xf32>
      %390 = vector.extract_strided_slice %353 {offsets = [0, 3, 0], sizes = [1, 16, 16], strides = [1, 1, 1]} : vector<1x22x16xf32> to vector<1x16x16xf32>
      %391 = vector.broadcast %385 : f32 to vector<1x16x16xf32>
      %392 = arith.mulf %391, %390 : vector<1x16x16xf32>
      %393 = arith.addf %383, %392 : vector<1x16x16xf32>
      %c30 = arith.constant 30 : index
      %394 = memref.load %arg2[%c30] : memref<99xf32, #tpu.memory_space<smem>>
      %c79 = arith.constant 79 : index
      %395 = memref.load %arg2[%c79] : memref<99xf32, #tpu.memory_space<smem>>
      %396 = vector.extract_strided_slice %352 {offsets = [0, 4, 0], sizes = [1, 16, 16], strides = [1, 1, 1]} : vector<1x22x16xf32> to vector<1x16x16xf32>
      %397 = vector.broadcast %394 : f32 to vector<1x16x16xf32>
      %398 = arith.mulf %397, %396 : vector<1x16x16xf32>
      %399 = arith.addf %389, %398 : vector<1x16x16xf32>
      %400 = vector.extract_strided_slice %353 {offsets = [0, 4, 0], sizes = [1, 16, 16], strides = [1, 1, 1]} : vector<1x22x16xf32> to vector<1x16x16xf32>
      %401 = vector.broadcast %395 : f32 to vector<1x16x16xf32>
      %402 = arith.mulf %401, %400 : vector<1x16x16xf32>
      %403 = arith.addf %393, %402 : vector<1x16x16xf32>
      %c37 = arith.constant 37 : index
      %404 = memref.load %arg2[%c37] : memref<99xf32, #tpu.memory_space<smem>>
      %c86 = arith.constant 86 : index
      %405 = memref.load %arg2[%c86] : memref<99xf32, #tpu.memory_space<smem>>
      %406 = vector.extract_strided_slice %352 {offsets = [0, 5, 0], sizes = [1, 16, 16], strides = [1, 1, 1]} : vector<1x22x16xf32> to vector<1x16x16xf32>
      %407 = vector.broadcast %404 : f32 to vector<1x16x16xf32>
      %408 = arith.mulf %407, %406 : vector<1x16x16xf32>
      %409 = arith.addf %399, %408 : vector<1x16x16xf32>
      %410 = vector.extract_strided_slice %353 {offsets = [0, 5, 0], sizes = [1, 16, 16], strides = [1, 1, 1]} : vector<1x22x16xf32> to vector<1x16x16xf32>
      %411 = vector.broadcast %405 : f32 to vector<1x16x16xf32>
      %412 = arith.mulf %411, %410 : vector<1x16x16xf32>
      %413 = arith.addf %403, %412 : vector<1x16x16xf32>
      %c44 = arith.constant 44 : index
      %414 = memref.load %arg2[%c44] : memref<99xf32, #tpu.memory_space<smem>>
      %c93 = arith.constant 93 : index
      %415 = memref.load %arg2[%c93] : memref<99xf32, #tpu.memory_space<smem>>
      %416 = vector.extract_strided_slice %352 {offsets = [0, 6, 0], sizes = [1, 16, 16], strides = [1, 1, 1]} : vector<1x22x16xf32> to vector<1x16x16xf32>
      %417 = vector.broadcast %414 : f32 to vector<1x16x16xf32>
      %418 = arith.mulf %417, %416 : vector<1x16x16xf32>
      %419 = arith.addf %409, %418 : vector<1x16x16xf32>
      %420 = vector.extract_strided_slice %353 {offsets = [0, 6, 0], sizes = [1, 16, 16], strides = [1, 1, 1]} : vector<1x22x16xf32> to vector<1x16x16xf32>
      %421 = vector.broadcast %415 : f32 to vector<1x16x16xf32>
      %422 = arith.mulf %421, %420 : vector<1x16x16xf32>
      %423 = arith.addf %413, %422 : vector<1x16x16xf32>
      %c0_151 = arith.constant 0 : index
      %c0_152 = arith.constant 0 : index
      %c3_153 = arith.constant 3 : index
      %424 = vector.load %arg7[%c0_151, %c0_152, %c3_153] : memref<1x22x22xf32, #tpu.memory_space<vmem>>, vector<1x22x16xf32>
      %c0_154 = arith.constant 0 : index
      %c0_155 = arith.constant 0 : index
      %c3_156 = arith.constant 3 : index
      %425 = vector.load %arg8[%c0_154, %c0_155, %c3_156] : memref<1x22x22xf32, #tpu.memory_space<vmem>>, vector<1x22x16xf32>
      %c3_157 = arith.constant 3 : index
      %426 = memref.load %arg2[%c3_157] : memref<99xf32, #tpu.memory_space<smem>>
      %c52 = arith.constant 52 : index
      %427 = memref.load %arg2[%c52] : memref<99xf32, #tpu.memory_space<smem>>
      %428 = vector.extract_strided_slice %424 {offsets = [0, 0, 0], sizes = [1, 16, 16], strides = [1, 1, 1]} : vector<1x22x16xf32> to vector<1x16x16xf32>
      %429 = vector.broadcast %426 : f32 to vector<1x16x16xf32>
      %430 = arith.mulf %429, %428 : vector<1x16x16xf32>
      %431 = arith.addf %419, %430 : vector<1x16x16xf32>
      %432 = vector.extract_strided_slice %425 {offsets = [0, 0, 0], sizes = [1, 16, 16], strides = [1, 1, 1]} : vector<1x22x16xf32> to vector<1x16x16xf32>
      %433 = vector.broadcast %427 : f32 to vector<1x16x16xf32>
      %434 = arith.mulf %433, %432 : vector<1x16x16xf32>
      %435 = arith.addf %423, %434 : vector<1x16x16xf32>
      %c10_158 = arith.constant 10 : index
      %436 = memref.load %arg2[%c10_158] : memref<99xf32, #tpu.memory_space<smem>>
      %c59 = arith.constant 59 : index
      %437 = memref.load %arg2[%c59] : memref<99xf32, #tpu.memory_space<smem>>
      %438 = vector.extract_strided_slice %424 {offsets = [0, 1, 0], sizes = [1, 16, 16], strides = [1, 1, 1]} : vector<1x22x16xf32> to vector<1x16x16xf32>
      %439 = vector.broadcast %436 : f32 to vector<1x16x16xf32>
      %440 = arith.mulf %439, %438 : vector<1x16x16xf32>
      %441 = arith.addf %431, %440 : vector<1x16x16xf32>
      %442 = vector.extract_strided_slice %425 {offsets = [0, 1, 0], sizes = [1, 16, 16], strides = [1, 1, 1]} : vector<1x22x16xf32> to vector<1x16x16xf32>
      %443 = vector.broadcast %437 : f32 to vector<1x16x16xf32>
      %444 = arith.mulf %443, %442 : vector<1x16x16xf32>
      %445 = arith.addf %435, %444 : vector<1x16x16xf32>
      %c17_159 = arith.constant 17 : index
      %446 = memref.load %arg2[%c17_159] : memref<99xf32, #tpu.memory_space<smem>>
      %c66 = arith.constant 66 : index
      %447 = memref.load %arg2[%c66] : memref<99xf32, #tpu.memory_space<smem>>
      %448 = vector.extract_strided_slice %424 {offsets = [0, 2, 0], sizes = [1, 16, 16], strides = [1, 1, 1]} : vector<1x22x16xf32> to vector<1x16x16xf32>
      %449 = vector.broadcast %446 : f32 to vector<1x16x16xf32>
      %450 = arith.mulf %449, %448 : vector<1x16x16xf32>
      %451 = arith.addf %441, %450 : vector<1x16x16xf32>
      %452 = vector.extract_strided_slice %425 {offsets = [0, 2, 0], sizes = [1, 16, 16], strides = [1, 1, 1]} : vector<1x22x16xf32> to vector<1x16x16xf32>
      %453 = vector.broadcast %447 : f32 to vector<1x16x16xf32>
      %454 = arith.mulf %453, %452 : vector<1x16x16xf32>
      %455 = arith.addf %445, %454 : vector<1x16x16xf32>
      %c24 = arith.constant 24 : index
      %456 = memref.load %arg2[%c24] : memref<99xf32, #tpu.memory_space<smem>>
      %c73 = arith.constant 73 : index
      %457 = memref.load %arg2[%c73] : memref<99xf32, #tpu.memory_space<smem>>
      %458 = vector.extract_strided_slice %424 {offsets = [0, 3, 0], sizes = [1, 16, 16], strides = [1, 1, 1]} : vector<1x22x16xf32> to vector<1x16x16xf32>
      %459 = vector.broadcast %456 : f32 to vector<1x16x16xf32>
      %460 = arith.mulf %459, %458 : vector<1x16x16xf32>
      %461 = arith.addf %451, %460 : vector<1x16x16xf32>
      %462 = vector.extract_strided_slice %425 {offsets = [0, 3, 0], sizes = [1, 16, 16], strides = [1, 1, 1]} : vector<1x22x16xf32> to vector<1x16x16xf32>
      %463 = vector.broadcast %457 : f32 to vector<1x16x16xf32>
      %464 = arith.mulf %463, %462 : vector<1x16x16xf32>
      %465 = arith.addf %455, %464 : vector<1x16x16xf32>
      %c31 = arith.constant 31 : index
      %466 = memref.load %arg2[%c31] : memref<99xf32, #tpu.memory_space<smem>>
      %c80 = arith.constant 80 : index
      %467 = memref.load %arg2[%c80] : memref<99xf32, #tpu.memory_space<smem>>
      %468 = vector.extract_strided_slice %424 {offsets = [0, 4, 0], sizes = [1, 16, 16], strides = [1, 1, 1]} : vector<1x22x16xf32> to vector<1x16x16xf32>
      %469 = vector.broadcast %466 : f32 to vector<1x16x16xf32>
      %470 = arith.mulf %469, %468 : vector<1x16x16xf32>
      %471 = arith.addf %461, %470 : vector<1x16x16xf32>
      %472 = vector.extract_strided_slice %425 {offsets = [0, 4, 0], sizes = [1, 16, 16], strides = [1, 1, 1]} : vector<1x22x16xf32> to vector<1x16x16xf32>
      %473 = vector.broadcast %467 : f32 to vector<1x16x16xf32>
      %474 = arith.mulf %473, %472 : vector<1x16x16xf32>
      %475 = arith.addf %465, %474 : vector<1x16x16xf32>
      %c38 = arith.constant 38 : index
      %476 = memref.load %arg2[%c38] : memref<99xf32, #tpu.memory_space<smem>>
      %c87 = arith.constant 87 : index
      %477 = memref.load %arg2[%c87] : memref<99xf32, #tpu.memory_space<smem>>
      %478 = vector.extract_strided_slice %424 {offsets = [0, 5, 0], sizes = [1, 16, 16], strides = [1, 1, 1]} : vector<1x22x16xf32> to vector<1x16x16xf32>
      %479 = vector.broadcast %476 : f32 to vector<1x16x16xf32>
      %480 = arith.mulf %479, %478 : vector<1x16x16xf32>
      %481 = arith.addf %471, %480 : vector<1x16x16xf32>
      %482 = vector.extract_strided_slice %425 {offsets = [0, 5, 0], sizes = [1, 16, 16], strides = [1, 1, 1]} : vector<1x22x16xf32> to vector<1x16x16xf32>
      %483 = vector.broadcast %477 : f32 to vector<1x16x16xf32>
      %484 = arith.mulf %483, %482 : vector<1x16x16xf32>
      %485 = arith.addf %475, %484 : vector<1x16x16xf32>
      %c45 = arith.constant 45 : index
      %486 = memref.load %arg2[%c45] : memref<99xf32, #tpu.memory_space<smem>>
      %c94 = arith.constant 94 : index
      %487 = memref.load %arg2[%c94] : memref<99xf32, #tpu.memory_space<smem>>
      %488 = vector.extract_strided_slice %424 {offsets = [0, 6, 0], sizes = [1, 16, 16], strides = [1, 1, 1]} : vector<1x22x16xf32> to vector<1x16x16xf32>
      %489 = vector.broadcast %486 : f32 to vector<1x16x16xf32>
      %490 = arith.mulf %489, %488 : vector<1x16x16xf32>
      %491 = arith.addf %481, %490 : vector<1x16x16xf32>
      %492 = vector.extract_strided_slice %425 {offsets = [0, 6, 0], sizes = [1, 16, 16], strides = [1, 1, 1]} : vector<1x22x16xf32> to vector<1x16x16xf32>
      %493 = vector.broadcast %487 : f32 to vector<1x16x16xf32>
      %494 = arith.mulf %493, %492 : vector<1x16x16xf32>
      %495 = arith.addf %485, %494 : vector<1x16x16xf32>
      %c0_160 = arith.constant 0 : index
      %c0_161 = arith.constant 0 : index
      %c4_162 = arith.constant 4 : index
      %496 = vector.load %arg7[%c0_160, %c0_161, %c4_162] : memref<1x22x22xf32, #tpu.memory_space<vmem>>, vector<1x22x16xf32>
      %c0_163 = arith.constant 0 : index
      %c0_164 = arith.constant 0 : index
      %c4_165 = arith.constant 4 : index
      %497 = vector.load %arg8[%c0_163, %c0_164, %c4_165] : memref<1x22x22xf32, #tpu.memory_space<vmem>>, vector<1x22x16xf32>
      %c4_166 = arith.constant 4 : index
      %498 = memref.load %arg2[%c4_166] : memref<99xf32, #tpu.memory_space<smem>>
      %c53 = arith.constant 53 : index
      %499 = memref.load %arg2[%c53] : memref<99xf32, #tpu.memory_space<smem>>
      %500 = vector.extract_strided_slice %496 {offsets = [0, 0, 0], sizes = [1, 16, 16], strides = [1, 1, 1]} : vector<1x22x16xf32> to vector<1x16x16xf32>
      %501 = vector.broadcast %498 : f32 to vector<1x16x16xf32>
      %502 = arith.mulf %501, %500 : vector<1x16x16xf32>
      %503 = arith.addf %491, %502 : vector<1x16x16xf32>
      %504 = vector.extract_strided_slice %497 {offsets = [0, 0, 0], sizes = [1, 16, 16], strides = [1, 1, 1]} : vector<1x22x16xf32> to vector<1x16x16xf32>
      %505 = vector.broadcast %499 : f32 to vector<1x16x16xf32>
      %506 = arith.mulf %505, %504 : vector<1x16x16xf32>
      %507 = arith.addf %495, %506 : vector<1x16x16xf32>
      %c11_167 = arith.constant 11 : index
      %508 = memref.load %arg2[%c11_167] : memref<99xf32, #tpu.memory_space<smem>>
      %c60 = arith.constant 60 : index
      %509 = memref.load %arg2[%c60] : memref<99xf32, #tpu.memory_space<smem>>
      %510 = vector.extract_strided_slice %496 {offsets = [0, 1, 0], sizes = [1, 16, 16], strides = [1, 1, 1]} : vector<1x22x16xf32> to vector<1x16x16xf32>
      %511 = vector.broadcast %508 : f32 to vector<1x16x16xf32>
      %512 = arith.mulf %511, %510 : vector<1x16x16xf32>
      %513 = arith.addf %503, %512 : vector<1x16x16xf32>
      %514 = vector.extract_strided_slice %497 {offsets = [0, 1, 0], sizes = [1, 16, 16], strides = [1, 1, 1]} : vector<1x22x16xf32> to vector<1x16x16xf32>
      %515 = vector.broadcast %509 : f32 to vector<1x16x16xf32>
      %516 = arith.mulf %515, %514 : vector<1x16x16xf32>
      %517 = arith.addf %507, %516 : vector<1x16x16xf32>
      %c18_168 = arith.constant 18 : index
      %518 = memref.load %arg2[%c18_168] : memref<99xf32, #tpu.memory_space<smem>>
      %c67 = arith.constant 67 : index
      %519 = memref.load %arg2[%c67] : memref<99xf32, #tpu.memory_space<smem>>
      %520 = vector.extract_strided_slice %496 {offsets = [0, 2, 0], sizes = [1, 16, 16], strides = [1, 1, 1]} : vector<1x22x16xf32> to vector<1x16x16xf32>
      %521 = vector.broadcast %518 : f32 to vector<1x16x16xf32>
      %522 = arith.mulf %521, %520 : vector<1x16x16xf32>
      %523 = arith.addf %513, %522 : vector<1x16x16xf32>
      %524 = vector.extract_strided_slice %497 {offsets = [0, 2, 0], sizes = [1, 16, 16], strides = [1, 1, 1]} : vector<1x22x16xf32> to vector<1x16x16xf32>
      %525 = vector.broadcast %519 : f32 to vector<1x16x16xf32>
      %526 = arith.mulf %525, %524 : vector<1x16x16xf32>
      %527 = arith.addf %517, %526 : vector<1x16x16xf32>
      %c25 = arith.constant 25 : index
      %528 = memref.load %arg2[%c25] : memref<99xf32, #tpu.memory_space<smem>>
      %c74 = arith.constant 74 : index
      %529 = memref.load %arg2[%c74] : memref<99xf32, #tpu.memory_space<smem>>
      %530 = vector.extract_strided_slice %496 {offsets = [0, 3, 0], sizes = [1, 16, 16], strides = [1, 1, 1]} : vector<1x22x16xf32> to vector<1x16x16xf32>
      %531 = vector.broadcast %528 : f32 to vector<1x16x16xf32>
      %532 = arith.mulf %531, %530 : vector<1x16x16xf32>
      %533 = arith.addf %523, %532 : vector<1x16x16xf32>
      %534 = vector.extract_strided_slice %497 {offsets = [0, 3, 0], sizes = [1, 16, 16], strides = [1, 1, 1]} : vector<1x22x16xf32> to vector<1x16x16xf32>
      %535 = vector.broadcast %529 : f32 to vector<1x16x16xf32>
      %536 = arith.mulf %535, %534 : vector<1x16x16xf32>
      %537 = arith.addf %527, %536 : vector<1x16x16xf32>
      %c32 = arith.constant 32 : index
      %538 = memref.load %arg2[%c32] : memref<99xf32, #tpu.memory_space<smem>>
      %c81 = arith.constant 81 : index
      %539 = memref.load %arg2[%c81] : memref<99xf32, #tpu.memory_space<smem>>
      %540 = vector.extract_strided_slice %496 {offsets = [0, 4, 0], sizes = [1, 16, 16], strides = [1, 1, 1]} : vector<1x22x16xf32> to vector<1x16x16xf32>
      %541 = vector.broadcast %538 : f32 to vector<1x16x16xf32>
      %542 = arith.mulf %541, %540 : vector<1x16x16xf32>
      %543 = arith.addf %533, %542 : vector<1x16x16xf32>
      %544 = vector.extract_strided_slice %497 {offsets = [0, 4, 0], sizes = [1, 16, 16], strides = [1, 1, 1]} : vector<1x22x16xf32> to vector<1x16x16xf32>
      %545 = vector.broadcast %539 : f32 to vector<1x16x16xf32>
      %546 = arith.mulf %545, %544 : vector<1x16x16xf32>
      %547 = arith.addf %537, %546 : vector<1x16x16xf32>
      %c39 = arith.constant 39 : index
      %548 = memref.load %arg2[%c39] : memref<99xf32, #tpu.memory_space<smem>>
      %c88 = arith.constant 88 : index
      %549 = memref.load %arg2[%c88] : memref<99xf32, #tpu.memory_space<smem>>
      %550 = vector.extract_strided_slice %496 {offsets = [0, 5, 0], sizes = [1, 16, 16], strides = [1, 1, 1]} : vector<1x22x16xf32> to vector<1x16x16xf32>
      %551 = vector.broadcast %548 : f32 to vector<1x16x16xf32>
      %552 = arith.mulf %551, %550 : vector<1x16x16xf32>
      %553 = arith.addf %543, %552 : vector<1x16x16xf32>
      %554 = vector.extract_strided_slice %497 {offsets = [0, 5, 0], sizes = [1, 16, 16], strides = [1, 1, 1]} : vector<1x22x16xf32> to vector<1x16x16xf32>
      %555 = vector.broadcast %549 : f32 to vector<1x16x16xf32>
      %556 = arith.mulf %555, %554 : vector<1x16x16xf32>
      %557 = arith.addf %547, %556 : vector<1x16x16xf32>
      %c46 = arith.constant 46 : index
      %558 = memref.load %arg2[%c46] : memref<99xf32, #tpu.memory_space<smem>>
      %c95 = arith.constant 95 : index
      %559 = memref.load %arg2[%c95] : memref<99xf32, #tpu.memory_space<smem>>
      %560 = vector.extract_strided_slice %496 {offsets = [0, 6, 0], sizes = [1, 16, 16], strides = [1, 1, 1]} : vector<1x22x16xf32> to vector<1x16x16xf32>
      %561 = vector.broadcast %558 : f32 to vector<1x16x16xf32>
      %562 = arith.mulf %561, %560 : vector<1x16x16xf32>
      %563 = arith.addf %553, %562 : vector<1x16x16xf32>
      %564 = vector.extract_strided_slice %497 {offsets = [0, 6, 0], sizes = [1, 16, 16], strides = [1, 1, 1]} : vector<1x22x16xf32> to vector<1x16x16xf32>
      %565 = vector.broadcast %559 : f32 to vector<1x16x16xf32>
      %566 = arith.mulf %565, %564 : vector<1x16x16xf32>
      %567 = arith.addf %557, %566 : vector<1x16x16xf32>
      %c0_169 = arith.constant 0 : index
      %c0_170 = arith.constant 0 : index
      %c5_171 = arith.constant 5 : index
      %568 = vector.load %arg7[%c0_169, %c0_170, %c5_171] : memref<1x22x22xf32, #tpu.memory_space<vmem>>, vector<1x22x16xf32>
      %c0_172 = arith.constant 0 : index
      %c0_173 = arith.constant 0 : index
      %c5_174 = arith.constant 5 : index
      %569 = vector.load %arg8[%c0_172, %c0_173, %c5_174] : memref<1x22x22xf32, #tpu.memory_space<vmem>>, vector<1x22x16xf32>
      %c5_175 = arith.constant 5 : index
      %570 = memref.load %arg2[%c5_175] : memref<99xf32, #tpu.memory_space<smem>>
      %c54 = arith.constant 54 : index
      %571 = memref.load %arg2[%c54] : memref<99xf32, #tpu.memory_space<smem>>
      %572 = vector.extract_strided_slice %568 {offsets = [0, 0, 0], sizes = [1, 16, 16], strides = [1, 1, 1]} : vector<1x22x16xf32> to vector<1x16x16xf32>
      %573 = vector.broadcast %570 : f32 to vector<1x16x16xf32>
      %574 = arith.mulf %573, %572 : vector<1x16x16xf32>
      %575 = arith.addf %563, %574 : vector<1x16x16xf32>
      %576 = vector.extract_strided_slice %569 {offsets = [0, 0, 0], sizes = [1, 16, 16], strides = [1, 1, 1]} : vector<1x22x16xf32> to vector<1x16x16xf32>
      %577 = vector.broadcast %571 : f32 to vector<1x16x16xf32>
      %578 = arith.mulf %577, %576 : vector<1x16x16xf32>
      %579 = arith.addf %567, %578 : vector<1x16x16xf32>
      %c12_176 = arith.constant 12 : index
      %580 = memref.load %arg2[%c12_176] : memref<99xf32, #tpu.memory_space<smem>>
      %c61 = arith.constant 61 : index
      %581 = memref.load %arg2[%c61] : memref<99xf32, #tpu.memory_space<smem>>
      %582 = vector.extract_strided_slice %568 {offsets = [0, 1, 0], sizes = [1, 16, 16], strides = [1, 1, 1]} : vector<1x22x16xf32> to vector<1x16x16xf32>
      %583 = vector.broadcast %580 : f32 to vector<1x16x16xf32>
      %584 = arith.mulf %583, %582 : vector<1x16x16xf32>
      %585 = arith.addf %575, %584 : vector<1x16x16xf32>
      %586 = vector.extract_strided_slice %569 {offsets = [0, 1, 0], sizes = [1, 16, 16], strides = [1, 1, 1]} : vector<1x22x16xf32> to vector<1x16x16xf32>
      %587 = vector.broadcast %581 : f32 to vector<1x16x16xf32>
      %588 = arith.mulf %587, %586 : vector<1x16x16xf32>
      %589 = arith.addf %579, %588 : vector<1x16x16xf32>
      %c19 = arith.constant 19 : index
      %590 = memref.load %arg2[%c19] : memref<99xf32, #tpu.memory_space<smem>>
      %c68 = arith.constant 68 : index
      %591 = memref.load %arg2[%c68] : memref<99xf32, #tpu.memory_space<smem>>
      %592 = vector.extract_strided_slice %568 {offsets = [0, 2, 0], sizes = [1, 16, 16], strides = [1, 1, 1]} : vector<1x22x16xf32> to vector<1x16x16xf32>
      %593 = vector.broadcast %590 : f32 to vector<1x16x16xf32>
      %594 = arith.mulf %593, %592 : vector<1x16x16xf32>
      %595 = arith.addf %585, %594 : vector<1x16x16xf32>
      %596 = vector.extract_strided_slice %569 {offsets = [0, 2, 0], sizes = [1, 16, 16], strides = [1, 1, 1]} : vector<1x22x16xf32> to vector<1x16x16xf32>
      %597 = vector.broadcast %591 : f32 to vector<1x16x16xf32>
      %598 = arith.mulf %597, %596 : vector<1x16x16xf32>
      %599 = arith.addf %589, %598 : vector<1x16x16xf32>
      %c26 = arith.constant 26 : index
      %600 = memref.load %arg2[%c26] : memref<99xf32, #tpu.memory_space<smem>>
      %c75 = arith.constant 75 : index
      %601 = memref.load %arg2[%c75] : memref<99xf32, #tpu.memory_space<smem>>
      %602 = vector.extract_strided_slice %568 {offsets = [0, 3, 0], sizes = [1, 16, 16], strides = [1, 1, 1]} : vector<1x22x16xf32> to vector<1x16x16xf32>
      %603 = vector.broadcast %600 : f32 to vector<1x16x16xf32>
      %604 = arith.mulf %603, %602 : vector<1x16x16xf32>
      %605 = arith.addf %595, %604 : vector<1x16x16xf32>
      %606 = vector.extract_strided_slice %569 {offsets = [0, 3, 0], sizes = [1, 16, 16], strides = [1, 1, 1]} : vector<1x22x16xf32> to vector<1x16x16xf32>
      %607 = vector.broadcast %601 : f32 to vector<1x16x16xf32>
      %608 = arith.mulf %607, %606 : vector<1x16x16xf32>
      %609 = arith.addf %599, %608 : vector<1x16x16xf32>
      %c33 = arith.constant 33 : index
      %610 = memref.load %arg2[%c33] : memref<99xf32, #tpu.memory_space<smem>>
      %c82 = arith.constant 82 : index
      %611 = memref.load %arg2[%c82] : memref<99xf32, #tpu.memory_space<smem>>
      %612 = vector.extract_strided_slice %568 {offsets = [0, 4, 0], sizes = [1, 16, 16], strides = [1, 1, 1]} : vector<1x22x16xf32> to vector<1x16x16xf32>
      %613 = vector.broadcast %610 : f32 to vector<1x16x16xf32>
      %614 = arith.mulf %613, %612 : vector<1x16x16xf32>
      %615 = arith.addf %605, %614 : vector<1x16x16xf32>
      %616 = vector.extract_strided_slice %569 {offsets = [0, 4, 0], sizes = [1, 16, 16], strides = [1, 1, 1]} : vector<1x22x16xf32> to vector<1x16x16xf32>
      %617 = vector.broadcast %611 : f32 to vector<1x16x16xf32>
      %618 = arith.mulf %617, %616 : vector<1x16x16xf32>
      %619 = arith.addf %609, %618 : vector<1x16x16xf32>
      %c40 = arith.constant 40 : index
      %620 = memref.load %arg2[%c40] : memref<99xf32, #tpu.memory_space<smem>>
      %c89 = arith.constant 89 : index
      %621 = memref.load %arg2[%c89] : memref<99xf32, #tpu.memory_space<smem>>
      %622 = vector.extract_strided_slice %568 {offsets = [0, 5, 0], sizes = [1, 16, 16], strides = [1, 1, 1]} : vector<1x22x16xf32> to vector<1x16x16xf32>
      %623 = vector.broadcast %620 : f32 to vector<1x16x16xf32>
      %624 = arith.mulf %623, %622 : vector<1x16x16xf32>
      %625 = arith.addf %615, %624 : vector<1x16x16xf32>
      %626 = vector.extract_strided_slice %569 {offsets = [0, 5, 0], sizes = [1, 16, 16], strides = [1, 1, 1]} : vector<1x22x16xf32> to vector<1x16x16xf32>
      %627 = vector.broadcast %621 : f32 to vector<1x16x16xf32>
      %628 = arith.mulf %627, %626 : vector<1x16x16xf32>
      %629 = arith.addf %619, %628 : vector<1x16x16xf32>
      %c47 = arith.constant 47 : index
      %630 = memref.load %arg2[%c47] : memref<99xf32, #tpu.memory_space<smem>>
      %c96 = arith.constant 96 : index
      %631 = memref.load %arg2[%c96] : memref<99xf32, #tpu.memory_space<smem>>
      %632 = vector.extract_strided_slice %568 {offsets = [0, 6, 0], sizes = [1, 16, 16], strides = [1, 1, 1]} : vector<1x22x16xf32> to vector<1x16x16xf32>
      %633 = vector.broadcast %630 : f32 to vector<1x16x16xf32>
      %634 = arith.mulf %633, %632 : vector<1x16x16xf32>
      %635 = arith.addf %625, %634 : vector<1x16x16xf32>
      %636 = vector.extract_strided_slice %569 {offsets = [0, 6, 0], sizes = [1, 16, 16], strides = [1, 1, 1]} : vector<1x22x16xf32> to vector<1x16x16xf32>
      %637 = vector.broadcast %631 : f32 to vector<1x16x16xf32>
      %638 = arith.mulf %637, %636 : vector<1x16x16xf32>
      %639 = arith.addf %629, %638 : vector<1x16x16xf32>
      %c0_177 = arith.constant 0 : index
      %c0_178 = arith.constant 0 : index
      %c6_179 = arith.constant 6 : index
      %640 = vector.load %arg7[%c0_177, %c0_178, %c6_179] : memref<1x22x22xf32, #tpu.memory_space<vmem>>, vector<1x22x16xf32>
      %c0_180 = arith.constant 0 : index
      %c0_181 = arith.constant 0 : index
      %c6_182 = arith.constant 6 : index
      %641 = vector.load %arg8[%c0_180, %c0_181, %c6_182] : memref<1x22x22xf32, #tpu.memory_space<vmem>>, vector<1x22x16xf32>
      %c6_183 = arith.constant 6 : index
      %642 = memref.load %arg2[%c6_183] : memref<99xf32, #tpu.memory_space<smem>>
      %c55 = arith.constant 55 : index
      %643 = memref.load %arg2[%c55] : memref<99xf32, #tpu.memory_space<smem>>
      %644 = vector.extract_strided_slice %640 {offsets = [0, 0, 0], sizes = [1, 16, 16], strides = [1, 1, 1]} : vector<1x22x16xf32> to vector<1x16x16xf32>
      %645 = vector.broadcast %642 : f32 to vector<1x16x16xf32>
      %646 = arith.mulf %645, %644 : vector<1x16x16xf32>
      %647 = arith.addf %635, %646 : vector<1x16x16xf32>
      %648 = vector.extract_strided_slice %641 {offsets = [0, 0, 0], sizes = [1, 16, 16], strides = [1, 1, 1]} : vector<1x22x16xf32> to vector<1x16x16xf32>
      %649 = vector.broadcast %643 : f32 to vector<1x16x16xf32>
      %650 = arith.mulf %649, %648 : vector<1x16x16xf32>
      %651 = arith.addf %639, %650 : vector<1x16x16xf32>
      %c13_184 = arith.constant 13 : index
      %652 = memref.load %arg2[%c13_184] : memref<99xf32, #tpu.memory_space<smem>>
      %c62 = arith.constant 62 : index
      %653 = memref.load %arg2[%c62] : memref<99xf32, #tpu.memory_space<smem>>
      %654 = vector.extract_strided_slice %640 {offsets = [0, 1, 0], sizes = [1, 16, 16], strides = [1, 1, 1]} : vector<1x22x16xf32> to vector<1x16x16xf32>
      %655 = vector.broadcast %652 : f32 to vector<1x16x16xf32>
      %656 = arith.mulf %655, %654 : vector<1x16x16xf32>
      %657 = arith.addf %647, %656 : vector<1x16x16xf32>
      %658 = vector.extract_strided_slice %641 {offsets = [0, 1, 0], sizes = [1, 16, 16], strides = [1, 1, 1]} : vector<1x22x16xf32> to vector<1x16x16xf32>
      %659 = vector.broadcast %653 : f32 to vector<1x16x16xf32>
      %660 = arith.mulf %659, %658 : vector<1x16x16xf32>
      %661 = arith.addf %651, %660 : vector<1x16x16xf32>
      %c20 = arith.constant 20 : index
      %662 = memref.load %arg2[%c20] : memref<99xf32, #tpu.memory_space<smem>>
      %c69 = arith.constant 69 : index
      %663 = memref.load %arg2[%c69] : memref<99xf32, #tpu.memory_space<smem>>
      %664 = vector.extract_strided_slice %640 {offsets = [0, 2, 0], sizes = [1, 16, 16], strides = [1, 1, 1]} : vector<1x22x16xf32> to vector<1x16x16xf32>
      %665 = vector.broadcast %662 : f32 to vector<1x16x16xf32>
      %666 = arith.mulf %665, %664 : vector<1x16x16xf32>
      %667 = arith.addf %657, %666 : vector<1x16x16xf32>
      %668 = vector.extract_strided_slice %641 {offsets = [0, 2, 0], sizes = [1, 16, 16], strides = [1, 1, 1]} : vector<1x22x16xf32> to vector<1x16x16xf32>
      %669 = vector.broadcast %663 : f32 to vector<1x16x16xf32>
      %670 = arith.mulf %669, %668 : vector<1x16x16xf32>
      %671 = arith.addf %661, %670 : vector<1x16x16xf32>
      %c27 = arith.constant 27 : index
      %672 = memref.load %arg2[%c27] : memref<99xf32, #tpu.memory_space<smem>>
      %c76 = arith.constant 76 : index
      %673 = memref.load %arg2[%c76] : memref<99xf32, #tpu.memory_space<smem>>
      %674 = vector.extract_strided_slice %640 {offsets = [0, 3, 0], sizes = [1, 16, 16], strides = [1, 1, 1]} : vector<1x22x16xf32> to vector<1x16x16xf32>
      %675 = vector.broadcast %672 : f32 to vector<1x16x16xf32>
      %676 = arith.mulf %675, %674 : vector<1x16x16xf32>
      %677 = arith.addf %667, %676 : vector<1x16x16xf32>
      %678 = vector.extract_strided_slice %641 {offsets = [0, 3, 0], sizes = [1, 16, 16], strides = [1, 1, 1]} : vector<1x22x16xf32> to vector<1x16x16xf32>
      %679 = vector.broadcast %673 : f32 to vector<1x16x16xf32>
      %680 = arith.mulf %679, %678 : vector<1x16x16xf32>
      %681 = arith.addf %671, %680 : vector<1x16x16xf32>
      %c34 = arith.constant 34 : index
      %682 = memref.load %arg2[%c34] : memref<99xf32, #tpu.memory_space<smem>>
      %c83 = arith.constant 83 : index
      %683 = memref.load %arg2[%c83] : memref<99xf32, #tpu.memory_space<smem>>
      %684 = vector.extract_strided_slice %640 {offsets = [0, 4, 0], sizes = [1, 16, 16], strides = [1, 1, 1]} : vector<1x22x16xf32> to vector<1x16x16xf32>
      %685 = vector.broadcast %682 : f32 to vector<1x16x16xf32>
      %686 = arith.mulf %685, %684 : vector<1x16x16xf32>
      %687 = arith.addf %677, %686 : vector<1x16x16xf32>
      %688 = vector.extract_strided_slice %641 {offsets = [0, 4, 0], sizes = [1, 16, 16], strides = [1, 1, 1]} : vector<1x22x16xf32> to vector<1x16x16xf32>
      %689 = vector.broadcast %683 : f32 to vector<1x16x16xf32>
      %690 = arith.mulf %689, %688 : vector<1x16x16xf32>
      %691 = arith.addf %681, %690 : vector<1x16x16xf32>
      %c41 = arith.constant 41 : index
      %692 = memref.load %arg2[%c41] : memref<99xf32, #tpu.memory_space<smem>>
      %c90 = arith.constant 90 : index
      %693 = memref.load %arg2[%c90] : memref<99xf32, #tpu.memory_space<smem>>
      %694 = vector.extract_strided_slice %640 {offsets = [0, 5, 0], sizes = [1, 16, 16], strides = [1, 1, 1]} : vector<1x22x16xf32> to vector<1x16x16xf32>
      %695 = vector.broadcast %692 : f32 to vector<1x16x16xf32>
      %696 = arith.mulf %695, %694 : vector<1x16x16xf32>
      %697 = arith.addf %687, %696 : vector<1x16x16xf32>
      %698 = vector.extract_strided_slice %641 {offsets = [0, 5, 0], sizes = [1, 16, 16], strides = [1, 1, 1]} : vector<1x22x16xf32> to vector<1x16x16xf32>
      %699 = vector.broadcast %693 : f32 to vector<1x16x16xf32>
      %700 = arith.mulf %699, %698 : vector<1x16x16xf32>
      %701 = arith.addf %691, %700 : vector<1x16x16xf32>
      %c48 = arith.constant 48 : index
      %702 = memref.load %arg2[%c48] : memref<99xf32, #tpu.memory_space<smem>>
      %c97 = arith.constant 97 : index
      %703 = memref.load %arg2[%c97] : memref<99xf32, #tpu.memory_space<smem>>
      %704 = vector.extract_strided_slice %640 {offsets = [0, 6, 0], sizes = [1, 16, 16], strides = [1, 1, 1]} : vector<1x22x16xf32> to vector<1x16x16xf32>
      %705 = vector.broadcast %702 : f32 to vector<1x16x16xf32>
      %706 = arith.mulf %705, %704 : vector<1x16x16xf32>
      %707 = arith.addf %697, %706 : vector<1x16x16xf32>
      %708 = vector.extract_strided_slice %641 {offsets = [0, 6, 0], sizes = [1, 16, 16], strides = [1, 1, 1]} : vector<1x22x16xf32> to vector<1x16x16xf32>
      %709 = vector.broadcast %703 : f32 to vector<1x16x16xf32>
      %710 = arith.mulf %709, %708 : vector<1x16x16xf32>
      %711 = arith.addf %701, %710 : vector<1x16x16xf32>
      %712 = arith.addf %707, %711 : vector<1x16x16xf32>
      %713 = vector.broadcast %205 : f32 to vector<1x16x16xf32>
      %714 = arith.addf %712, %713 : vector<1x16x16xf32>
      %715 = arith.negf %714 : vector<1x16x16xf32>
      %716 = math.exp %715 : vector<1x16x16xf32>
      %cst_185 = arith.constant 1.000000e+00 : f32
      %717 = vector.broadcast %cst_185 : f32 to vector<1x16x16xf32>
      %718 = arith.addf %717, %716 : vector<1x16x16xf32>
      %719 = arith.divf %717, %718 : vector<1x16x16xf32>
      %c0_186 = arith.constant 0 : index
      %c0_187 = arith.constant 0 : index
      %c0_188 = arith.constant 0 : index
      %c0_189 = arith.constant 0 : index
      %720 = vector.load %arg4[%c0_186, %c0_187, %c0_188, %c0_189] : memref<1x1x16x16xf32, #tpu.memory_space<vmem>>, vector<1x1x16x16xf32>
      %721 = vector.shape_cast %720 : vector<1x1x16x16xf32> to vector<1x16x16xf32>
      %722 = vector.shape_cast %719 : vector<1x16x16xf32> to vector<1x1x16x16xf32>
      tpu.vector_store %arg4[%c0_186, %c0_187, %c0_188, %c0_189], %722 {strides = array<i32>} : memref<1x1x16x16xf32, #tpu.memory_space<vmem>>, vector<1x1x16x16xf32>,
    } else {
    }
    return
  }
  func.func @transform_0(%arg0: i32, %arg1: i32, %arg2: memref<99xf32, #tpu.memory_space<smem>>) -> (i32, i32, i32) {
    %c0_i32 = arith.constant 0 : i32
    %c0_i32_0 = arith.constant 0 : i32
    return %arg0, %arg1, %c0_i32 : i32, i32, i32
  }
  func.func @transform_1(%arg0: i32, %arg1: i32, %arg2: memref<99xf32, #tpu.memory_space<smem>>) -> (i32, i32, i32, i32) {
    %c0_i32 = arith.constant 0 : i32
    %c0_i32_0 = arith.constant 0 : i32
    %c0_i32_1 = arith.constant 0 : i32
    %c0_i32_2 = arith.constant 0 : i32
    return %arg0, %c0_i32, %c0_i32_0, %c0_i32_1 : i32, i32, i32, i32
  }
}

</mosaic_0001>

<bundles_post_ra>
// kernel: tpu_custom_call.1
= control target key start
LH: loop header
LB: loop body
LE: loop exit
PB: predicated region body
PF: predicated region fallthrough
CT: control target
= control target key end

     0   :  { %s2811_s9 = smov [#allocation7]   ;;  %s4894_s0 = inlined_call_operand.hbm [shape: f32[99], index: 0, kind: input, shape index: {}]   ;;  %s4895_s1 = inlined_call_operand.hbm [shape: f32[2,4,256], index: 1, kind: input, shape index: {}]   ;;  %s4896_s2 = inlined_call_operand.hbm [shape: f32[2,1,16,16], index: 2, kind: output, shape index: {}]  }
   0x1   :  { %4929 = sst [smem:[#allocation80_spill]] %s4895_s1 }
   0x2   :  { %4930 = sst [smem:[#allocation81_spill]] %s4896_s2 }
   0x3   :  { %8 = dma.hbm_to_smem %s4894_s0, 16, %s2811_s9, [#allocation6] }
   0x4   :  { %2777 = dma.done.wait [#allocation6], 16 }
   0x5   :  { %2778 = vsyncadd [#allocation6], 4294967280 }
   0x6   :  { %10 = sfence }
   0x7   :  { %11 = vsyncpa [#allocation9], 0 }
   0x8   :  { %13 = vsyncpa [#allocation9 + $0x1], 0 }
   0x9   :  { %14 = vsyncpa [#allocation10], 0 }
   0xa   :  { %16 = vsyncpa [#allocation10 + $0x1], 0  ;;  %s2849_s12 = smov 0   ;;  %s2851_s13 = smov 0  }
   0xb   :  { %s2853_s14 = smov 0   ;;  %s2855_s15 = smov 0  }
   0xc   :  { %s2857_s16 = smov 0   ;;  %s2859_s17 = smov 0  }
   0xd LB: > { %4931 = sst [smem:[#allocation15_spill]] %s2789_s12  ;;  %s2471_s0 = sadd.s32 4294967295, %s2809_s17   ;;  %s2809_s17 = sphi %s2859_s17, %s22_s17   ;;  %s2805_s16 = sphi %s2857_s16, %s5135_s16   ;;  %s2801_s15 = sphi %s2855_s15, %s5134_s15   ;;  %s2797_s14 = sphi %s2853_s14, %s5133_s14   ;;  %s2793_s13 = sphi %s2851_s13, %s5132_s13   ;;  %s2789_s12 = sphi %s2849_s12, %s5131_s12  }
   0xe   : > { %4932 = sst [smem:[#allocation16_spill]] %s2793_s13  ;;  %s2472_s18 = sadd.s32 4294967294, %s2809_s17  }
   0xf   : > { %4933 = sst [smem:[#allocation17_spill]] %s2797_s14  ;;  %s34_s19 = sadd.s32 1, %s2805_s16 }
  0x10   : > { %4934 = sst [smem:[#allocation18_spill]] %s2805_s16  ;;  %s43_s20 = sadd.s32 1, %s2797_s14 }
  0x11   : > { %4935 = sst [smem:[#allocation19_spill]] %s2809_s17  ;;  %p36_p0 = scmp.ge.s32.totalorder %s34_s19, 2 }
  0x12   : > { %p50_p1 = scmp.ne.s32.totalorder %s2797_s14, %s2793_s13  ;;  %p51_p2 = scmp.eq.s32.totalorder %s2809_s17, 0 }
  0x13   : > { %p56_p3 = scmp.ne.s32.totalorder %s2793_s13, %s2789_s12  ;;  %s5137_s19 = smov (%p36_p0, %s34_s19), 0 }
  0x14   : > { %4936 = sst [smem:[#allocation20_spill]] %s5137_s19  ;;  %p2890_p4 = por %p51_p2, %p50_p1 }
  0x15   : > { %p57_p5 = scmp.eq.s32.totalorder %s2471_s0, 0  ;;  %s38_s22 = ssub.s32 %s2805_s16, %s5137_s19 }
  0x16   : > { %p80_p6 = scmp.eq.s32.totalorder %s2471_s0, 1  ;;  %p41_p7 = scmp.eq.s32.totalorder %s38_s22, 0 }
  0x17   : > { %p2896_p8 = por %p57_p5, %p56_p3  ;;  %p86_p10 = scmp.eq.s32.totalorder %s2472_s18, 1 }
  0x18   : > { %p2900_p9 = por %p80_p6, %p50_p1  ;;  %p2603_p13 = scmp.lt.s32.totalorder %s2809_s17, 2 }
  0x19   : > { %s2905_s25 = scalar_select %p41_p7, %s2797_s14, %s43_s20  }
  0x1a   : > { %s4939_s24 = scalar_select %p2900_p9, 1, 0 }
  0x1b   : > { %4941 = sst [smem:[#allocation22_spill]] %s2905_s25  ;;  %p2907_p11 = por %p86_p10, %p56_p3 }
  0x1c   : > { %4940 = sst [smem:[#allocation21_spill]] %s4939_s24  ;;  %s106_s27 = sand.u32 1, %s2797_s14  }
  0x1d   : > { %s4942_s26 = scalar_select %p2907_p11, 1, 0 }
  0x1e   : > { %s2475_s28 = sshll.u32 %s106_s27, 3  ;;  %s2589_s29 = sshll.u32 %s2805_s16, 7 }
  0x1f   : > { %4943 = sst [smem:[#allocation23_spill]] %s4942_s26  ;;  %s110_s5 = scalar_lea.vmem [#allocation8], %s2475_s28 }
  0x20   : > { %s4944_s1 = sld [smem:[#allocation80_spill]]  ;;  %s120_s6 = sshll.u32 %s110_s5, 4  ;;  %s121_s6 = int_to_ptr.vmem [resolvable:$true] %s120_s6 }
  0x21   : > { %p2920_p0 = pnand %p2603_p13, %p2890_p4  ;;  %p2478_p1 = scmp.ge.s32.totalorder %s2809_s17, 1 }
  0x22   : > { %p125_p2 = scmp.lt.s32.totalorder %s2809_s17, 3  ;;  %s107_s8 = scalar_lea.sflag [#allocation9], %s106_s27 }
  0x23   : > { %p2701_p3 = pneg %p2920_p0  ;;  %s2712_s9 = scalar_lea.vmem %s121_s6, 128 }
  0x24   : > { %p2713_p5 = scmp.ne.s32.totalorder %s121_s6, %s2712_s9  ;;  %s2812_s10 = smov [#allocation8]  }
  0x25   : > { %s2717_s11 = sshll.u32 %s2812_s10, 4  ;;  %s2718_s11 = int_to_ptr.vmem [resolvable:$false] %s2717_s11 }
  0x26   : > { %s118_s4 = scalar_lea.hbm %s4944_s1, %s2589_s29  ;;  %p2715_p6 = pnand %p2713_p5, %p2701_p3 }
  0x27   : > { %s2719_s0 = scalar_lea.vmem %s2718_s11, 256  ;;  %p2720_p10 = scmp.lt.s32.totalorder %s121_s6, %s2718_s11 }
  0x28   : > { %p2716_p7 = pneg %p2715_p6  ;;  %p2721_p12 = scmp.lt.s32.totalorder %s2719_s0, %s2712_s9 }
  0x2a   : > { %p2722_p4 = por %p2721_p12, %p2720_p10 }
  0x2c   : > { %p2723_p13 = pnand %p2722_p4, %p2716_p7 }
  0x2e   : > { %2726 = shalt.err (!%p2723_p13)
}
  0x2f   : > { %2598 = dma.hbm_to_vmem [thread:$0]  (!%p2920_p0), %s118_s4, 128, %s121_s6, %s107_s8  }
  0x30   : > { %p126_p11 = pnand %p2478_p1, %p125_p2 }
  0x32   : > { %129 = sbr.rel (%p126_p11) target bundleno = 765 (0x2fd), region = 24 }
  0x37   : > { %s2935_s18 = sand.u32 1, %s2793_s13  }
  0x38   : > { %s2479_s20 = sshll.u32 %s2935_s18, 3  ;;  %s132_s21 = scalar_lea.sflag [#allocation9], %s2935_s18 }
  0x39   : > { %s135_s22 = scalar_lea.vmem [#allocation8], %s2479_s20 }
  0x3a   : > { %2780 = dma.done.wait (%p2896_p8), %s132_s21, 128  }
  0x3b   : > { %2782 = vsyncadd (%p2896_p8), %s132_s21, 4294967168  ;;  %v162_v0 = vlaneseq  ;;  %vm251_vm0 = vcmask 179200   ;;  %v2813_v1 = vmov 0.0   ;;  %v169_v4 = vld [vmem:[%s135_s22] ss:$4 sm:$0x3] }
  0x3c   : > { %252 = vst.msk [vmem:[#allocation4] sm:$0xff] %vm251_vm0, %v2813_v1  ;;  %253 = vst.msk [vmem:[#allocation4 + $0x8] sm:$0xff] %vm251_vm0, %v2813_v1  ;;  %v2481_v5 = vld [vmem:[%s135_s22 + $0x1] ss:$4 sm:$0x3]  ;;  %s2814_s23 = smov 115  }
  0x3d   : > { %256 = vst.msk [vmem:[#allocation5] sm:$0xff] %vm251_vm0, %v2813_v1  ;;  %257 = vst.msk [vmem:[#allocation5 + $0x8] sm:$0xff] %vm251_vm0, %v2813_v1  ;;  %v163_v2 = vshrl.u32 %v162_v0, 7  ;;  %v2482_v8 = vld [vmem:[%s135_s22 + $0x2] ss:$4 sm:$0x3] }
  0x3e   : > { %v2483_v9 = vld [vmem:[%s135_s22 + $0x3] ss:$4 sm:$0x3]  ;;  %s2815_s27 = smov 3   ;;  %s2816_s28 = smov 99   ;;  %vm254_vm2 = vcmask 177152  }
  0x3f   : > { %v173_v3 = vsub.s32 0, %v163_v2  ;;  %vm164_vm1 = vcmp.eq.s32.totalorder %v163_v2, 0  ;;  %v177_v20 = vsub.s32 1, %v163_v2  ;;  %s2817_s29 = smov 83   ;;  %s2818_s30 = smov 67   ;;  %vm315_vm3 = vcmask 147480  }
  0x40   : > { %s2819_s3 = smov 51   ;;  %s2820_s4 = smov 35   ;;  %258 = vst.msk [vmem:[#allocation5 + $0x10] sm:$0x3f] %vm254_vm2, %v2813_v1  ;;  %255 = vst.msk [vmem:[#allocation4 + $0x10] sm:$0x3f] %vm254_vm2, %v2813_v1 }
  0x41   : > { %v174_v6 = vrot.slane %v169_v4, %v173_v3  ;;  %v193_v7 = vrot.slane %v2481_v5, %v173_v3  ;;  %v212_v10 = vrot.slane %v2482_v8, %v173_v3  ;;  %v231_v12 = vrot.slane %v2483_v9, %v173_v3  ;;  %s2821_s5 = smov 19   ;;  %s2987_s6 = sld [smem:[#allocation7 + $0x1]] }
  0x42   : > { %v178_v25 = vrot.slane %v169_v4, %v177_v20  ;;  %v197_v26 = vrot.slane %v2481_v5, %v177_v20  ;;  %v216_v33 = vrot.slane %v2482_v8, %v177_v20  ;;  %v235_v41 = vrot.slane %v2483_v9, %v177_v20  ;;  %s2991_s7 = sld [smem:[#allocation7 + $0x2]]  ;;  %s2822_s8 = smov 127  }
  0x43   : > { %v200_v11 = vmax.f32 %v174_v6, %v193_v7  ;;  %v183_v13 = vsel %vm164_vm1, %v174_v6, 0.0  ;;  %v202_v14 = vsel %vm164_vm1, %v193_v7, 0.0  ;;  %v221_v16 = vsel %vm164_vm1, %v212_v10, 0.0  ;;  %s3010_s9 = sld [smem:[#allocation7 + $0x32]]  ;;  %s2823_s10 = smov 126  }
  0x44   : > { %v204_v15 = vadd.f32 %v202_v14, %v183_v13  ;;  %v240_v18 = vsel %vm164_vm1, %v231_v12, 0.0  ;;  %v184_v31 = vsel %vm164_vm1, %v178_v25, 0.0  ;;  %v203_v32 = vsel %vm164_vm1, %v197_v26, 0.0  ;;  %s3015_s11 = sld [smem:[#allocation7 + $0x33]]  ;;  %s4963_s16 = smov 125  }
  0x45   : > { %v219_v17 = vmax.f32 %v200_v11, %v212_v10  ;;  %v205_v37 = vadd.f32 %v203_v32, %v184_v31  ;;  %v201_v38 = vmax.f32 %v178_v25, %v197_v26  ;;  %v222_v40 = vsel %vm164_vm1, %v216_v33, 0.0  ;;  %s2500_s0 = sld [smem:[#allocation7 + $0x8]] }
  0x46   : > { %v223_v19 = vadd.f32 %v221_v16, %v204_v15  ;;  %v241_v46 = vsel %vm164_vm1, %v235_v41, 0.0  ;;  %s2502_s20 = sld [smem:[#allocation7 + $0xf]]  ;;  %vm472_vm4 = vcmask 1046528   ;;  %vm507_vm5 = vcmask 1045504  }
  0x47   : > { %v238_v21 = vmax.f32 %v219_v17, %v231_v12  ;;  %v224_v44 = vadd.f32 %v222_v40, %v205_v37  ;;  %v220_v45 = vmax.f32 %v201_v38, %v216_v33  ;;  %v675_v7 = vstv %s2987_s6  ;;  %s2504_s21 = sld [smem:[#allocation7 + $0x16]] }
  0x48   : > { %v242_v22 = vadd.f32 %v240_v18, %v223_v19  ;;  %v955_v12 = vstv %s2991_s7  ;;  %s2506_s22 = sld [smem:[#allocation7 + $0x1d]]  ;;  %vm542_vm6 = vcmask 1044480   ;;  %vm577_vm7 = vcmask 1043456  }
  0x49   : > { %v263_v23 = vrot.slane %v238_v21, 4  ;;  %v243_v47 = vadd.f32 %v241_v46, %v224_v44  ;;  %v239_v48 = vmax.f32 %v220_v45, %v235_v41  ;;  %v688_v20 = vstv %s3010_s9  ;;  %s2505_s6 = sld [smem:[#allocation7 + $0x47]] }
  0x4a   : > { %v289_v24 = vrot.slane %v242_v22, 4  ;;  %v968_v25 = vstv %s3015_s11  ;;  %vm612_vm8 = vcmask 1042432   ;;  %vm647_vm9 = vcmask 1041408   ;;  %s2507_s7 = sld [smem:[#allocation7 + $0x4e]] }
  0x4b   : > { %v267_v27 = vmax.f32 %v238_v21, %v263_v23  ;;  %v290_v49 = vrot.slane %v243_v47, 4  ;;  %v264_v50 = vrot.slane %v239_v48, 4  ;;  %s2509_s9 = sld [smem:[#allocation7 + $0x55]]  ;;  %vm2370_vm10 = vcmask 130048  }
  0x4c   : > { %v293_v28 = vadd.f32 %v289_v24, %v242_v22  ;;  %v745_v40 = vstv %s2502_s20  ;;  %s2511_s11 = sld [smem:[#allocation7 + $0x5c]] }
  0x4d   : > { %v271_v29 = vrot.slane %v267_v27, 2  ;;  %v294_v51 = vadd.f32 %v290_v49, %v243_v47  ;;  %v268_v52 = vmax.f32 %v239_v48, %v264_v50  ;;  %v787_v49 = vstv %s2504_s21  ;;  %s2517_s20 = sld [smem:[#allocation7 + $0x41]] }
  0x4e   : > { %v297_v30 = vrot.slane %v293_v28, 2  ;;  %s2519_s21 = sld [smem:[#allocation7 + $0x48]] }
  0x4f   : > { %v275_v34 = vmax.f32 %v267_v27, %v271_v29  ;;  %v298_v53 = vrot.slane %v294_v51, 2  ;;  %v272_v54 = vrot.slane %v268_v52, 2  ;;  %s3481_s1 = sld [smem:[#allocation7 + $0xb]] }
  0x50   : > { %v301_v35 = vadd.f32 %v297_v30, %v293_v28  ;;  %s3488_s19 = sld [smem:[#allocation7 + $0x12]] }
  0x51   : > { %v279_v36 = vrot.slane %v275_v34, 1  ;;  %v302_v55 = vadd.f32 %v298_v53, %v294_v51  ;;  %v276_v56 = vmax.f32 %v268_v52, %v272_v54  ;;  %s3514_s25 = sld [smem:[#allocation7 + $0x27]] }
  0x52   : > { %v305_v39 = vrot.slane %v301_v35, 1  ;;  %s3521_s14 = sld [smem:[#allocation7 + $0x35]] }
  0x53   : > { %v283_v42 = vmax.f32 %v275_v34, %v279_v36  ;;  %v306_v57 = vrot.slane %v302_v55, 1  ;;  %v280_v58 = vrot.slane %v276_v56, 1  ;;  %s3533_s13 = sld [smem:[#allocation7 + $0x2e]] }
  0x54   : > { %v309_v43 = vadd.f32 %v305_v39, %v301_v35  ;;  %v703_v35 = vstv %s2500_s0  ;;  %s2515_s0 = sld [smem:[#allocation7 + $0x3a]] }
  0x55   : > { %322 = vrot.lane.b32.xlu1 %v283_v42, %s2814_s23  ;;  %312 = vrot.lane.b32.xlu0 %v283_v42, %s2815_s27  ;;  %v310_v59 = vadd.f32 %v306_v57, %v302_v55  ;;  %v284_v60 = vmax.f32 %v276_v56, %v280_v58  ;;  %v829_v57 = vstv %s2506_s22  ;;  %s2521_s22 = sld [smem:[#allocation7 + $0x4f]] }
  0x56   : > { %s3547_s17 = sld [smem:[#allocation7 + $0x5]] }
  0x57   : > { %s3551_s26 = sld [smem:[#allocation7 + $0xc]] }
  0x58   : > { %s3559_s12 = sld [smem:[#allocation7 + $0x43]] }
  0x59   : > { %330 = vrot.lane.b32.xlu0 %v283_v42, %s2816_s28  ;;  %326 = vrot.lane.b32.xlu1 %v309_v43, %s2814_s23  ;;  %s3566_s2 = sld [smem:[#allocation7 + $0x4a]] }
  0x5a   : > { %s3576_s24 = sld [smem:[#allocation7 + $0x13]] }
  0x5d   : > { %338 = vrot.lane.b32.xlu0 %v283_v42, %s2817_s29  ;;  %334 = vrot.lane.b32.xlu1 %v309_v43, %s2816_s28 }
  0x61   : > { %346 = vrot.lane.b32.xlu0 %v283_v42, %s2818_s30  ;;  %342 = vrot.lane.b32.xlu1 %v309_v43, %s2817_s29 }
  0x65   : > { %354 = vrot.lane.b32.xlu0 %v283_v42, %s2819_s3  ;;  %350 = vrot.lane.b32.xlu1 %v309_v43, %s2818_s30 }
  0x69   : > { %362 = vrot.lane.b32.xlu0 %v283_v42, %s2820_s4  ;;  %358 = vrot.lane.b32.xlu1 %v309_v43, %s2819_s3 }
  0x6d   : > { %370 = vrot.lane.b32.xlu0 %v283_v42, %s2821_s5  ;;  %366 = vrot.lane.b32.xlu1 %v309_v43, %s2820_s4 }
  0x71   : > { %374 = vrot.lane.b32.xlu1 %v309_v43, %s2821_s5  ;;  %318 = vrot.lane.b32.xlu0 %v309_v43, %s2815_s27 }
  0x75   : > { %384 = vrot.lane.b32.xlu1 %v310_v59, %s2815_s27  ;;  %379 = vrot.lane.b32.xlu0 %v284_v60, %s2815_s27  ;;  %s2510_s27 = sld [smem:[#allocation7 + $0x2b]] }
  0x79   : > { %392 = vrot.lane.b32.xlu1 %v310_v59, %s2814_s23  ;;  %388 = vrot.lane.b32.xlu0 %v284_v60, %s2814_s23  ;;  %s2508_s23 = sld [smem:[#allocation7 + $0x24]] }
  0x7d   : > { %400 = vrot.lane.b32.xlu1 %v310_v59, %s2816_s28  ;;  %396 = vrot.lane.b32.xlu0 %v284_v60, %s2816_s28  ;;  %s2514_s28 = sld [smem:[#allocation7 + $0x9]] }
  0x81   : > { %408 = vrot.lane.b32.xlu1 %v310_v59, %s2817_s29  ;;  %404 = vrot.lane.b32.xlu0 %v284_v60, %s2817_s29  ;;  %s2516_s29 = sld [smem:[#allocation7 + $0x10]] }
  0x85   : > { %416 = vrot.lane.b32.xlu1 %v310_v59, %s2818_s30  ;;  %412 = vrot.lane.b32.xlu0 %v284_v60, %s2818_s30  ;;  %s2518_s30 = sld [smem:[#allocation7 + $0x17]] }
  0x89   : > { %424 = vrot.lane.b32.xlu1 %v310_v59, %s2819_s3  ;;  %420 = vrot.lane.b32.xlu0 %v284_v60, %s2819_s3  ;;  %s2520_s3 = sld [smem:[#allocation7 + $0x1e]] }
  0x8d   : > { %432 = vrot.lane.b32.xlu1 %v310_v59, %s2820_s4  ;;  %428 = vrot.lane.b32.xlu0 %v284_v60, %s2820_s4  ;;  %s2501_s4 = sld [smem:[#allocation7 + $0x39]] }
  0x91   : > { %440 = vrot.lane.b32.xlu1 %v310_v59, %s2821_s5  ;;  %436 = vrot.lane.b32.xlu0 %v284_v60, %s2821_s5  ;;  %s2503_s5 = sld [smem:[#allocation7 + $0x40]] }
  0xc7   : > { %v323_v61 = vpop.permute.xlu1 %322  ;;  %v313_v62 = vpop.permute.xlu0 %312 }
  0xc8   : > { %325 = vst.msk [vmem:[#allocation4 + $0x4] sm:$0x1] %vm315_vm3, %v323_v61  ;;  %316 = vst.msk [vmem:[#allocation4 + $0x3] sm:$0x1] %vm315_vm3, %v313_v62 }
  0xcb   : > { %v331_v63 = vpop.permute.xlu0 %330  ;;  %v327_v0 = vpop.permute.xlu1 %326 }
  0xcc   : > { %333 = vst.msk [vmem:[#allocation4 + $0x5] sm:$0x1] %vm315_vm3, %v331_v63  ;;  %329 = vst.msk [vmem:[#allocation5 + $0x4] sm:$0x1] %vm315_vm3, %v327_v0 }
  0xcf   : > { %v339_v1 = vpop.permute.xlu0 %338  ;;  %v335_v2 = vpop.permute.xlu1 %334 }
  0xd0   : > { %341 = vst.msk [vmem:[#allocation4 + $0x6] sm:$0x1] %vm315_vm3, %v339_v1  ;;  %337 = vst.msk [vmem:[#allocation5 + $0x5] sm:$0x1] %vm315_vm3, %v335_v2  ;;  %v871_v2 = vstv %s2508_s23  ;;  %s2522_s23 = sld [smem:[#allocation7 + $0x25]] }
  0xd3   : > { %v347_v3 = vpop.permute.xlu0 %346  ;;  %v343_v4 = vpop.permute.xlu1 %342 }
  0xd4   : > { %349 = vst.msk [vmem:[#allocation4 + $0x7] sm:$0x1] %vm315_vm3, %v347_v3  ;;  %345 = vst.msk [vmem:[#allocation5 + $0x6] sm:$0x1] %vm315_vm3, %v343_v4 }
  0xd7   : > { %v355_v5 = vpop.permute.xlu0 %354  ;;  %v351_v6 = vpop.permute.xlu1 %350 }
  0xd8   : > { %357 = vst.msk [vmem:[#allocation4 + $0x8] sm:$0x1] %vm315_vm3, %v355_v5  ;;  %353 = vst.msk [vmem:[#allocation5 + $0x7] sm:$0x1] %vm315_vm3, %v351_v6 }
  0xdb   : > { %v2996_v8 = vld [vmem:[#allocation4] sm:$0xff]  ;;  %v363_v9 = vpop.permute.xlu0 %362  ;;  %v359_v10 = vpop.permute.xlu1 %358 }
  0xdc   : > { %365 = vst.msk [vmem:[#allocation4 + $0x9] sm:$0x1] %vm315_vm3, %v363_v9  ;;  %361 = vst.msk [vmem:[#allocation5 + $0x8] sm:$0x1] %vm315_vm3, %v359_v10  ;;  %v676_v11 = vmul.f32 %v675_v7, %v2996_v8  ;;  %v956_v15 = vmul.f32 %v955_v12, %v2996_v8  ;;  %v704_v36 = vmul.f32 %v703_v35, %v2996_v8 }
  0xdd   : > { %v746_v46 = vmul.f32 %v745_v40, %v2996_v8  ;;  %v788_v56 = vmul.f32 %v787_v49, %v2996_v8  ;;  %v830_v63 = vmul.f32 %v829_v57, %v2996_v8 }
  0xde   : > { %680 = vrot.lane.b32.xlu0 %v676_v11, %s2822_s8  ;;  %v710_v44 = vrot.slane %v704_v36, 1  ;;  %v872_v11 = vmul.f32 %v871_v2, %v2996_v8 }
  0xdf   : > { %v371_v13 = vpop.permute.xlu0 %370  ;;  %v367_v14 = vpop.permute.xlu1 %366  ;;  %v752_v55 = vrot.slane %v746_v46, 2  ;;  %v794_v62 = vrot.slane %v788_v56, 3  ;;  %v836_v9 = vrot.slane %v830_v63, 4 }
  0xe0   : > { %373 = vst.msk [vmem:[#allocation4 + $0xa] sm:$0x1] %vm315_vm3, %v371_v13  ;;  %369 = vst.msk [vmem:[#allocation5 + $0x9] sm:$0x1] %vm315_vm3, %v367_v14 }
  0xe2   : > { %960 = vrot.lane.b32.xlu0 %v956_v15, %s2823_s10 }
  0xe3   : > { %v375_v16 = vpop.permute.xlu1 %374  ;;  %v319_v17 = vpop.permute.xlu0 %318 }
  0xe4   : > { %377 = vst.msk [vmem:[#allocation5 + $0xa] sm:$0x1] %vm315_vm3, %v375_v16  ;;  %321 = vst.msk [vmem:[#allocation5 + $0x3] sm:$0x1] %vm315_vm3, %v319_v17 }
  0xe7   : > { %v385_v18 = vpop.permute.xlu1 %384  ;;  %v380_v19 = vpop.permute.xlu0 %379 }
  0xe8   : > { %387 = vst.msk [vmem:[#allocation5 + $0xb] sm:$0x1] %vm315_vm3, %v385_v18  ;;  %382 = vst.msk [vmem:[#allocation4 + $0xb] sm:$0x1] %vm315_vm3, %v380_v19  ;;  %v878_v19 = vrot.slane %v872_v11, 5 }
  0xeb   : > { %v3020_v21 = vld [vmem:[#allocation5] sm:$0xff]  ;;  %v393_v22 = vpop.permute.xlu1 %392  ;;  %v389_v23 = vpop.permute.xlu0 %388 }
  0xec   : > { %395 = vst.msk [vmem:[#allocation5 + $0xc] sm:$0x1] %vm315_vm3, %v393_v22  ;;  %391 = vst.msk [vmem:[#allocation4 + $0xc] sm:$0x1] %vm315_vm3, %v389_v23  ;;  %v689_v24 = vmul.f32 %v688_v20, %v3020_v21  ;;  %v969_v28 = vmul.f32 %v968_v25, %v3020_v21  ;;  %v983_v22 = vstv %s2514_s28  ;;  %s2524_s28 = sld [smem:[#allocation7 + $0x2c]] }
  0xee   : > { %693 = vrot.lane.b32.xlu0 %v689_v24, %s2822_s8 }
  0xef   : > { %v401_v26 = vpop.permute.xlu1 %400  ;;  %v397_v27 = vpop.permute.xlu0 %396 }
  0xf0   : > { %403 = vst.msk [vmem:[#allocation5 + $0xd] sm:$0x1] %vm315_vm3, %v401_v26  ;;  %399 = vst.msk [vmem:[#allocation4 + $0xd] sm:$0x1] %vm315_vm3, %v397_v27 }
  0xf2   : > { %973 = vrot.lane.b32.xlu0 %v969_v28, %s2823_s10 }
  0xf3   : > { %v409_v29 = vpop.permute.xlu1 %408  ;;  %v405_v30 = vpop.permute.xlu0 %404 }
  0xf4   : > { %411 = vst.msk [vmem:[#allocation5 + $0xe] sm:$0x1] %vm315_vm3, %v409_v29  ;;  %407 = vst.msk [vmem:[#allocation4 + $0xe] sm:$0x1] %vm315_vm3, %v405_v30  ;;  %v984_v30 = vmul.f32 %v983_v22, %v2996_v8 }
  0xf7   : > { %v417_v31 = vpop.permute.xlu1 %416  ;;  %v413_v32 = vpop.permute.xlu0 %412 }
  0xf8   : > { %419 = vst.msk [vmem:[#allocation5 + $0xf] sm:$0x1] %vm315_vm3, %v417_v31  ;;  %415 = vst.msk [vmem:[#allocation4 + $0xf] sm:$0x1] %vm315_vm3, %v413_v32  ;;  %v1025_v31 = vstv %s2516_s29  ;;  %s2525_s29 = sld [smem:[#allocation7 + $0x5d]] }
  0xfb   : > { %v425_v33 = vpop.permute.xlu1 %424  ;;  %v421_v34 = vpop.permute.xlu0 %420 }
  0xfc   : > { %427 = vst.msk [vmem:[#allocation5 + $0x10] sm:$0x1] %vm315_vm3, %v425_v33  ;;  %423 = vst.msk [vmem:[#allocation4 + $0x10] sm:$0x1] %vm315_vm3, %v421_v34 }
  0xff   : > { %v3042_v37 = vld [vmem:[#allocation4 + $0x8] sm:$0xff]  ;;  %v433_v38 = vpop.permute.xlu1 %432  ;;  %v429_v39 = vpop.permute.xlu0 %428  ;;  %v3065_v54 = vld [vmem:[#allocation5 + $0x8] sm:$0xff] }
 0x100   : > { %435 = vst.msk [vmem:[#allocation5 + $0x11] sm:$0x1] %vm315_vm3, %v433_v38  ;;  %431 = vst.msk [vmem:[#allocation4 + $0x11] sm:$0x1] %vm315_vm3, %v429_v39  ;;  %v677_v41 = vmul.f32 %v675_v7, %v3042_v37  ;;  %v705_v42 = vmul.f32 %v703_v35, %v3042_v37  ;;  %v3051_v43 = vmul.f32 %v745_v40, %v3042_v37  ;;  %v990_v39 = vrot.slane %v984_v30, 1 }
 0x101   : > { %v957_v51 = vmul.f32 %v955_v12, %v3042_v37  ;;  %v3063_v53 = vmul.f32 %v787_v49, %v3042_v37  ;;  %v690_v59 = vmul.f32 %v688_v20, %v3065_v54  ;;  %v3076_v61 = vmul.f32 %v829_v57, %v3042_v37 }
 0x102   : > { %682 = vrot.lane.b32.xlu1 %v677_v41, %s2822_s8  ;;  %v711_v45 = vrot.slane %v705_v42, 1  ;;  %v753_v52 = vrot.slane %v3051_v43, 2  ;;  %v970_v1 = vmul.f32 %v968_v25, %v3065_v54  ;;  %v3090_v6 = vmul.f32 %v871_v2, %v3042_v37 }
 0x103   : > { %v441_v47 = vpop.permute.xlu1 %440  ;;  %v437_v48 = vpop.permute.xlu0 %436  ;;  %v795_v60 = vrot.slane %v3063_v53, 3  ;;  %v837_v4 = vrot.slane %v3076_v61, 4  ;;  %v913_v12 = vstv %s2510_s27  ;;  %v3109_v25 = vmul.f32 %v983_v22, %v3042_v37  ;;  %s2523_s27 = sld [smem:[#allocation7 + $0x56]] }
 0x104   : > { %443 = vst.msk [vmem:[#allocation5 + $0x12] sm:$0x1] %vm315_vm3, %v441_v47  ;;  %439 = vst.msk [vmem:[#allocation4 + $0x12] sm:$0x1] %vm315_vm3, %v437_v48  ;;  %v712_v50 = vsel %vm472_vm4, %v710_v44, %v711_v45  ;;  %v754_v58 = vsel %vm507_vm5, %v752_v55, %v753_v52  ;;  %v879_v15 = vrot.slane %v3090_v6, 5  ;;  %v3100_v16 = vmul.f32 %v913_v12, %v3042_v37 }
 0x105   : > { %715 = vrot.lane.b32.xlu0 %v712_v50, %s2822_s8  ;;  %v796_v3 = vsel %vm542_vm6, %v794_v62, %v795_v60  ;;  %v838_v13 = vsel %vm577_vm7, %v836_v9, %v837_v4  ;;  %v914_v20 = vmul.f32 %v913_v12, %v2996_v8  ;;  %v991_v33 = vrot.slane %v3109_v25, 1 }
 0x106   : > { %962 = vrot.lane.b32.xlu1 %v957_v51, %s2823_s10  ;;  %v880_v23 = vsel %vm612_vm8, %v878_v19, %v879_v15  ;;  %v921_v24 = vrot.slane %v3100_v16, 6  ;;  %v3119_v34 = vmul.f32 %v1025_v31, %v3042_v37  ;;  %v1067_v41 = vstv %s2518_s30  ;;  %s2528_s30 = sld [smem:[#allocation7 + $0xa]] }
 0x107   : > { %v920_v29 = vrot.slane %v914_v20, 6  ;;  %v992_v42 = vsel %vm472_vm4, %v990_v39, %v991_v33  ;;  %v3129_v44 = vmul.f32 %v1067_v41, %v3042_v37  ;;  %v1109_v50 = vstv %s2520_s3  ;;  %s3277_s3 = sld [smem:[#allocation7 + $0x34]] }
 0x108   : > { %v1033_v43 = vrot.slane %v3119_v34, 2  ;;  %v3139_v53 = vmul.f32 %v1109_v50, %v3042_v37  ;;  %v765_v6 = vstv %s2503_s5  ;;  %v807_v16 = vstv %s2505_s6  ;;  %s2530_s5 = sld [smem:[#allocation7 + $0x11]]  ;;  %s4898_s6 = smov 125  }
 0x109   : > { %757 = vrot.lane.b32.xlu0 %v754_v58, %s2822_s8  ;;  %v922_v32 = vsel %vm647_vm9, %v920_v29, %v921_v24  ;;  %v3169_v19 = vmul.f32 %v807_v16, %v3065_v54 }
 0x10a   : > { %695 = vrot.lane.b32.xlu1 %v690_v59, %s2822_s8  ;;  %v1110_v59 = vmul.f32 %v1109_v50, %v2996_v8  ;;  %v1117_v62 = vrot.slane %v3139_v53, 4 }
 0x10b   : > { %v3081_v0 = vld [vmem:[#allocation4 + $0x10] sm:$0x3f]  ;;  %v815_v29 = vrot.slane %v3169_v19, 3 }
 0x10c   : > { %v706_v5 = vmul.f32 %v703_v35, %v3081_v0  ;;  %v748_v7 = vmul.f32 %v745_v40, %v3081_v0  ;;  %v790_v18 = vmul.f32 %v787_v49, %v3081_v0  ;;  %v832_v28 = vmul.f32 %v829_v57, %v3081_v0 }
 0x10d   : > { %799 = vrot.lane.b32.xlu0 %v796_v3, %s2822_s8  ;;  %v874_v38 = vmul.f32 %v871_v2, %v3081_v0  ;;  %v1026_v40 = vmul.f32 %v1025_v31, %v2996_v8  ;;  %v916_v47 = vmul.f32 %v913_v12, %v3081_v0  ;;  %v1068_v49 = vmul.f32 %v1067_v41, %v2996_v8 }
 0x10e   : > { %975 = vrot.lane.b32.xlu1 %v970_v1, %s2823_s10  ;;  %v713_v10 = vrot.slane %v706_v5, 1  ;;  %v755_v17 = vrot.slane %v748_v7, 2  ;;  %v797_v27 = vrot.slane %v790_v18, 3  ;;  %v839_v36 = vrot.slane %v832_v28, 4 }
 0x10f   : > { %v881_v46 = vrot.slane %v874_v38, 5  ;;  %v1032_v48 = vrot.slane %v1026_v40, 2  ;;  %v923_v56 = vrot.slane %v916_v47, 6  ;;  %v986_v57 = vmul.f32 %v983_v22, %v3081_v0 }
 0x110   : > { %v714_v14 = vsel %vm472_vm4, %v711_v45, %v713_v10  ;;  %v756_v26 = vsel %vm507_vm5, %v753_v52, %v755_v17  ;;  %v798_v35 = vsel %vm542_vm6, %v795_v60, %v797_v27  ;;  %v840_v45 = vsel %vm577_vm7, %v837_v4, %v839_v36 }
 0x111   : > { %841 = vrot.lane.b32.xlu0 %v838_v13, %s2822_s8  ;;  %v1034_v51 = vsel %vm507_vm5, %v1032_v48, %v1033_v43  ;;  %v1075_v52 = vrot.slane %v3129_v44, 3  ;;  %v882_v55 = vsel %vm612_vm8, %v879_v15, %v881_v46  ;;  %v1074_v58 = vrot.slane %v1068_v49, 3 }
 0x112   : > { %717 = vrot.lane.b32.xlu1 %v714_v14, %s2822_s8  ;;  %v723_v60 = vstv %s2501_s4  ;;  %v924_v1 = vsel %vm647_vm9, %v921_v24, %v923_v56  ;;  %v993_v2 = vrot.slane %v986_v57, 1  ;;  %v1028_v3 = vmul.f32 %v1025_v31, %v3081_v0  ;;  %v3174_v24 = vld [vmem:[#allocation5 + $0x10] sm:$0x3f]  ;;  %s2529_s4 = sld [smem:[#allocation7 + $0x3b]] }
 0x113   : > { %v1076_v61 = vsel %vm542_vm6, %v1074_v58, %v1075_v52  ;;  %v3149_v63 = vmul.f32 %v723_v60, %v3065_v54  ;;  %v1116_v4 = vrot.slane %v1110_v59, 4  ;;  %v724_v5 = vmul.f32 %v723_v60, %v3020_v21 }
 0x114   : > { %v3159_v10 = vmul.f32 %v765_v6, %v3065_v54  ;;  %v994_v11 = vsel %vm472_vm4, %v991_v33, %v993_v2  ;;  %v1035_v12 = vrot.slane %v1028_v3, 2  ;;  %v1070_v13 = vmul.f32 %v1067_v41, %v3081_v0 }
 0x115   : > { %883 = vrot.lane.b32.xlu0 %v880_v23, %s2822_s8  ;;  %v1118_v7 = vsel %vm577_vm7, %v1116_v4, %v1117_v62  ;;  %v731_v9 = vrot.slane %v3149_v63, 1  ;;  %v730_v14 = vrot.slane %v724_v5, 1  ;;  %v766_v15 = vmul.f32 %v765_v6, %v3020_v21 }
 0x116   : > { %759 = vrot.lane.b32.xlu1 %v756_v26, %s2822_s8  ;;  %v773_v18 = vrot.slane %v3159_v10, 2  ;;  %v1036_v20 = vsel %vm507_vm5, %v1033_v43, %v1035_v12  ;;  %v1077_v22 = vrot.slane %v1070_v13, 3  ;;  %v1112_v23 = vmul.f32 %v1109_v50, %v3081_v0 }
 0x117   : > { %v732_v17 = vsel %vm472_vm4, %v730_v14, %v731_v9  ;;  %v772_v25 = vrot.slane %v766_v15, 2  ;;  %v808_v26 = vmul.f32 %v807_v16, %v3020_v21  ;;  %v849_v27 = vstv %s2507_s7  ;;  %s2531_s7 = sld [smem:[#allocation7 + $0x42]] }
 0x118   : > { %v3181_v30 = vmul.f32 %v849_v27, %v3065_v54  ;;  %v1078_v31 = vsel %vm542_vm6, %v1075_v52, %v1077_v22  ;;  %v726_v33 = vmul.f32 %v723_v60, %v3174_v24  ;;  %v891_v36 = vstv %s2509_s9  ;;  %s2532_s9 = sld [smem:[#allocation7 + $0x18]] }
 0x119   : > { %925 = vrot.lane.b32.xlu0 %v922_v32, %s2822_s8  ;;  %v774_v28 = vsel %vm507_vm5, %v772_v25, %v773_v18  ;;  %v1119_v32 = vrot.slane %v1112_v23, 4  ;;  %v814_v34 = vrot.slane %v808_v26, 3  ;;  %v3191_v40 = vmul.f32 %v891_v36, %v3065_v54 }
 0x11a   : > { %801 = vrot.lane.b32.xlu1 %v798_v35, %s2822_s8  ;;  %v850_v35 = vmul.f32 %v849_v27, %v3020_v21  ;;  %v857_v39 = vrot.slane %v3181_v30, 4  ;;  %v768_v43 = vmul.f32 %v765_v6, %v3174_v24  ;;  %v933_v46 = vstv %s2511_s11  ;;  %s2533_s11 = sld [smem:[#allocation7 + $0x49]] }
 0x11b   : > { %v816_v38 = vsel %vm542_vm6, %v814_v34, %v815_v29  ;;  %v1120_v41 = vsel %vm577_vm7, %v1117_v62, %v1119_v32  ;;  %v899_v48 = vrot.slane %v3191_v40, 5  ;;  %v3201_v49 = vmul.f32 %v933_v46, %v3065_v54 }
 0x11c   : > { %v856_v44 = vrot.slane %v850_v35, 4  ;;  %v810_v52 = vmul.f32 %v807_v16, %v3174_v24  ;;  %v1003_v56 = vstv %s2515_s0  ;;  %v852_v62 = vmul.f32 %v849_v27, %v3174_v24  ;;  %s3349_s0 = sld [smem:[#allocation7]] }
 0x11d   : > { %995 = vrot.lane.b32.xlu0 %v992_v42, %s2823_s10  ;;  %v733_v42 = vrot.slane %v726_v33, 1  ;;  %v941_v58 = vrot.slane %v3201_v49, 6  ;;  %v3211_v59 = vmul.f32 %v1003_v56, %v3065_v54  ;;  %v1045_v2 = vstv %s2517_s20  ;;  %s3355_s20 = sld [smem:[#allocation7 + $0x50]] }
 0x11e   : > { %843 = vrot.lane.b32.xlu1 %v840_v45, %s2822_s8  ;;  %v892_v45 = vmul.f32 %v891_v36, %v3020_v21  ;;  %v858_v47 = vsel %vm577_vm7, %v856_v44, %v857_v39  ;;  %v3221_v5 = vmul.f32 %v1045_v2, %v3065_v54  ;;  %v1087_v12 = vstv %s2519_s21  ;;  %s3357_s21 = sld [smem:[#allocation7 + $0x7]] }
 0x11f   : > { %v734_v50 = vsel %vm472_vm4, %v731_v9, %v733_v42  ;;  %v1011_v4 = vrot.slane %v3211_v59, 1  ;;  %v894_v9 = vmul.f32 %v891_v36, %v3174_v24  ;;  %v3231_v15 = vmul.f32 %v1087_v12, %v3065_v54 }
 0x120   : > { %v898_v53 = vrot.slane %v892_v45, 5  ;;  %v1053_v14 = vrot.slane %v3221_v5, 2  ;;  %v1129_v22 = vstv %s2521_s22  ;;  %v1151_v32 = vstv %s2522_s23  ;;  %s3368_s22 = sld [smem:[#allocation7 + $0xe]] }
 0x121   : > { %1037 = vrot.lane.b32.xlu0 %v1034_v51, %s2823_s10  ;;  %v775_v51 = vrot.slane %v768_v43, 2  ;;  %v1095_v25 = vrot.slane %v3231_v15, 3  ;;  %v1131_v26 = vmul.f32 %v1129_v22, %v3065_v54  ;;  %v1153_v35 = vmul.f32 %v1151_v32, %v3042_v37  ;;  %s3373_s23 = sld [smem:[#allocation7 + $0x15]] }
 0x122   : > { %885 = vrot.lane.b32.xlu1 %v882_v55, %s2822_s8  ;;  %v934_v55 = vmul.f32 %v933_v46, %v3020_v21  ;;  %v900_v57 = vsel %vm612_vm8, %v898_v53, %v899_v48  ;;  %v1171_v42 = vstv %s2523_s27  ;;  %s3380_s27 = sld [smem:[#allocation7 + $0x26]] }
 0x123   : > { %v776_v60 = vsel %vm507_vm5, %v773_v18, %v775_v51  ;;  %v936_v18 = vmul.f32 %v933_v46, %v3174_v24  ;;  %v1137_v34 = vrot.slane %v1131_v26, 4  ;;  %v1159_v44 = vrot.slane %v1153_v35, 5 }
 0x124   : > { %v940_v63 = vrot.slane %v934_v55, 6  ;;  %v1173_v45 = vmul.f32 %v1171_v42, %v3065_v54  ;;  %v1193_v51 = vstv %s2524_s28  ;;  %s3382_s28 = sld [smem:[#allocation7 + $0x1c]] }
 0x125   : > { %1079 = vrot.lane.b32.xlu0 %v1076_v61, %s2823_s10  ;;  %v817_v61 = vrot.slane %v810_v52, 3  ;;  %v1195_v55 = vmul.f32 %v1193_v51, %v3042_v37 }
 0x126   : > { %927 = vrot.lane.b32.xlu1 %v924_v1, %s2822_s8  ;;  %v1004_v1 = vmul.f32 %v1003_v56, %v3020_v21  ;;  %v942_v3 = vsel %vm647_vm9, %v940_v63, %v941_v58  ;;  %v1179_v53 = vrot.slane %v1173_v45, 5 }
 0x127   : > { %v818_v6 = vsel %vm542_vm6, %v815_v29, %v817_v61  ;;  %v1006_v29 = vmul.f32 %v1003_v56, %v3174_v24  ;;  %v1213_v61 = vstv %s2525_s29  ;;  %v1201_v63 = vrot.slane %v1195_v55, 6  ;;  %s3393_s29 = sld [smem:[#allocation7 + $0x23]] }
 0x128   : > { %v1010_v10 = vrot.slane %v1004_v1, 1  ;;  %v1215_v1 = vmul.f32 %v1213_v61, %v3065_v54 }
 0x129   : > { %1121 = vrot.lane.b32.xlu0 %v1118_v7, %s2823_s10  ;;  %v859_v7 = vrot.slane %v852_v62, 4 }
 0x12a   : > { %997 = vrot.lane.b32.xlu1 %v994_v11, %s2823_s10  ;;  %v1046_v11 = vmul.f32 %v1045_v2, %v3020_v21  ;;  %v1012_v13 = vsel %vm472_vm4, %v1010_v10, %v1011_v4 }
 0x12b   : > { %v860_v16 = vsel %vm577_vm7, %v857_v39, %v859_v7  ;;  %v1048_v39 = vmul.f32 %v1045_v2, %v3174_v24 }
 0x12c   : > { %v1052_v19 = vrot.slane %v1046_v11, 2 }
 0x12d   : > { %735 = vrot.lane.b32.xlu0 %v732_v17, %s2822_s8  ;;  %v901_v17 = vrot.slane %v894_v9, 5  ;;  %v1221_v9 = vrot.slane %v1215_v1, 6 }
 0x12e   : > { %1039 = vrot.lane.b32.xlu1 %v1036_v20, %s2823_s10  ;;  %v1088_v20 = vmul.f32 %v1087_v12, %v3020_v21  ;;  %v1054_v23 = vsel %vm507_vm5, %v1052_v19, %v1053_v14 }
 0x12f   : > { %v902_v27 = vsel %vm612_vm8, %v899_v48, %v901_v17  ;;  %v1090_v48 = vmul.f32 %v1087_v12, %v3174_v24  ;;  %v1174_v12 = vmul.f32 %v1171_v42, %v3174_v24 }
 0x130   : > { %v1094_v30 = vrot.slane %v1088_v20, 3 }
 0x131   : > { %777 = vrot.lane.b32.xlu0 %v774_v28, %s2822_s8  ;;  %v943_v28 = vrot.slane %v936_v18, 6  ;;  %v1181_v17 = vrot.slane %v1174_v12, 5  ;;  %v1196_v18 = vmul.f32 %v1193_v51, %v3081_v0 }
 0x132   : > { %1081 = vrot.lane.b32.xlu1 %v1078_v31, %s2823_s10  ;;  %v1130_v31 = vmul.f32 %v1129_v22, %v3020_v21  ;;  %v1096_v33 = vsel %vm542_vm6, %v1094_v30, %v1095_v25 }
 0x133   : > { %v944_v36 = vsel %vm647_vm9, %v941_v58, %v943_v28  ;;  %v1132_v58 = vmul.f32 %v1129_v22, %v3174_v24  ;;  %v1263_v22 = vstv %s2528_s30  ;;  %v1182_v26 = vsel %vm612_vm8, %v1179_v53, %v1181_v17  ;;  %s3405_s30 = sld [smem:[#allocation7 + $0x57]] }
 0x134   : > { %v1136_v40 = vrot.slane %v1130_v31, 4  ;;  %v1216_v28 = vmul.f32 %v1213_v61, %v3174_v24  ;;  %v1283_v31 = vstv %s2529_s4  ;;  %s3418_s4 = sld [smem:[#allocation7 + $0x38]] }
 0x135   : > { %819 = vrot.lane.b32.xlu0 %v816_v38, %s2822_s8  ;;  %v1013_v38 = vrot.slane %v1006_v29, 1  ;;  %v1264_v29 = vmul.f32 %v1263_v22, %v2996_v8 }
 0x136   : > { %1123 = vrot.lane.b32.xlu1 %v1120_v41, %s2823_s10  ;;  %v1152_v41 = vmul.f32 %v1151_v32, %v2996_v8  ;;  %v1138_v43 = vsel %vm577_vm7, %v1136_v40, %v1137_v34  ;;  %v1305_v40 = vstv %s2530_s5  ;;  %s3425_s5 = sld [smem:[#allocation7 + $0x3f]] }
 0x137   : > { %v1014_v46 = vsel %vm472_vm4, %v1011_v4, %v1013_v38  ;;  %v1154_v4 = vmul.f32 %v1151_v32, %v3081_v0  ;;  %v1270_v38 = vrot.slane %v1264_v29, 1 }
 0x138   : > { %v1158_v49 = vrot.slane %v1152_v41, 5 }
 0x139   : > { %861 = vrot.lane.b32.xlu0 %v858_v47, %s2822_s8  ;;  %v1055_v47 = vrot.slane %v1048_v39, 2  ;;  %v1161_v11 = vrot.slane %v1154_v4, 5  ;;  %v1284_v39 = vmul.f32 %v1283_v31, %v3020_v21 }
 0x13a   : > { %737 = vrot.lane.b32.xlu1 %v734_v50, %s2822_s8  ;;  %v1172_v50 = vmul.f32 %v1171_v42, %v3020_v21  ;;  %v1160_v52 = vsel %vm612_vm8, %v1158_v49, %v1159_v44 }
 0x13b   : > { %v1056_v56 = vsel %vm507_vm5, %v1053_v14, %v1055_v47  ;;  %v1306_v47 = vmul.f32 %v1305_v40, %v2996_v8 }
 0x13c   : > { %v1178_v59 = vrot.slane %v1172_v50, 5 }
 0x13d   : > { %903 = vrot.lane.b32.xlu0 %v900_v57, %s2822_s8  ;;  %v1097_v57 = vrot.slane %v1090_v48, 3  ;;  %v1325_v48 = vstv %s2531_s7  ;;  %v1312_v55 = vrot.slane %v1306_v47, 2  ;;  %v1431_v47 = vstv %s3380_s27  ;;  %s3432_s7 = sld [smem:[#allocation7 + $0x2d]] }
 0x13e   : > { %779 = vrot.lane.b32.xlu1 %v776_v60, %s2822_s8  ;;  %v1194_v60 = vmul.f32 %v1193_v51, %v2996_v8  ;;  %v1180_v62 = vsel %vm612_vm8, %v1178_v59, %v1179_v53  ;;  %v1266_v53 = vmul.f32 %v1263_v22, %v3081_v0  ;;  %s3461_s27 = sld [smem:[#allocation7 + $0x5b]] }
 0x13f   : > { %v1098_v2 = vsel %vm542_vm6, %v1095_v25, %v1097_v57  ;;  %v3294_v25 = vmul.f32 %v1263_v22, %v3042_v37 }
 0x140   : > { %v1200_v5 = vrot.slane %v1194_v60, 6  ;;  %v1273_v1 = vrot.slane %v1266_v53, 1 }
 0x141   : > { %945 = vrot.lane.b32.xlu0 %v942_v3, %s2822_s8  ;;  %v1139_v3 = vrot.slane %v1132_v58, 4  ;;  %v1271_v32 = vrot.slane %v3294_v25, 1  ;;  %v1347_v58 = vstv %s2532_s9  ;;  %s3434_s9 = sld [smem:[#allocation7 + $0x46]] }
 0x142   : > { %821 = vrot.lane.b32.xlu1 %v818_v6, %s2822_s8  ;;  %v1214_v6 = vmul.f32 %v1213_v61, %v3020_v21  ;;  %v1202_v7 = vsel %vm647_vm9, %v1200_v5, %v1201_v63  ;;  %v1348_v4 = vmul.f32 %v1347_v58, %v2996_v8 }
 0x143   : > { %v1140_v10 = vsel %vm577_vm7, %v1137_v34, %v1139_v3  ;;  %v1272_v41 = vsel %vm472_vm4, %v1270_v38, %v1271_v32  ;;  %v1274_v12 = vsel %vm472_vm4, %v1271_v32, %v1273_v1  ;;  %v1409_v32 = vstv %s3355_s20  ;;  %s3459_s20 = sld [smem:[#allocation7 + $0x5e]] }
 0x144   : > { %v3416_v38 = vmul.f32 %v1409_v32, %v3065_v54 }
 0x145   : > { %1015 = vrot.lane.b32.xlu0 %v1012_v13, %s2823_s10  ;;  %v1220_v13 = vrot.slane %v1214_v6, 6  ;;  %v1367_v6 = vstv %s2533_s11  ;;  %s3445_s11 = sld [smem:[#allocation7 + $0x4d]] }
 0x146   : > { %863 = vrot.lane.b32.xlu1 %v860_v16, %s2822_s8  ;;  %v1162_v16 = vsel %vm612_vm8, %v1159_v44, %v1161_v11  ;;  %v3366_v11 = vmul.f32 %v1367_v6, %v3065_v54 }
 0x147   : > { %v1222_v14 = vsel %vm647_vm9, %v1220_v13, %v1221_v9 }
 0x149   : > { %1057 = vrot.lane.b32.xlu0 %v1054_v23, %s2823_s10  ;;  %v1248_v23 = vstv %s3277_s3  ;;  %s3407_s3 = sld [smem:[#allocation7 + $0x31]] }
 0x14a   : > { %905 = vrot.lane.b32.xlu1 %v902_v27, %s2822_s8  ;;  %v1203_v27 = vrot.slane %v1196_v18, 6  ;;  %v1249_v30 = vmul.f32 %v1248_v23, %v3020_v21  ;;  %v1250_v61 = vmul.f32 %v1248_v23, %v3065_v54  ;;  %v1375_v23 = vrot.slane %v3366_v11, 3 }
 0x14b   : > { %v3519_v11 = vstv %s3459_s20  ;;  %s3540_s20 = sld [smem:[#allocation7 + $0x3c]] }
 0x14c   : > { %v1204_v35 = vsel %vm647_vm9, %v1201_v63, %v1203_v27  ;;  %v3345_v63 = vmul.f32 %v1347_v58, %v3042_v37 }
 0x14d   : > { %1099 = vrot.lane.b32.xlu0 %v1096_v33, %s2823_s10  ;;  %v3304_v33 = vmul.f32 %v1283_v31, %v3065_v54 }
 0x14e   : > { %947 = vrot.lane.b32.xlu1 %v944_v36, %s2822_s8  ;;  %s3269_s8 = sld [smem:[#allocation7 + $0x3]]  ;;  %v1223_v36 = vrot.slane %v1216_v28, 6  ;;  %v1328_v28 = vmul.f32 %v1325_v48, %v3174_v24 }
 0x14f   : > { %v1291_v42 = vrot.slane %v3304_v33, 1 }
 0x150   : > { %v3289_v19 = vpop.permute.xlu0 %680  ;;  %v1224_v45 = vsel %vm647_vm9, %v1221_v9, %v1223_v36 }
 0x151   : > { %1141 = vrot.lane.b32.xlu0 %v1138_v43, %s2823_s10  ;;  %4946 = vst [vmem:[#allocation24_spill] sm:$0xff] %v3289_v19  ;;  %v3315_v43 = vmul.f32 %v1305_v40, %v3042_v37 }
 0x152   : > { %1017 = vrot.lane.b32.xlu1 %v1014_v46, %s2823_s10  ;;  %v1290_v46 = vrot.slane %v1284_v39, 1 }
 0x153   : > { %v1313_v51 = vrot.slane %v3315_v43, 2 }
 0x154   : > { %v1235_v15 = vstv %s3269_s8  ;;  %v3306_v34 = vpop.permute.xlu0 %960  ;;  %v1292_v49 = vsel %vm472_vm4, %v1290_v46, %v1291_v42  ;;  %s3398_s8 = sld [smem:[#allocation7 + $0x2a]] }
 0x155   : > { %1163 = vrot.lane.b32.xlu0 %v1160_v52, %s2823_s10  ;;  %v1236_v20 = vmul.f32 %v1235_v15, %v2996_v8  ;;  %4947 = vst [vmem:[#allocation25_spill] sm:$0xff] %v3306_v34  ;;  %v1237_v50 = vmul.f32 %v1235_v15, %v3042_v37  ;;  %v3327_v52 = vmul.f32 %v1325_v48, %v3065_v54  ;;  %v1354_v15 = vrot.slane %v1348_v4, 3 }
 0x156   : > { %1059 = vrot.lane.b32.xlu1 %v1056_v56, %s2823_s10  ;;  %v1326_v56 = vmul.f32 %v1325_v48, %v3020_v21  ;;  %v1314_v60 = vsel %vm507_vm5, %v1312_v55, %v1313_v51  ;;  %v1370_v55 = vmul.f32 %v1367_v6, %v3174_v24  ;;  %v4985_v34 = vstv %s3349_s0 }
 0x158   : > { %v1332_v3 = vrot.slane %v1326_v56, 2 }
 0x159   : > { %1183 = vrot.lane.b32.xlu0 %v1180_v62, %s2823_s10  ;;  %v1333_v62 = vrot.slane %v3327_v52, 2 }
 0x15a   : > { %1101 = vrot.lane.b32.xlu1 %v1098_v2, %s2823_s10  ;;  %v1286_v2 = vmul.f32 %v1283_v31, %v3174_v24 }
 0x15b   : > { %v1334_v9 = vsel %vm507_vm5, %v1332_v3, %v1333_v62  ;;  %v1377_v3 = vrot.slane %v1370_v55, 3  ;;  %v3570_v55 = vstv %s3357_s21  ;;  %s3592_s21 = sld [smem:[#allocation7 + $0x51]] }
 0x15c   : > { %v1293_v13 = vrot.slane %v1286_v2, 1 }
 0x15d   : > { %1205 = vrot.lane.b32.xlu0 %v1202_v7, %s2823_s10 }
 0x15e   : > { %1143 = vrot.lane.b32.xlu1 %v1140_v10, %s2823_s10  ;;  %v1355_v10 = vrot.slane %v3345_v63, 3 }
 0x160   : > { %v3317_v44 = vpop.permute.xlu0 %693  ;;  %v1356_v22 = vsel %vm542_vm6, %v1354_v15, %v1355_v10  ;;  %v1378_v15 = vsel %vm542_vm6, %v1375_v23, %v1377_v3 }
 0x161   : > { %1225 = vrot.lane.b32.xlu0 %v1222_v14, %s2823_s10  ;;  %4948 = vst [vmem:[#allocation26_spill] sm:$0xff] %v3317_v44  ;;  %v1308_v14 = vmul.f32 %v1305_v40, %v3081_v0  ;;  %v1335_v40 = vrot.slane %v1328_v28, 2 }
 0x162   : > { %1165 = vrot.lane.b32.xlu1 %v1162_v16, %s2823_s10  ;;  %v1368_v16 = vmul.f32 %v1367_v6, %v3020_v21 }
 0x163   : > { %v1315_v27 = vrot.slane %v1308_v14, 2 }
 0x164   : > { %v3333_v57 = vpop.permute.xlu0 %973  ;;  %v1374_v29 = vrot.slane %v1368_v16, 3 }
 0x165   : > { %1240 = vrot.lane.b32.xlu0 %v1236_v20, %s4898_s6  ;;  %4949 = vst [vmem:[#allocation27_spill] sm:$0xff] %v3333_v57  ;;  %v1316_v39 = vsel %vm507_vm5, %v1313_v51, %v1315_v27  ;;  %v1336_v51 = vsel %vm507_vm5, %v1333_v62, %v1335_v40 }
 0x166   : > { %1185 = vrot.lane.b32.xlu1 %v1182_v26, %s2823_s10  ;;  %v1294_v26 = vsel %vm472_vm4, %v1291_v42, %v1293_v13  ;;  %v3486_v13 = vstv %s3432_s7  ;;  %s3507_s7 = sld [smem:[#allocation7 + $0x20]] }
 0x169   : > { %1253 = vrot.lane.b32.xlu0 %v1249_v30, %s4898_s6 }
 0x16a   : > { %1207 = vrot.lane.b32.xlu1 %v1204_v35, %s2823_s10  ;;  %v1376_v35 = vsel %vm542_vm6, %v1374_v29, %v1375_v23 }
 0x16d   : > { %1275 = vrot.lane.b32.xlu0 %v1272_v41, %s4898_s6  ;;  %v1350_v41 = vmul.f32 %v1347_v58, %v3081_v0  ;;  %v1432_v58 = vmul.f32 %v1431_v47, %v2996_v8 }
 0x16e   : > { %1227 = vrot.lane.b32.xlu1 %v1224_v45, %s2823_s10  ;;  %s3335_s10 = sld [smem:[#allocation7 + $0x1f]]  ;;  %v1410_v45 = vmul.f32 %v1409_v32, %v3020_v21 }
 0x16f   : > { %v1357_v53 = vrot.slane %v1350_v41, 3  ;;  %v1438_v6 = vrot.slane %v1432_v58, 5 }
 0x170   : > { %v1416_v56 = vrot.slane %v1410_v45, 4 }
 0x171   : > { %1295 = vrot.lane.b32.xlu0 %v1292_v49, %s4898_s6  ;;  %v1417_v49 = vrot.slane %v3416_v38, 4  ;;  %v3579_v38 = vstv %s3373_s23  ;;  %s3615_s23 = sld [smem:[#allocation7 + $0x58]] }
 0x172   : > { %1242 = vrot.lane.b32.xlu1 %v1237_v50, %s4898_s6  ;;  %v3443_v50 = vmul.f32 %v1431_v47, %v3042_v37 }
 0x173   : > { %v1418_v62 = vsel %vm577_vm7, %v1416_v56, %v1417_v49  ;;  %v3573_v56 = vstv %s3368_s22  ;;  %s3604_s22 = sld [smem:[#allocation7 + $0x1a]] }
 0x174   : > { %v3337_v59 = vpop.permute.xlu1 %682  ;;  %v1389_v18 = vstv %s3335_s10  ;;  %s3452_s10 = sld [smem:[#allocation7 + $0x54]]  ;;  %v1439_v1 = vrot.slane %v3443_v50, 5  ;;  %v3630_v50 = vstv %s3461_s27 }
 0x175   : > { %4950 = vst [vmem:[#allocation28_spill] sm:$0xff] %v3337_v59  ;;  %1317 = vrot.lane.b32.xlu0 %v1314_v60, %s4898_s6  ;;  %v3391_v25 = vmul.f32 %v1389_v18, %v3042_v37  ;;  %v1390_v30 = vmul.f32 %v1389_v18, %v2996_v8  ;;  %v1358_v8 = vsel %vm542_vm6, %v1355_v10, %v1357_v53  ;;  %s2576_s27 = sld [smem:[#allocation7 + $0x22]] }
 0x176   : > { %1255 = vrot.lane.b32.xlu1 %v1250_v61, %s4898_s6  ;;  %v1451_v61 = vstv %s3405_s30  ;;  %v1392_v4 = vmul.f32 %v1389_v18, %v3081_v0  ;;  %s3477_s30 = sld [smem:[#allocation7 + $0x4]]  ;;  %v1440_v10 = vsel %vm612_vm8, %v1438_v6, %v1439_v1  ;;  %v1412_v18 = vmul.f32 %v1409_v32, %v3174_v24 }
 0x177   : > { %v3353_v5 = vpop.permute.xlu0 %715  ;;  %v1397_v36 = vrot.slane %v3391_v25, 4  ;;  %v1396_v42 = vrot.slane %v1390_v30, 4  ;;  %v3470_v2 = vmul.f32 %v1451_v61, %v3065_v54  ;;  %v3531_v30 = vmul.f32 %v3519_v11, %v3065_v54  ;;  %v3543_v54 = vld [vmem:[#allocation5] sm:$0xff] }
 0x178   : > { %4951 = vst [vmem:[#allocation29_spill] sm:$0xff] %v3353_v5  ;;  %v3359_v7 = vpop.permute.xlu1 %962  ;;  %v1399_v16 = vrot.slane %v1392_v4, 4  ;;  %4967 = vst [vmem:[#allocation44_spill] sm:$0xff] %v3543_v54  ;;  %v1494_v41 = vmul.f32 %v3543_v54, %v3519_v11  ;;  %v3596_v4 = vstv %s3418_s4  ;;  %s4645_s4 = sld [smem:[#allocation7 + $0x14]] }
 0x179   : > { %4952 = vst [vmem:[#allocation30_spill] sm:$0xff] %v3359_v7  ;;  %1337 = vrot.lane.b32.xlu0 %v1334_v9, %s4898_s6  ;;  %v1398_v48 = vsel %vm577_vm7, %v1396_v42, %v1397_v36  ;;  %v1452_v9 = vmul.f32 %v1451_v61, %v3020_v21  ;;  %v1459_v14 = vrot.slane %v3470_v2, 5  ;;  %v3498_v21 = vmul.f32 %v3486_v13, %v3042_v37 }
 0x17a   : > { %1277 = vrot.lane.b32.xlu1 %v1274_v12, %s4898_s6  ;;  %v1400_v32 = vsel %vm577_vm7, %v1397_v36, %v1399_v16  ;;  %v4911_v45 = vrot.slane %v3531_v30, 6  ;;  %v1500_v58 = vrot.slane %v1494_v41, 6  ;;  %v3646_v41 = vld [vmem:[#allocation4 + $0x8] sm:$0xff]  ;;  %v3678_v2 = vstv %s3533_s13  ;;  %s4306_s13 = sld [smem:[#allocation7 + $0x4b]] }
 0x17b   : > { %v3377_v17 = vpop.permute.xlu0 %757  ;;  %v4912_v29 = vrot.slane %v3498_v21, 6  ;;  %v4980_v7 = vrot.slane %v3498_v21, 6  ;;  %v3718_v53 = vstv %s3604_s22  ;;  %s2581_s22 = sld [smem:[#allocation7 + $0x61]] }
 0x17c   : > { %4953 = vst [vmem:[#allocation31_spill] sm:$0xff] %v3377_v17  ;;  %v3384_v20 = vpop.permute.xlu1 %695  ;;  %4981 = vst [vmem:[#allocation57_spill] sm:$0xff] %v3718_v53 }
 0x17d   : > { %4954 = vst [vmem:[#allocation32_spill] sm:$0xff] %v3384_v20  ;;  %1359 = vrot.lane.b32.xlu0 %v1356_v22, %s4898_s6  ;;  %v1458_v22 = vrot.slane %v1452_v9, 5  ;;  %v1502_v9 = vsel %vm647_vm9, %v1500_v58, %v4911_v45 }
 0x17e   : > { %1297 = vrot.lane.b32.xlu1 %v1294_v26, %s4898_s6  ;;  %v3510_v26 = vld [vmem:[#allocation4] sm:$0xff] }
 0x17f   : > { %v3402_v31 = vpop.permute.xlu0 %799  ;;  %4964 = vst [vmem:[#allocation41_spill] sm:$0xff] %v3510_v26  ;;  %v1474_v37 = vmul.f32 %v3510_v26, %v3486_v13  ;;  %v1460_v28 = vsel %vm612_vm8, %v1458_v22, %v1459_v14  ;;  %v1476_v22 = vmul.f32 %v3486_v13, %v3081_v0  ;;  %v3638_v13 = vstv %s3481_s1  ;;  %s3658_s1 = sld [smem:[#allocation7 + $0x36]] }
 0x180   : > { %4955 = vst [vmem:[#allocation33_spill] sm:$0xff] %v3402_v31  ;;  %v3409_v33 = vpop.permute.xlu1 %975  ;;  %v1544_v3 = vmul.f32 %v3510_v26, %v3638_v13 }
 0x181   : > { %4956 = vst [vmem:[#allocation34_spill] sm:$0xff] %v3409_v33  ;;  %1379 = vrot.lane.b32.xlu0 %v1376_v35, %s4898_s6  ;;  %v1419_v35 = vrot.slane %v1412_v18, 4  ;;  %v1480_v40 = vrot.slane %v1474_v37, 6  ;;  %v3618_v37 = vstv %s3434_s9  ;;  %v1483_v58 = vrot.slane %v1476_v22, 6  ;;  %s2573_s9 = sld [smem:[#allocation7 + $0x45]] }
 0x182   : > { %1319 = vrot.lane.b32.xlu1 %v1316_v39, %s4898_s6  ;;  %v1434_v39 = vmul.f32 %v1431_v47, %v3081_v0  ;;  %v3687_v22 = vstv %s3559_s12  ;;  %s4267_s12 = sld [smem:[#allocation7 + $0x44]] }
 0x183   : > { %v3429_v46 = vpop.permute.xlu0 %841  ;;  %v1482_v42 = vsel %vm647_vm9, %v1480_v40, %v4912_v29  ;;  %v1420_v47 = vsel %vm577_vm7, %v1417_v49, %v1419_v35  ;;  %v3582_v49 = vstv %s3382_s28  ;;  %s3627_s28 = sld [smem:[#allocation7 + $0x5f]]  ;;  %v3641_v35 = vstv %s3488_s19  ;;  %s2825_s19 = smov 124   ;;  %v3698_v29 = vld [vmem:[#allocation5 + $0x8] sm:$0xff] }
 0x184   : > { %4957 = vst [vmem:[#allocation35_spill] sm:$0xff] %v3429_v46  ;;  %v3436_v43 = vpop.permute.xlu1 %717  ;;  %v4913_v40 = vstv %s3521_s14  ;;  %v1484_v33 = vsel %vm647_vm9, %v4980_v7, %v1483_v58  ;;  %v3732_v7 = vmul.f32 %v3510_v26, %v3573_v56  ;;  %v3736_v58 = vmul.f32 %v3510_v26, %v3579_v38 }
 0x185   : > { %4958 = vst [vmem:[#allocation36_spill] sm:$0xff] %v3436_v43  ;;  %1401 = vrot.lane.b32.xlu0 %v1398_v48, %s4898_s6  ;;  %v1441_v48 = vrot.slane %v1434_v39, 5  ;;  %v3762_v43 = vmul.f32 %v3510_v26, %v4985_v34  ;;  %v1586_v34 = vmul.f32 %v3510_v26, %v3641_v35 }
 0x186   : > { %1339 = vrot.lane.b32.xlu1 %v1336_v51, %s4898_s6  ;;  %v1454_v51 = vmul.f32 %v1451_v61, %v3174_v24  ;;  %v3588_v61 = vstv %s3398_s8  ;;  %s4620_s8 = sld [smem:[#allocation7 + $0x37]] }
 0x187   : > { %v3456_v60 = vpop.permute.xlu0 %883  ;;  %4971 = vst [vmem:[#allocation48_spill] sm:$0xff] %v3588_v61  ;;  %v1442_v16 = vsel %vm612_vm8, %v1439_v1, %v1441_v48  ;;  %v3656_v48 = vstv %s3507_s7  ;;  %v3766_v57 = vmul.f32 %v3510_v26, %v3588_v61  ;;  %s4730_s7 = sld [smem:[#allocation7 + $0x29]] }
 0x188   : > { %4959 = vst [vmem:[#allocation37_spill] sm:$0xff] %v3456_v60  ;;  %v3463_v52 = vpop.permute.xlu1 %759  ;;  %v1461_v18 = vrot.slane %v1454_v51, 5  ;;  %v3826_v60 = vmul.f32 %v3543_v54, %v3596_v4 }
 0x189   : > { %4960 = vst [vmem:[#allocation38_spill] sm:$0xff] %v3463_v52  ;;  %1421 = vrot.lane.b32.xlu0 %v1418_v62, %s4898_s6  ;;  %v3585_v62 = vstv %s3393_s29  ;;  %v3728_v21 = vstv %s3627_s28  ;;  %4986 = vst [vmem:[#allocation60_spill] sm:$0xff] %v3766_v57  ;;  %s4612_s29 = sld [smem:[#allocation7 + $0xd]]  ;;  %s2480_s28 = sshll.u32 %s2935_s18, 4 }
 0x18a   : > { %1361 = vrot.lane.b32.xlu1 %v1358_v8, %s4898_s6  ;;  %s3500_s6 = sld [smem:[#allocation7 + $0x19]]  ;;  %4970 = vst [vmem:[#allocation47_spill] sm:$0xff] %v3585_v62  ;;  %v1462_v51 = vsel %vm612_vm8, %v1459_v14, %v1461_v18 }
 0x18b   : > { %v3483_v12 = vpop.permute.xlu0 %925 }
 0x18c   : > { %4961 = vst [vmem:[#allocation39_spill] sm:$0xff] %v3483_v12  ;;  %v3490_v63 = vpop.permute.xlu1 %801  ;;  %v4992_v12 = vstv %s3477_s30 }
 0x18d   : > { %4962 = vst [vmem:[#allocation40_spill] sm:$0xff] %v3490_v63  ;;  %1443 = vrot.lane.b32.xlu0 %v1440_v10, %s4963_s16  ;;  %v4910_v10 = vstv %s3477_s30  ;;  %v3756_v63 = vmul.f32 %v3646_v41, %v3641_v35  ;;  %v1517_v20 = vmul.f32 %v3646_v41, %v4992_v12  ;;  %s4714_s30 = sld [smem:[#allocation7 + $0x53]] }
 0x18e   : > { %1381 = vrot.lane.b32.xlu1 %v1378_v15, %s4963_s16  ;;  %v3607_v15 = vstv %s3425_s5  ;;  %v1516_v0 = vmul.f32 %v3510_v26, %v4910_v10  ;;  %v3690_v10 = vstv %s3566_s2  ;;  %s2826_s2 = smov 123   ;;  %s2827_s5 = smov 122  }
 0x18f   : > { %v3516_v27 = vpop.permute.xlu0 %995 }
 0x190   : > { %4965 = vst [vmem:[#allocation42_spill] sm:$0xff] %v3516_v27  ;;  %v3523_v23 = vpop.permute.xlu1 %843 }
 0x191   : > { %4966 = vst [vmem:[#allocation43_spill] sm:$0xff] %v3523_v23  ;;  %1463 = vrot.lane.b32.xlu0 %v1460_v28, %s4963_s16  ;;  %v3621_v28 = vstv %s3445_s11  ;;  %s2574_s11 = sld [smem:[#allocation7 + $0x1b]] }
 0x192   : > { %1403 = vrot.lane.b32.xlu1 %v1400_v32, %s4963_s16  ;;  %v3624_v32 = vstv %s3452_s10  ;;  %s2575_s10 = sld [smem:[#allocation7 + $0x4c]] }
 0x193   : > { %v3549_v25 = vpop.permute.xlu0 %1037 }
 0x194   : > { %4968 = vst [vmem:[#allocation45_spill] sm:$0xff] %v3549_v25  ;;  %v3553_v36 = vpop.permute.xlu1 %885 }
 0x195   : > { %4969 = vst [vmem:[#allocation46_spill] sm:$0xff] %v3553_v36  ;;  %1485 = vrot.lane.b32.xlu0 %v1482_v42, %s4963_s16  ;;  %v3650_v42 = vmul.f32 %v3646_v41, %v3638_v13 }
 0x196   : > { %1423 = vrot.lane.b32.xlu1 %v1420_v47, %s4963_s16  ;;  %v3653_v47 = vstv %s3500_s6  ;;  %s3669_s6 = sld [smem:[#allocation7 + $0x3d]] }
 0x197   : > { %v3590_v8 = vpop.permute.xlu0 %1079  ;;  %v4984_v25 = vrot.slane %v3650_v42, 1  ;;  %v3781_v59 = vmul.f32 %v3510_v26, %v3653_v47 }
 0x198   : > { %4972 = vst [vmem:[#allocation49_spill] sm:$0xff] %v3590_v8  ;;  %v3598_v6 = vpop.permute.xlu1 %927  ;;  %v1550_v8 = vrot.slane %v1544_v3, 1 }
 0x199   : > { %4973 = vst [vmem:[#allocation50_spill] sm:$0xff] %v3598_v6  ;;  %1505 = vrot.lane.b32.xlu0 %v1502_v9, %s4963_s16  ;;  %v1496_v9 = vmul.f32 %v3519_v11, %v3174_v24  ;;  %v1529_v11 = vmul.f32 %v3543_v54, %v4913_v40  ;;  %v3708_v40 = vstv %s3576_s24  ;;  %v3722_v6 = vmul.f32 %v3510_v26, %v3570_v55  ;;  %s4477_s24 = sld [smem:[#allocation7 + $0x59]] }
 0x19a   : > { %1445 = vrot.lane.b32.xlu1 %v1442_v16, %s4963_s16  ;;  %v3667_v16 = vstv %s3514_s25  ;;  %4979 = vst [vmem:[#allocation56_spill] sm:$0xff] %v3708_v40  ;;  %v1552_v23 = vsel %vm472_vm4, %v1550_v8, %v4984_v25  ;;  %v4987_v25 = vrot.slane %v3531_v30, 6  ;;  %v3800_v30 = vmul.f32 %v3698_v29, %v3687_v22  ;;  %s4508_s25 = sld [smem:[#allocation7 + $0x2f]] }
 0x19b   : > { %v3632_v1 = vpop.permute.xlu0 %1121  ;;  %v3814_v12 = vmul.f32 %v3510_v26, %v3667_v16  ;;  %v4995_v40 = vrot.slane %v3756_v63, 2 }
 0x19c   : > { %4974 = vst [vmem:[#allocation51_spill] sm:$0xff] %v3632_v1  ;;  %v3643_v39 = vpop.permute.xlu1 %997  ;;  %v1503_v1 = vrot.slane %v1496_v9, 6  ;;  %v3740_v9 = vmul.f32 %v3510_v26, %v3582_v49  ;;  %v3773_v27 = vstv %s3669_s6  ;;  %s2590_s6 = sshll.u32 %s2801_s15, 8  ;;  %s2828_s15 = smov [#allocation11]  }
 0x19d   : > { %4975 = vst [vmem:[#allocation52_spill] sm:$0xff] %v3643_v39  ;;  %1520 = vrot.lane.b32.xlu0 %v1516_v0, %s2825_s19  ;;  %v3675_v0 = vstv %s3540_s20  ;;  %v3705_v39 = vstv %s3592_s21  ;;  %4988 = vst [vmem:[#allocation61_spill] sm:$0xff] %v3773_v27  ;;  %v3874_v27 = vmul.f32 %v3543_v54, %v3624_v32  ;;  %s4747_s20 = sld [smem:[#allocation7 + $0x5a]] }
 0x19e   : > { %1465 = vrot.lane.b32.xlu1 %v1462_v51, %s4963_s16  ;;  %v3693_v51 = vstv %s3551_s26  ;;  %v3702_v14 = vmul.f32 %v3698_v29, %v3675_v0  ;;  %v1504_v8 = vsel %vm647_vm9, %v4987_v25, %v1503_v1  ;;  %v3804_v25 = vld [vmem:[#allocation4 + $0x10] sm:$0x3f]  ;;  %v1634_v1 = vrot.slane %v3781_v59, 3  ;;  %s4541_s26 = sld [smem:[#allocation7 + $0x60]] }
 0x19f   : > { %v3681_v18 = vpop.permute.xlu0 %735  ;;  %4977 = vst [vmem:[#allocation54_spill] sm:$0xff] %v3693_v51  ;;  %v3838_v59 = vmul.f32 %v3543_v54, %v3621_v28  ;;  %s4764_s21 = sld [smem:[#allocation7 + $0x30]] }
 0x1a0   : > { %4976 = vst [vmem:[#allocation53_spill] sm:$0xff] %v3681_v18  ;;  %v3695_v45 = vpop.permute.xlu1 %1039 }
 0x1a1   : > { %4978 = vst [vmem:[#allocation55_spill] sm:$0xff] %v3695_v45  ;;  %1533 = vrot.lane.b32.xlu0 %v1529_v11, %s2825_s19  ;;  %v3715_v45 = vstv %s3615_s23  ;;  %v1564_v11 = vmul.f32 %v3543_v54, %v3675_v0  ;;  %s4836_s23 = sld [smem:[#allocation7 + $0x62]] }
 0x1a2   : > { %1487 = vrot.lane.b32.xlu1 %v1484_v33, %s4963_s16  ;;  %v3744_v33 = vmul.f32 %v3510_v26, %v3585_v62 }
 0x1a3   : > { %v3746_v3 = vpop.permute.xlu0 %777  ;;  %v1570_v52 = vrot.slane %v1564_v11, 1  ;;  %v4991_v11 = vrot.slane %v3702_v14, 1 }
 0x1a4   : > { %4982 = vst [vmem:[#allocation58_spill] sm:$0xff] %v3746_v3  ;;  %v3748_v36 = vpop.permute.xlu1 %1081  ;;  %v3853_v3 = vmul.f32 %v3646_v41, %v3653_v47 }
 0x1a5   : > { %4983 = vst [vmem:[#allocation59_spill] sm:$0xff] %v3748_v36  ;;  %1555 = vrot.lane.b32.xlu0 %v1552_v23, %s2825_s19  ;;  %v1546_v23 = vmul.f32 %v3804_v25, %v3638_v13  ;;  %v3822_v13 = vmul.f32 %v3510_v26, %v3678_v2 }
 0x1a6   : > { %1507 = vrot.lane.b32.xlu1 %v1504_v8, %s4963_s16  ;;  %v1572_v8 = vsel %vm472_vm4, %v1570_v52, %v4991_v11  ;;  %v3810_v52 = vmul.f32 %v3510_v26, %v3656_v48  ;;  %v1592_v11 = vrot.slane %v1586_v34, 2  ;;  %s4408_s16 = sld [smem:[#allocation7 + $0x52]] }
 0x1a7   : > { %v3787_v53 = vpop.permute.xlu0 %819  ;;  %v1553_v5 = vrot.slane %v1546_v23, 1  ;;  %v3897_v23 = vmul.f32 %v3698_v29, %v3690_v10 }
 0x1a8   : > { %4989 = vst [vmem:[#allocation62_spill] sm:$0xff] %v3787_v53  ;;  %v3789_v36 = vpop.permute.xlu1 %1123  ;;  %v1594_v31 = vsel %vm507_vm5, %v1592_v11, %v4995_v40  ;;  %v4996_v53 = vstv %s3521_s14  ;;  %v3865_v40 = vmul.f32 %v3510_v26, %v3693_v51  ;;  %v5004_v51 = vrot.slane %v3800_v30, 2  ;;  %s4354_s14 = sld [smem:[#allocation7 + $0x21]] }
 0x1a9   : > { %4990 = vst [vmem:[#allocation63_spill] sm:$0xff] %v3789_v36  ;;  %1575 = vrot.lane.b32.xlu0 %v1572_v8, %s2825_s19  ;;  %v1606_v8 = vmul.f32 %v3543_v54, %v3687_v22  ;;  %v3830_v36 = vmul.f32 %v3543_v54, %v3607_v15  ;;  %v1530_v17 = vmul.f32 %v3698_v29, %v4996_v53  ;;  %v5000_v53 = vstv %s3407_s3 }
 0x1aa   : > { %1522 = vrot.lane.b32.xlu1 %v1517_v20, %s2825_s19  ;;  %v3834_v20 = vmul.f32 %v3543_v54, %v3618_v37  ;;  %4999 = vst [vmem:[#allocation67_spill] sm:$0xff] %v3865_v40  ;;  %v3870_v11 = vmul.f32 %v3543_v54, %v5000_v53  ;;  %v1648_v53 = vmul.f32 %v3543_v54, %v3690_v10 }
 0x1ab   : > { %v3840_v34 = vpop.permute.xlu0 %861 }
 0x1ac   : > { %4993 = vst [vmem:[#allocation64_spill] sm:$0xff] %v3840_v34  ;;  %v3842_v46 = vpop.permute.xlu1 %737  ;;  %v1566_v34 = vmul.f32 %v3675_v0, %v3174_v24 }
 0x1ad   : > { %4994 = vst [vmem:[#allocation65_spill] sm:$0xff] %v3842_v46  ;;  %1597 = vrot.lane.b32.xlu0 %v1594_v31, %s2825_s19  ;;  %v4997_v46 = vstv %s3547_s17  ;;  %v3878_v31 = vmul.f32 %v3543_v54, %v3630_v50 }
 0x1ae   : > { %v3861_v18 = vmul.f32 %v3510_v26, %v4997_v46  ;;  %1535 = vrot.lane.b32.xlu1 %v1530_v17, %s2825_s19  ;;  %v1612_v46 = vrot.slane %v1606_v8, 2  ;;  %v4923_v8 = vrot.slane %v3853_v3, 3  ;;  %v5005_v26 = vrot.slane %v3650_v42, 1 }
 0x1af   : > { %5001 = vst [vmem:[#allocation68_spill] sm:$0xff] %v3878_v31  ;;  %v3884_v19 = vpop.permute.xlu0 %903  ;;  %v3936_v42 = vmul.f32 %v3646_v41, %v3656_v48 }
 0x1b0   : > { %4998 = vst [vmem:[#allocation66_spill] sm:$0xff] %v3861_v18  ;;  %5002 = vst [vmem:[#allocation69_spill] sm:$0xff] %v3884_v19  ;;  %v3889_v44 = vpop.permute.xlu1 %779  ;;  %v1614_v17 = vsel %vm507_vm5, %v1612_v46, %v5004_v51  ;;  %v1554_v0 = vsel %vm472_vm4, %v5005_v26, %v1553_v5  ;;  %v1573_v19 = vrot.slane %v1566_v34, 1  ;;  %v1588_v18 = vmul.f32 %v3804_v25, %v3641_v35 }
 0x1b1   : > { %5003 = vst [vmem:[#allocation70_spill] sm:$0xff] %v3889_v44  ;;  %1617 = vrot.lane.b32.xlu0 %v1614_v17, %s2825_s19  ;;  %v3907_v44 = vmul.f32 %v3543_v54, %v3705_v39  ;;  %v1676_v17 = vrot.slane %v3810_v52, 4  ;;  %v3916_v5 = vmul.f32 %v3646_v41, %v3570_v55  ;;  %v3920_v26 = vmul.f32 %v3698_v29, %v3596_v4 }
 0x1b2   : > { %1557 = vrot.lane.b32.xlu1 %v1554_v0, %s2825_s19  ;;  %v1654_v34 = vrot.slane %v1648_v53, 3  ;;  %v3926_v46 = vmul.f32 %v3543_v54, %v3715_v45  ;;  %v1636_v52 = vsel %vm542_vm6, %v1634_v1, %v4923_v8  ;;  %v5008_v53 = vrot.slane %v3702_v14, 1 }
 0x1b3   : > { %v3922_v35 = vpop.permute.xlu0 %945  ;;  %v1595_v31 = vrot.slane %v1588_v18, 2  ;;  %v1696_v1 = vrot.slane %v3907_v44, 4  ;;  %v3948_v8 = vmul.f32 %v3646_v41, %v3573_v56  ;;  %v3952_v51 = vmul.f32 %v3646_v41, %v3579_v38 }
 0x1b4   : > { %5006 = vst [vmem:[#allocation71_spill] sm:$0xff] %v3922_v35  ;;  %v3928_v0 = vpop.permute.xlu1 %821  ;;  %v1574_v57 = vsel %vm472_vm4, %v5008_v53, %v1573_v19  ;;  %v3957_v14 = vmul.f32 %v3543_v54, %v3728_v21  ;;  %v5009_v19 = vstv %s3658_s1  ;;  %v3967_v44 = vmul.f32 %v3646_v41, %v3582_v49 }
 0x1b5   : > { %5007 = vst [vmem:[#allocation72_spill] sm:$0xff] %v3928_v0  ;;  %1639 = vrot.lane.b32.xlu0 %v1636_v52, %s2825_s19  ;;  %v1608_v0 = vmul.f32 %v3687_v22, %v3174_v24  ;;  %v3962_v18 = vmul.f32 %v3543_v54, %v5009_v19  ;;  %v3975_v53 = vmul.f32 %v3646_v41, %v3585_v62  ;;  %v5013_v19 = vrot.slane %v3897_v23, 3 }
 0x1b6   : > { %1577 = vrot.lane.b32.xlu1 %v1574_v57, %s2825_s19  ;;  %v3989_v22 = vmul.f32 %v3698_v29, %v3607_v15  ;;  %v5014_v57 = vrot.slane %v3756_v63, 2  ;;  %v5016_v63 = vrot.slane %v3722_v6, 1  ;;  %v5021_v6 = vrot.slane %v3936_v42, 4 }
 0x1b7   : > { %5010 = vst [vmem:[#allocation73_spill] sm:$0xff] %v3962_v18  ;;  %v3970_v52 = vpop.permute.xlu0 %1015  ;;  %v1656_v24 = vsel %vm542_vm6, %v1654_v34, %v5013_v19  ;;  %v3985_v18 = vmul.f32 %v3698_v29, %v3705_v39  ;;  %v1630_v34 = vmul.f32 %v3804_v25, %v3653_v47  ;;  %v5017_v47 = vrot.slane %v3920_v26, 1 }
 0x1b8   : > { %5011 = vst [vmem:[#allocation74_spill] sm:$0xff] %v3970_v52  ;;  %v3977_v35 = vpop.permute.xlu1 %863  ;;  %v1615_v52 = vrot.slane %v1608_v0, 2 }
 0x1b9   : > { %5012 = vst [vmem:[#allocation75_spill] sm:$0xff] %v3977_v35  ;;  %1659 = vrot.lane.b32.xlu0 %v1656_v24, %s2825_s19  ;;  %v1596_v35 = vsel %vm507_vm5, %v5014_v57, %v1595_v31  ;;  %v5015_v24 = vrot.slane %v3916_v5, 1  ;;  %v5018_v57 = vrot.slane %v3826_v60, 1  ;;  %v4028_v60 = vmul.f32 %v3646_v41, %v3667_v16 }
 0x1ba   : > { %1599 = vrot.lane.b32.xlu1 %v1596_v35, %s2825_s19  ;;  %v4015_v35 = vmul.f32 %v3698_v29, %v3618_v37  ;;  %v1637_v0 = vrot.slane %v1630_v34, 3 }
 0x1bb   : > { %v475_v31 = vsel %vm472_vm4, %v5016_v63, %v5015_v24  ;;  %v491_v54 = vsel %vm472_vm4, %v5018_v57, %v5017_v47  ;;  %v4017_v40 = vpop.permute.xlu0 %1057  ;;  %v1678_v24 = vsel %vm577_vm7, %v1676_v17, %v5021_v6  ;;  %v5022_v57 = vrot.slane %v3800_v30, 2 }
 0x1bc   : > { %5019 = vst [vmem:[#allocation76_spill] sm:$0xff] %v4017_v40  ;;  %v4020_v19 = vpop.permute.xlu1 %905  ;;  %v480_v6 = vadd.f32 %v475_v31, %v3762_v43  ;;  %v5023_v63 = vrot.slane %v3948_v8, 2  ;;  %v5024_v40 = vrot.slane %v3732_v7, 2  ;;  %v5026_v30 = vrot.slane %v3736_v58, 3 }
 0x1bd   : > { %5020 = vst [vmem:[#allocation77_spill] sm:$0xff] %v4020_v19  ;;  %1681 = vrot.lane.b32.xlu0 %v1678_v24, %s2825_s19  ;;  %v1616_v62 = vsel %vm507_vm5, %v5022_v57, %v1615_v52  ;;  %v4035_v19 = vld [vmem:[#allocation5 + $0x10] sm:$0x3f]  ;;  %v5025_v24 = vrot.slane %v3952_v51, 3  ;;  %v496_v34 = vadd.f32 %v491_v54, %v3870_v11  ;;  %v4059_v7 = vmul.f32 %v3698_v29, %v3621_v28 }
 0x1be   : > { %v1650_v17 = vmul.f32 %v4035_v19, %v3690_v10  ;;  %v510_v47 = vsel %vm507_vm5, %v5024_v40, %v5023_v63  ;;  %1619 = vrot.lane.b32.xlu1 %v1616_v62, %s2825_s19  ;;  %v4054_v10 = vmul.f32 %v3646_v41, %v3588_v61  ;;  %v468_v40 = vmul.f32 %v3804_v25, %v3570_v55 }
 0x1bf   : > { %v545_v52 = vsel %vm542_vm6, %v5026_v30, %v5025_v24  ;;  %v4063_v58 = vpop.permute.xlu0 %1099  ;;  %v485_v54 = vmul.f32 %v4035_v19, %v3596_v4  ;;  %v5029_v62 = vrot.slane %v3985_v18, 4  ;;  %v4075_v57 = vmul.f32 %v3698_v29, %v3715_v45 }
 0x1c0   : > { %5027 = vst [vmem:[#allocation78_spill] sm:$0xff] %v4063_v58  ;;  %v4067_v11 = vpop.permute.xlu1 %947  ;;  %v5030_v24 = vrot.slane %v3989_v22, 2  ;;  %v5031_v55 = vrot.slane %v3830_v36, 2  ;;  %v5032_v4 = vrot.slane %v3853_v3, 3  ;;  %v5033_v63 = vrot.slane %v3967_v44, 4 }
 0x1c1   : > { %5028 = vst [vmem:[#allocation79_spill] sm:$0xff] %v4067_v11  ;;  %v1698_v31 = vsel %vm577_vm7, %v1696_v1, %v5029_v62  ;;  %v1657_v11 = vrot.slane %v1650_v17, 3  ;;  %v1672_v1 = vmul.f32 %v3804_v25, %v3656_v48  ;;  %v515_v62 = vadd.f32 %v510_v47, %v480_v6 }
 0x1c2   : > { %v526_v30 = vsel %vm507_vm5, %v5031_v55, %v5030_v24  ;;  %1701 = vrot.lane.b32.xlu0 %v1698_v31, %s2825_s19  ;;  %v1638_v43 = vsel %vm542_vm6, %v5032_v4, %v1637_v0  ;;  %v5034_v58 = vrot.slane %v3740_v9, 4  ;;  %v4095_v24 = vmul.f32 %v3698_v29, %v3624_v32 }
 0x1c3   : > { %v531_v36 = vadd.f32 %v526_v30, %v496_v34  ;;  %1641 = vrot.lane.b32.xlu1 %v1638_v43, %s2825_s19  ;;  %v5035_v3 = vrot.slane %v3975_v53, 5  ;;  %v5036_v0 = vrot.slane %v3744_v33, 5  ;;  %v595_v17 = vrot.slane %v4059_v7, 4  ;;  %v4105_v6 = vpop.permute.xlu0 %1141 }
 0x1c4   : > { %v580_v61 = vsel %vm577_vm7, %v5034_v58, %v5033_v63  ;;  %v476_v9 = vrot.slane %v468_v40, 1  ;;  %v492_v34 = vrot.slane %v485_v54, 1  ;;  %v4107_v58 = vpop.permute.xlu1 %1017  ;;  %v5037_v31 = vrot.slane %v4028_v60, 5 }
 0x1c5   : > { %v615_v48 = vsel %vm612_vm8, %v5036_v0, %v5035_v3  ;;  %v5038_v43 = vrot.slane %v3814_v12, 5  ;;  %v1739_v33 = vrot.slane %v4075_v57, 5  ;;  %v4117_v55 = vmul.f32 %v3646_v41, %v3678_v2 }
 0x1c6   : > { %v5039_v30 = vrot.slane %v4015_v35, 3  ;;  %v5040_v40 = vrot.slane %v3834_v20, 3  ;;  %v5041_v4 = vrot.slane %v3897_v23, 3  ;;  %v1679_v3 = vrot.slane %v1672_v1, 4 }
 0x1c7   : > { %v1720_v63 = vsel %vm612_vm8, %v5038_v43, %v5037_v31  ;;  %v1692_v0 = vmul.f32 %v4035_v19, %v3705_v39  ;;  %v550_v31 = vadd.f32 %v545_v52, %v515_v62  ;;  %v630_v47 = vrot.slane %v4095_v24, 5  ;;  %v4148_v62 = vpop.permute.xlu0 %1163  ;;  %v5079_v24 = vld [vmem:[#allocation67_spill] sm:$0xff] }
 0x1c8   : > { %v561_v54 = vsel %vm542_vm6, %v5040_v40, %v5039_v30  ;;  %1723 = vrot.lane.b32.xlu0 %v1720_v63, %s2825_s19  ;;  %v1658_v12 = vsel %vm542_vm6, %v5041_v4, %v1657_v11  ;;  %v520_v20 = vmul.f32 %v4035_v19, %v3607_v15  ;;  %v5042_v23 = vrot.slane %v3838_v59, 4  ;;  %v4153_v63 = vpop.permute.xlu1 %1059 }
 0x1c9   : > { %v566_v43 = vadd.f32 %v561_v54, %v531_v36  ;;  %1661 = vrot.lane.b32.xlu1 %v1658_v12, %s2825_s19  ;;  %v4141_v39 = vmul.f32 %v3698_v29, %v3630_v50  ;;  %v5043_v52 = vrot.slane %v3916_v5, 1  ;;  %v503_v15 = vmul.f32 %v3804_v25, %v3573_v56 }
 0x1ca   : > { %v596_v11 = vsel %vm577_vm7, %v5042_v23, %v595_v17  ;;  %v5044_v36 = vrot.slane %v3920_v26, 1  ;;  %v5045_v30 = vrot.slane %v3926_v46, 5  ;;  %v1761_v5 = vrot.slane %v4117_v55, 6 }
 0x1cb   : > { %v477_v1 = vsel %vm472_vm4, %v5043_v52, %v476_v9  ;;  %v4163_v9 = vmul.f32 %v3698_v29, %v3728_v21  ;;  %v5046_v56 = vstv %s3407_s3  ;;  %v5047_v26 = vrot.slane %v3936_v42, 4  ;;  %s4630_s3 = sld [smem:[#allocation7 + $0x3e]] }
 0x1cc   : > { %v493_v59 = vsel %vm472_vm4, %v5044_v36, %v492_v34  ;;  %v1740_v40 = vsel %vm612_vm8, %v5045_v30, %v1739_v33  ;;  %v460_v54 = vmul.f32 %v3698_v29, %v5046_v56  ;;  %v1699_v4 = vrot.slane %v1692_v0, 4  ;;  %v4182_v0 = vpop.permute.xlu0 %1183 }
 0x1cd   : > { %1743 = vrot.lane.b32.xlu0 %v1740_v40, %s2825_s19  ;;  %v1680_v34 = vsel %vm577_vm7, %v5047_v26, %v1679_v3  ;;  %v1714_v46 = vmul.f32 %v3804_v25, %v3667_v16  ;;  %v601_v12 = vadd.f32 %v596_v11, %v566_v43  ;;  %v5048_v23 = vstv %s3349_s0  ;;  %v4185_v11 = vpop.permute.xlu1 %1101  ;;  %s4601_s0 = sld [smem:[#allocation7 + $0x6]] }
 0x1ce   : > { %v455_v52 = vmul.f32 %v3646_v41, %v5048_v23  ;;  %v527_v36 = vrot.slane %v520_v20, 2  ;;  %v555_v30 = vmul.f32 %v4035_v19, %v3618_v37  ;;  %1683 = vrot.lane.b32.xlu1 %v1680_v34, %s2825_s19  ;;  %v585_v56 = vadd.f32 %v580_v61, %v550_v31 }
 0x1cf   : > { %v511_v40 = vrot.slane %v503_v15, 2  ;;  %v538_v42 = vmul.f32 %v3804_v25, %v3579_v38  ;;  %v497_v3 = vadd.f32 %v493_v59, %v460_v54  ;;  %v665_v16 = vrot.slane %v4141_v39, 6 }
 0x1d0   : > { %v481_v43 = vadd.f32 %v477_v1, %v455_v52  ;;  %v5049_v20 = vrot.slane %v3822_v13, 6  ;;  %v1781_v61 = vrot.slane %v4163_v9, 6  ;;  %v5050_v38 = vrot.slane %v3874_v27, 5 }
 0x1d1   : > { %v5051_v1 = vrot.slane %v3985_v18, 4  ;;  %v1721_v59 = vrot.slane %v1714_v46, 5  ;;  %v1734_v13 = vmul.f32 %v4035_v19, %v3715_v45  ;;  %v5052_v26 = vrot.slane %v3989_v22, 2  ;;  %v5054_v45 = vld [vmem:[#allocation68_spill] sm:$0xff] }
 0x1d2   : > { %v1762_v37 = vsel %vm647_vm9, %v5049_v20, %v1761_v5  ;;  %v631_v31 = vsel %vm612_vm8, %v5050_v38, %v630_v47  ;;  %v562_v23 = vrot.slane %v555_v30, 3  ;;  %v590_v27 = vmul.f32 %v4035_v19, %v3621_v28  ;;  %v4222_v30 = vpop.permute.xlu1 %1143  ;;  %v5059_v38 = vld [vmem:[#allocation60_spill] sm:$0xff] }
 0x1d3   : > { %1765 = vrot.lane.b32.xlu0 %v1762_v37, %s2825_s19  ;;  %v1700_v15 = vsel %vm577_vm7, %v5051_v1, %v1699_v4  ;;  %v636_v54 = vadd.f32 %v631_v31, %v601_v12  ;;  %v528_v34 = vsel %vm507_vm5, %v5052_v26, %v527_v36  ;;  %v620_v52 = vadd.f32 %v615_v48, %v585_v56  ;;  %v4213_v37 = vpop.permute.xlu0 %1205 }
 0x1d4   : > { %1703 = vrot.lane.b32.xlu1 %v1700_v15, %s2825_s19  ;;  %v5053_v18 = vrot.slane %v3948_v8, 2  ;;  %v546_v46 = vrot.slane %v538_v42, 3  ;;  %v532_v20 = vadd.f32 %v528_v34, %v497_v3  ;;  %v5055_v22 = vrot.slane %v5054_v45, 6  ;;  %v5065_v45 = vld [vmem:[#allocation26_spill] sm:$0xff] }
 0x1d5   : > { %v573_v28 = vmul.f32 %v3804_v25, %v3582_v49  ;;  %v5056_v8 = vrot.slane %v3957_v14, 6  ;;  %v625_v56 = vmul.f32 %v4035_v19, %v3624_v32  ;;  %v1741_v3 = vrot.slane %v1734_v13, 5  ;;  %v5063_v13 = vld [vmem:[#allocation47_spill] sm:$0xff] }
 0x1d6   : > { %v512_v4 = vsel %vm507_vm5, %v5053_v18, %v511_v40  ;;  %v666_v12 = vsel %vm647_vm9, %v5055_v22, %v665_v16  ;;  %v5057_v40 = vrot.slane %v4028_v60, 5  ;;  %v1756_v49 = vmul.f32 %v3804_v25, %v3678_v2 }
 0x1d7   : > { %v516_v36 = vadd.f32 %v512_v4, %v481_v43  ;;  %v1782_v48 = vsel %vm647_vm9, %v5056_v8, %v1781_v61  ;;  %v5058_v43 = vrot.slane %v4054_v10, 6  ;;  %v5060_v31 = vrot.slane %v5059_v38, 6  ;;  %v4251_v18 = vpop.permute.xlu0 %1225  ;;  %v5064_v4 = vld [vmem:[#allocation54_spill] sm:$0xff]  ;;  %v5071_v38 = vld [vmem:[#allocation29_spill] sm:$0xff] }
 0x1d8   : > { %1785 = vrot.lane.b32.xlu0 %v1782_v48, %s2825_s19  ;;  %v1722_v42 = vsel %vm612_vm8, %v5057_v40, %v1721_v59  ;;  %v671_v1 = vadd.f32 %v666_v12, %v636_v54  ;;  %v5061_v15 = vrot.slane %v4015_v35, 3  ;;  %v597_v26 = vrot.slane %v590_v27, 4  ;;  %v4258_v12 = vpop.permute.xlu1 %1165  ;;  %v5068_v40 = vld [vmem:[#allocation53_spill] sm:$0xff] }
 0x1d9   : > { %v650_v14 = vsel %vm647_vm9, %v5060_v31, %v5058_v43  ;;  %1725 = vrot.lane.b32.xlu1 %v1722_v42, %s2825_s19  ;;  %v5062_v60 = vrot.slane %v3952_v51, 3  ;;  %v608_v2 = vmul.f32 %v3804_v25, %v5063_v13  ;;  %v4255_v54 = vmul.f32 %v3646_v41, %v5064_v4  ;;  %v5075_v13 = vld [vmem:[#allocation44_spill] sm:$0xff] }
 0x1da   : > { %v563_v32 = vsel %vm542_vm6, %v5061_v15, %v562_v23  ;;  %v655_v35 = vadd.f32 %v650_v14, %v620_v52  ;;  %v699_v23 = vadd.f32 %v5065_v45, %v671_v1  ;;  %v581_v22 = vrot.slane %v573_v28, 4  ;;  %v5067_v52 = vld [vmem:[#allocation24_spill] sm:$0xff]  ;;  %v5073_v15 = vld [vmem:[#allocation61_spill] sm:$0xff] }
 0x1db   : > { %v547_v59 = vsel %vm542_vm6, %v5062_v60, %v546_v46  ;;  %v567_v34 = vadd.f32 %v563_v32, %v532_v20  ;;  %v632_v51 = vrot.slane %v625_v56, 5  ;;  %v5066_v46 = vld [vmem:[#allocation66_spill] sm:$0xff]  ;;  %v1742_v20 = vsel %vm612_vm8, %v1739_v33, %v1741_v3  ;;  %v5069_v33 = vld [vmem:[#allocation48_spill] sm:$0xff]  ;;  %v5074_v60 = vld [vmem:[#allocation73_spill] sm:$0xff] }
 0x1dc   : > { %v551_v27 = vadd.f32 %v547_v59, %v516_v36  ;;  %1800 = vrot.lane.b32.xlu0 %v5066_v46, %s2826_s2  ;;  %v1763_v8 = vrot.slane %v1756_v49, 6  ;;  %v1776_v48 = vmul.f32 %v4035_v19, %v3728_v21  ;;  %v686_v36 = vadd.f32 %v5067_v52, %v655_v35  ;;  %v4279_v49 = vpop.permute.xlu0 %1240  ;;  %v4287_v1 = vpop.permute.xlu1 %1185 }
 0x1dd   : > { %v598_v28 = vsel %vm577_vm7, %v595_v17, %v597_v26  ;;  %v660_v56 = vmul.f32 %v4035_v19, %v3630_v50  ;;  %v741_v42 = vadd.f32 %v5068_v40, %v699_v23  ;;  %1745 = vrot.lane.b32.xlu1 %v1742_v20, %s2825_s19  ;;  %v616_v57 = vrot.slane %v608_v2, 5  ;;  %v5072_v50 = vld [vmem:[#allocation58_spill] sm:$0xff]  ;;  %v5083_v40 = vld [vmem:[#allocation56_spill] sm:$0xff] }
 0x1de   : > { %v643_v3 = vmul.f32 %v3804_v25, %v5069_v33  ;;  %v602_v21 = vadd.f32 %v598_v28, %v567_v34  ;;  %v1831_v43 = vrot.slane %v4255_v54, 1  ;;  %v5070_v7 = vrot.slane %v3967_v44, 4  ;;  %v5076_v34 = vld [vmem:[#allocation31_spill] sm:$0xff] }
 0x1df   : > { %v721_v31 = vadd.f32 %v5071_v38, %v686_v36  ;;  %v783_v14 = vadd.f32 %v5072_v50, %v741_v42  ;;  %v4291_v32 = vmul.f32 %v3698_v29, %v5073_v15  ;;  %v1764_v44 = vsel %vm647_vm9, %v1761_v5, %v1763_v8  ;;  %v5082_v36 = vld [vmem:[#allocation64_spill] sm:$0xff]  ;;  %v5085_v38 = vld [vmem:[#allocation35_spill] sm:$0xff]  ;;  %v5086_v50 = vld [vmem:[#allocation69_spill] sm:$0xff] }
 0x1e0   : > { %v582_v17 = vsel %vm577_vm7, %v5070_v7, %v581_v22  ;;  %1813 = vrot.lane.b32.xlu0 %v5074_v60, %s2826_s2  ;;  %v1783_v59 = vrot.slane %v1776_v48, 6  ;;  %v1844_v2 = vmul.f32 %v5075_v13, %v5073_v15  ;;  %v633_v45 = vsel %vm612_vm8, %v630_v47, %v632_v51  ;;  %v5077_v22 = vld [vmem:[#allocation62_spill] sm:$0xff]  ;;  %v4311_v8 = vpop.permute.xlu0 %1253  ;;  %v5081_v48 = vld [vmem:[#allocation33_spill] sm:$0xff] }
 0x1e1   : > { %v586_v26 = vadd.f32 %v582_v17, %v551_v27  ;;  %v763_v35 = vadd.f32 %v5076_v34, %v721_v31  ;;  %v667_v23 = vrot.slane %v660_v56, 6  ;;  %v825_v27 = vadd.f32 %v5077_v22, %v783_v14  ;;  %1767 = vrot.lane.b32.xlu1 %v1764_v44, %s2825_s19  ;;  %v4320_v56 = vpop.permute.xlu1 %1207 }
 0x1e2   : > { %v5078_v55 = vrot.slane %v3975_v53, 5  ;;  %v651_v46 = vrot.slane %v643_v3, 6  ;;  %v637_v20 = vadd.f32 %v633_v45, %v602_v21  ;;  %v5080_v47 = vrot.slane %v5079_v24, 1  ;;  %v5084_v3 = vld [vmem:[#allocation41_spill] sm:$0xff]  ;;  %v5092_v24 = vld [vmem:[#allocation39_spill] sm:$0xff] }
 0x1e3   : > { %v805_v52 = vadd.f32 %v5081_v48, %v763_v35  ;;  %v867_v28 = vadd.f32 %v5082_v36, %v825_v27  ;;  %v1851_v53 = vrot.slane %v4291_v32, 1  ;;  %v4325_v42 = vmul.f32 %v3646_v41, %v5083_v40  ;;  %v5093_v48 = vld [vmem:[#allocation57_spill] sm:$0xff] }
 0x1e4   : > { %v617_v5 = vsel %vm612_vm8, %v5078_v55, %v616_v57  ;;  %v1832_v51 = vsel %vm472_vm4, %v5080_v47, %v1831_v43  ;;  %v1784_v33 = vsel %vm647_vm9, %v1781_v61, %v1783_v59  ;;  %v1866_v21 = vmul.f32 %v5084_v3, %v5083_v40  ;;  %v4345_v44 = vpop.permute.xlu0 %1275  ;;  %v5091_v55 = vld [vmem:[#allocation32_spill] sm:$0xff] }
 0x1e5   : > { %v621_v57 = vadd.f32 %v617_v5, %v586_v26  ;;  %1835 = vrot.lane.b32.xlu0 %v1832_v51, %s2826_s2  ;;  %v4334_v7 = vstv %s4267_s12  ;;  %v668_v17 = vsel %vm647_vm9, %v665_v16, %v667_v23  ;;  %v847_v31 = vadd.f32 %v5085_v38, %v805_v52  ;;  %1787 = vrot.lane.b32.xlu1 %v1784_v33, %s2825_s19  ;;  %v5089_v16 = vld [vmem:[#allocation37_spill] sm:$0xff]  ;;  %s153_s19 = scalar_lea.vmem [#allocation11], %s2480_s28 }
 0x1e6   : > { %v909_v14 = vadd.f32 %v5086_v50, %v867_v28  ;;  %v1850_v26 = vrot.slane %v1844_v2, 1  ;;  %v5087_v9 = vrot.slane %v4054_v10, 6  ;;  %v672_v60 = vadd.f32 %v668_v17, %v637_v20  ;;  %v5090_v2 = vld [vmem:[#allocation71_spill] sm:$0xff]  ;;  %v4358_v10 = vpop.permute.xlu1 %1227  ;;  %v5094_v28 = vld [vmem:[#allocation28_spill] sm:$0xff]  ;;  %v5095_v33 = vld [vmem:[#allocation65_spill] sm:$0xff] }
 0x1e7   : > { %v5088_v59 = vstv %s3547_s17  ;;  %v4352_v39 = vmul.f32 %v3698_v29, %v4334_v7  ;;  %v889_v35 = vadd.f32 %v5089_v16, %v847_v31  ;;  %v1873_v22 = vrot.slane %v4325_v42, 2  ;;  %v5099_v16 = vld [vmem:[#allocation70_spill] sm:$0xff]  ;;  %s4436_s17 = sld [smem:[#allocation7 + $0x28]] }
 0x1e8   : > { %v652_v61 = vsel %vm647_vm9, %v5087_v9, %v651_v46  ;;  %v1797_v34 = vmul.f32 %v3646_v41, %v5088_v59  ;;  %v951_v45 = vadd.f32 %v5090_v2, %v909_v14  ;;  %v1852_v23 = vsel %vm472_vm4, %v1850_v26, %v1851_v53  ;;  %v4379_v38 = vpop.permute.xlu0 %1295  ;;  %v5097_v14 = vld [vmem:[#allocation27_spill] sm:$0xff]  ;;  %v5098_v59 = vld [vmem:[#allocation36_spill] sm:$0xff] }
 0x1e9   : > { %v656_v27 = vadd.f32 %v652_v61, %v621_v57  ;;  %v700_v5 = vadd.f32 %v5091_v55, %v672_v60  ;;  %1855 = vrot.lane.b32.xlu0 %v1852_v23, %s2826_s2  ;;  %v1886_v46 = vmul.f32 %v5075_v13, %v4334_v7  ;;  %v1826_v20 = vmul.f32 %v3804_v25, %v5064_v4 }
 0x1ea   : > { %v931_v47 = vadd.f32 %v5092_v24, %v889_v35  ;;  %1802 = vrot.lane.b32.xlu1 %v1797_v34, %s2826_s2  ;;  %v1872_v51 = vrot.slane %v1866_v21, 2  ;;  %v1908_v52 = vmul.f32 %v5084_v3, %v5093_v48  ;;  %v4375_v36 = vstv %s4306_s13  ;;  %v4389_v26 = vpop.permute.xlu1 %1242 }
 0x1eb   : > { %v687_v57 = vadd.f32 %v5094_v28, %v656_v27  ;;  %v742_v17 = vadd.f32 %v5095_v33, %v700_v5  ;;  %v5096_v31 = vstv %s3658_s1  ;;  %v4386_v4 = vmul.f32 %v3646_v41, %v5093_v48 }
 0x1ec   : > { %v1810_v50 = vmul.f32 %v3698_v29, %v5096_v31  ;;  %v979_v21 = vadd.f32 %v5097_v14, %v951_v45  ;;  %v1874_v9 = vsel %vm507_vm5, %v1872_v51, %v1873_v22  ;;  %v1893_v61 = vrot.slane %v4352_v39, 2  ;;  %v5100_v45 = vld [vmem:[#allocation25_spill] sm:$0xff]  ;;  %v5102_v51 = vld [vmem:[#allocation72_spill] sm:$0xff] }
 0x1ed   : > { %v1846_v60 = vmul.f32 %v4035_v19, %v5073_v15  ;;  %v722_v34 = vadd.f32 %v5098_v59, %v687_v57  ;;  %v784_v35 = vadd.f32 %v5099_v16, %v742_v17  ;;  %1877 = vrot.lane.b32.xlu0 %v1874_v9, %s2826_s2  ;;  %v1833_v2 = vrot.slane %v1826_v20, 1  ;;  %v5101_v15 = vld [vmem:[#allocation38_spill] sm:$0xff]  ;;  %v4412_v57 = vpop.permute.xlu0 %1317  ;;  %v5104_v9 = vld [vmem:[#allocation40_spill] sm:$0xff] }
 0x1ee   : > { %v966_v23 = vadd.f32 %v5100_v45, %v931_v47  ;;  %1815 = vrot.lane.b32.xlu1 %v1810_v50, %s2826_s2  ;;  %v1892_v27 = vrot.slane %v1886_v46, 2  ;;  %v1928_v55 = vmul.f32 %v5075_v13, %v4375_v36  ;;  %v4406_v5 = vmul.f32 %v3698_v29, %v4375_v36  ;;  %v5103_v46 = vld [vmem:[#allocation74_spill] sm:$0xff]  ;;  %v4419_v17 = vpop.permute.xlu1 %1255 }
 0x1ef   : > { %v764_v24 = vadd.f32 %v5101_v15, %v722_v34  ;;  %v826_v28 = vadd.f32 %v5102_v51, %v784_v35  ;;  %v1915_v20 = vrot.slane %v4386_v4, 3  ;;  %v4416_v47 = vstv %s4354_s14  ;;  %v5105_v34 = vld [vmem:[#allocation75_spill] sm:$0xff]  ;;  %v5106_v45 = vld [vmem:[#allocation42_spill] sm:$0xff]  ;;  %v5107_v51 = vld [vmem:[#allocation76_spill] sm:$0xff]  ;;  %s5124_s14 = sld [smem:[#allocation81_spill]] }
 0x1f0   : > { %v1021_v33 = vadd.f32 %v5103_v46, %v979_v21  ;;  %v1894_v31 = vsel %vm507_vm5, %v1892_v27, %v1893_v61  ;;  %v1914_v50 = vrot.slane %v1908_v52, 3  ;;  %v1853_v14 = vrot.slane %v1846_v60, 1  ;;  %v5108_v27 = vld [vmem:[#allocation43_spill] sm:$0xff] }
 0x1f1   : > { %v806_v59 = vadd.f32 %v5104_v9, %v764_v24  ;;  %v868_v16 = vadd.f32 %v5105_v34, %v826_v28  ;;  %1897 = vrot.lane.b32.xlu0 %v1894_v31, %s2826_s2  ;;  %v1834_v35 = vsel %vm472_vm4, %v1831_v43, %v1833_v2  ;;  %v1868_v21 = vmul.f32 %v3804_v25, %v5083_v40  ;;  %v5109_v28 = vld [vmem:[#allocation77_spill] sm:$0xff]  ;;  %v4440_v31 = vpop.permute.xlu0 %1337 }
 0x1f2   : > { %v1001_v15 = vadd.f32 %v5106_v45, %v966_v23  ;;  %v1063_v46 = vadd.f32 %v5107_v51, %v1021_v33  ;;  %1837 = vrot.lane.b32.xlu1 %v1834_v35, %s2826_s2  ;;  %v1934_v52 = vrot.slane %v1928_v55, 3  ;;  %v1935_v60 = vrot.slane %v4406_v5, 3  ;;  %v5110_v2 = vld [vmem:[#allocation45_spill] sm:$0xff]  ;;  %v5111_v55 = vld [vmem:[#allocation78_spill] sm:$0xff]  ;;  %v4449_v9 = vpop.permute.xlu1 %1277 }
 0x1f3   : > { %v848_v24 = vadd.f32 %v5108_v27, %v806_v59  ;;  %v910_v54 = vadd.f32 %v5109_v28, %v868_v16  ;;  %v1916_v43 = vsel %vm542_vm6, %v1914_v50, %v1915_v20  ;;  %v1950_v40 = vmul.f32 %v5084_v3, %v4416_v47  ;;  %v5112_v16 = vld [vmem:[#allocation46_spill] sm:$0xff]  ;;  %v5113_v50 = vld [vmem:[#allocation79_spill] sm:$0xff]  ;;  %v5114_v51 = vld [vmem:[#allocation49_spill] sm:$0xff] }
 0x1f4   : > { %v1043_v23 = vadd.f32 %v5110_v2, %v1001_v15  ;;  %v1105_v33 = vadd.f32 %v5111_v55, %v1063_v46  ;;  %v1854_v59 = vsel %vm472_vm4, %v1851_v53, %v1853_v14  ;;  %v4456_v34 = vmul.f32 %v3646_v41, %v4416_v47  ;;  %v5115_v27 = vld [vmem:[#allocation50_spill] sm:$0xff] }
 0x1f5   : > { %v890_v35 = vadd.f32 %v5112_v16, %v848_v24  ;;  %v952_v45 = vadd.f32 %v5113_v50, %v910_v54  ;;  %1919 = vrot.lane.b32.xlu0 %v1916_v43, %s2826_s2  ;;  %v1875_v3 = vrot.slane %v1868_v21, 2  ;;  %v1888_v15 = vmul.f32 %v4035_v19, %v4334_v7  ;;  %v4472_v28 = vpop.permute.xlu0 %1359  ;;  %v5117_v55 = vld [vmem:[#allocation34_spill] sm:$0xff] }
 0x1f6   : > { %v1085_v46 = vadd.f32 %v5114_v51, %v1043_v23  ;;  %v1147_v32 = vadd.f32 %v4105_v6, %v1105_v33  ;;  %1857 = vrot.lane.b32.xlu1 %v1854_v59, %s2826_s2  ;;  %v4467_v53 = vstv %s4408_s16  ;;  %v1910_v14 = vmul.f32 %v3804_v25, %v5093_v48  ;;  %v5116_v6 = vld [vmem:[#allocation51_spill] sm:$0xff]  ;;  %v4481_v2 = vpop.permute.xlu1 %1297  ;;  %s4844_s16 = scalar_lea.hbm %s5124_s14, %s2590_s6 }
 0x1f7   : > { %v932_v24 = vadd.f32 %v5115_v27, %v890_v35  ;;  %v1936_v21 = vsel %vm542_vm6, %v1934_v52, %v1935_v60  ;;  %v1956_v7 = vrot.slane %v1950_v40, 4  ;;  %v1957_v48 = vrot.slane %v4456_v34, 4 }
 0x1f8   : > { %v1127_v54 = vadd.f32 %v5116_v6, %v1085_v46  ;;  %v1189_v43 = vadd.f32 %v4182_v0, %v1147_v32  ;;  %v4486_v23 = vmul.f32 %v3698_v29, %v4467_v53  ;;  %v980_v33 = vadd.f32 %v5117_v55, %v952_v45  ;;  %v5118_v45 = vld [vmem:[#allocation30_spill] sm:$0xff] }
 0x1f9   : > { %1939 = vrot.lane.b32.xlu0 %v1936_v21, %s2826_s2  ;;  %v1876_v52 = vsel %vm507_vm5, %v1873_v22, %v1875_v3  ;;  %v1895_v40 = vrot.slane %v1888_v15, 2  ;;  %v1970_v0 = vmul.f32 %v5075_v13, %v4467_v53  ;;  %v1917_v35 = vrot.slane %v1910_v14, 3  ;;  %v1380_v46 = vpop.permute.xlu0 %1379  ;;  %v4523_v14 = vld [vmem:[#allocation4] sm:$0xff] }
 0x1fa   : > { %v1169_v59 = vadd.f32 %v4148_v62, %v1127_v54  ;;  %v1231_v16 = vadd.f32 %v4251_v18, %v1189_v43  ;;  %1879 = vrot.lane.b32.xlu1 %v1876_v52, %s2826_s2  ;;  %v4499_v50 = vstv %s4436_s17  ;;  %v967_v51 = vadd.f32 %v5118_v45, %v932_v24  ;;  %v4512_v13 = vpop.permute.xlu1 %1319  ;;  %s2374_s17 = scalar_lea.sflag [#allocation10], %s2935_s18 }
 0x1fb   : > { %v4504_v42 = vmul.f32 %v3646_v41, %v4499_v50  ;;  %v1930_v22 = vmul.f32 %v4035_v19, %v4375_v36  ;;  %v1958_v3 = vsel %vm577_vm7, %v1956_v7, %v1957_v48  ;;  %v1977_v15 = vrot.slane %v4486_v23, 4 }
 0x1fc   : > { %v1211_v62 = vadd.f32 %v4213_v37, %v1169_v59  ;;  %v1259_v18 = vadd.f32 %v4311_v8, %v1231_v16  ;;  %v1022_v32 = vadd.f32 %v4107_v58, %v980_v33  ;;  %v1896_v36 = vsel %vm507_vm5, %v1893_v61, %v1895_v40  ;;  %v5119_v61 = vld [vmem:[#allocation52_spill] sm:$0xff] }
 0x1fd   : > { %1961 = vrot.lane.b32.xlu0 %v1958_v3, %s2826_s2  ;;  %v1976_v37 = vrot.slane %v1970_v0, 4  ;;  %v1992_v8 = vmul.f32 %v4523_v14, %v4499_v50  ;;  %v1918_v58 = vsel %vm542_vm6, %v1915_v20, %v1917_v35  ;;  %v1952_v39 = vmul.f32 %v3804_v25, %v4416_v47  ;;  %v1402_v6 = vpop.permute.xlu0 %1401  ;;  %v5120_v47 = vld [vmem:[#allocation55_spill] sm:$0xff] }
 0x1fe   : > { %v1246_v27 = vadd.f32 %v4279_v49, %v1211_v62  ;;  %v1301_v24 = vadd.f32 %v4379_v38, %v1259_v18  ;;  %1899 = vrot.lane.b32.xlu1 %v1896_v36, %s2826_s2  ;;  %v1002_v21 = vadd.f32 %v5119_v61, %v967_v51  ;;  %v1064_v7 = vadd.f32 %v4153_v63, %v1022_v32  ;;  %v4545_v4 = vpop.permute.xlu1 %1339  ;;  %v4559_v0 = vld [vmem:[#allocation5] sm:$0xff] }
 0x1ff   : > { %v1999_v54 = vrot.slane %v4504_v42, 5  ;;  %v4539_v43 = vstv %s4477_s24  ;;  %v1978_v20 = vsel %vm577_vm7, %v1976_v37, %v1977_v15  ;;  %v1937_v52 = vrot.slane %v1930_v22, 3  ;;  %v5121_v35 = vld [vmem:[#allocation59_spill] sm:$0xff]  ;;  %s5125_s24 = smov %s5124_s14 }
 0x200   : > { %v1281_v49 = vadd.f32 %v4345_v44, %v1246_v27  ;;  %v1343_v38 = vadd.f32 %v4440_v31, %v1301_v24  ;;  %v4552_v63 = vmul.f32 %v3698_v29, %v4539_v43  ;;  %v1044_v55 = vadd.f32 %v5120_v47, %v1002_v21  ;;  %v5122_v36 = vld [vmem:[#allocation63_spill] sm:$0xff] }
 0x201   : > { %v1106_v33 = vadd.f32 %v4185_v11, %v1064_v7  ;;  %1981 = vrot.lane.b32.xlu0 %v1978_v20, %s2826_s2  ;;  %v1998_v44 = vrot.slane %v1992_v8, 5  ;;  %v2012_v59 = vmul.f32 %v4559_v0, %v4539_v43  ;;  %v1959_v16 = vrot.slane %v1952_v39, 4  ;;  %v1422_v11 = vpop.permute.xlu0 %1421 }
 0x202   : > { %v1323_v31 = vadd.f32 %v4412_v57, %v1281_v49  ;;  %v1385_v40 = vadd.f32 %v1380_v46, %v1343_v38  ;;  %1921 = vrot.lane.b32.xlu1 %v1918_v58, %s2826_s2  ;;  %v1086_v45 = vadd.f32 %v5121_v35, %v1044_v55  ;;  %v4569_v62 = vstv %s4508_s25  ;;  %v1362_v18 = vpop.permute.xlu1 %1361 }
 0x203   : > { %v1148_v51 = vadd.f32 %v4222_v30, %v1106_v33  ;;  %v2000_v22 = vsel %vm612_vm8, %v1998_v44, %v1999_v54  ;;  %v2019_v3 = vrot.slane %v4552_v63, 5  ;;  %v4575_v32 = vmul.f32 %v3646_v41, %v4569_v62  ;;  %v4663_v63 = vld [vmem:[#allocation5 + $0x8] sm:$0xff] }
 0x204   : > { %v1365_v57 = vadd.f32 %v4472_v28, %v1323_v31  ;;  %v1427_v46 = vadd.f32 %v1422_v11, %v1385_v40  ;;  %v1128_v30 = vadd.f32 %v5122_v36, %v1086_v45  ;;  %v1938_v8 = vsel %vm542_vm6, %v1935_v60, %v1937_v52 }
 0x205   : > { %v1190_v37 = vadd.f32 %v4287_v1, %v1148_v51  ;;  %2003 = vrot.lane.b32.xlu0 %v2000_v22, %s2826_s2  ;;  %v1972_v28 = vmul.f32 %v4035_v19, %v4467_v53  ;;  %v2018_v24 = vrot.slane %v2012_v59, 5  ;;  %v2034_v41 = vmul.f32 %v4523_v14, %v4569_v62  ;;  %v1444_v39 = vpop.permute.xlu0 %1443 }
 0x206   : > { %v1407_v27 = vadd.f32 %v1402_v6, %v1365_v57  ;;  %1941 = vrot.lane.b32.xlu1 %v1938_v8, %s2826_s2  ;;  %v1170_v58 = vadd.f32 %v4258_v12, %v1128_v30  ;;  %v1960_v5 = vsel %vm577_vm7, %v1957_v48, %v1959_v16  ;;  %v2053_v60 = vstv %s4541_s26  ;;  %v1382_v21 = vpop.permute.xlu1 %1381  ;;  %s2731_s26 = sshll.u32 %s2828_s15, 4  ;;  %s2732_s26 = int_to_ptr.vmem [resolvable:$false] %s2731_s26 }
 0x207   : > { %v1232_v1 = vadd.f32 %v4358_v10, %v1190_v37  ;;  %v2020_v53 = vsel %vm612_vm8, %v2018_v24, %v2019_v3  ;;  %v2041_v7 = vrot.slane %v4575_v32, 6  ;;  %v4599_v6 = vmul.f32 %v3698_v29, %v2053_v60  ;;  %v4648_v37 = vld [vmem:[#allocation4 + $0x8] sm:$0xff] }
 0x208   : > { %v1449_v61 = vadd.f32 %v1444_v39, %v1407_v27  ;;  %v1212_v12 = vadd.f32 %v4320_v56, %v1170_v58  ;;  %v1979_v34 = vrot.slane %v1972_v28, 4  ;;  %v1994_v48 = vmul.f32 %v3804_v25, %v4499_v50 }
 0x209   : > { %v1260_v10 = vadd.f32 %v4419_v17, %v1232_v1  ;;  %2023 = vrot.lane.b32.xlu0 %v2020_v53, %s2826_s2  ;;  %v2040_v49 = vrot.slane %v2034_v41, 6  ;;  %v2054_v38 = vmul.f32 %v4559_v0, %v2053_v60  ;;  %v1464_v47 = vpop.permute.xlu0 %1463  ;;  %v2061_v50 = vrot.slane %v4599_v6, 6 }
 0x20a   : > { %1963 = vrot.lane.b32.xlu1 %v1960_v5, %s2826_s2  ;;  %v1247_v29 = vadd.f32 %v4389_v26, %v1212_v12  ;;  %v1469_v56 = vadd.f32 %v1464_v47, %v1427_v46  ;;  %v1404_v17 = vpop.permute.xlu1 %1403  ;;  %v2014_v33 = vmul.f32 %v4035_v19, %v4539_v43  ;;  %v1980_v44 = vsel %vm577_vm7, %v1977_v15, %v1979_v34 }
 0x20b   : > { %v1302_v20 = vadd.f32 %v4481_v2, %v1260_v10  ;;  %v2042_v55 = vsel %vm647_vm9, %v2040_v49, %v2041_v7  ;;  %v2001_v52 = vrot.slane %v1994_v48, 5  ;;  %v2060_v31 = vrot.slane %v2054_v38, 6 }
 0x20c   : > { %v1282_v26 = vadd.f32 %v4449_v9, %v1247_v29  ;;  %v2075_v23 = vstv %s4601_s0  ;;  %v2021_v15 = vrot.slane %v2014_v33, 5  ;;  %v2036_v51 = vmul.f32 %v3804_v25, %v4569_v62  ;;  %s2733_s0 = scalar_lea.vmem %s2732_s26, 512 }
 0x20d   : > { %v1344_v2 = vadd.f32 %v4545_v4, %v1302_v20  ;;  %2045 = vrot.lane.b32.xlu0 %v2042_v55, %s2826_s2  ;;  %v1486_v59 = vpop.permute.xlu0 %1485  ;;  %v2062_v4 = vsel %vm647_vm9, %v2060_v31, %v2061_v50  ;;  %v2076_v57 = vmul.f32 %v4523_v14, %v2075_v23  ;;  %v2103_v46 = vstv %s4612_s29 }
 0x20e   : > { %1983 = vrot.lane.b32.xlu1 %v1980_v44, %s2826_s2  ;;  %v1324_v40 = vadd.f32 %v4512_v13, %v1282_v26  ;;  %v1491_v9 = vadd.f32 %v1486_v59, %v1449_v61  ;;  %v1424_v16 = vpop.permute.xlu1 %1423  ;;  %v2002_v13 = vsel %vm612_vm8, %v1999_v54, %v2001_v52  ;;  %v2088_v30 = vstv %s4620_s8  ;;  %v4697_v52 = vld [vmem:[#allocation4 + $0x10] sm:$0x3f] }
 0x20f   : > { %v1386_v43 = vadd.f32 %v1382_v21, %v1344_v2  ;;  %v4651_v42 = vmul.f32 %v4648_v37, %v2103_v46  ;;  %v2022_v25 = vsel %vm612_vm8, %v2019_v3, %v2021_v15  ;;  %v2043_v62 = vrot.slane %v2036_v51, 6 }
 0x210   : > { %v1366_v35 = vadd.f32 %v1362_v18, %v1324_v40  ;;  %v2056_v8 = vmul.f32 %v4035_v19, %v2053_v60  ;;  %v2104_v28 = vmul.f32 %v4523_v14, %v2103_v46  ;;  %v2089_v24 = vmul.f32 %v4559_v0, %v2088_v30 }
 0x211   : > { %v1428_v45 = vadd.f32 %v1424_v16, %v1386_v43  ;;  %2065 = vrot.lane.b32.xlu0 %v2062_v4, %s2826_s2  ;;  %v1506_v22 = vpop.permute.xlu0 %1505  ;;  %v2123_v41 = vstv %s4630_s3  ;;  %v2111_v39 = vrot.slane %v4651_v42, 1  ;;  %v2044_v60 = vsel %vm647_vm9, %v2041_v7, %v2043_v62 }
 0x212   : > { %2005 = vrot.lane.b32.xlu1 %v2002_v13, %s2826_s2  ;;  %v1408_v11 = vadd.f32 %v1404_v17, %v1366_v35  ;;  %v1511_v18 = vadd.f32 %v1506_v22, %v1469_v56  ;;  %v1446_v36 = vpop.permute.xlu1 %1445  ;;  %v4666_v3 = vmul.f32 %v4663_v63, %v2123_v41  ;;  %v2063_v61 = vrot.slane %v2056_v8, 6 }
 0x213   : > { %v2110_v21 = vrot.slane %v2104_v28, 1  ;;  %v2124_v53 = vmul.f32 %v4559_v0, %v2123_v41  ;;  %v2145_v10 = vstv %s4645_s4  ;;  %v2077_v17 = vmul.f32 %v4648_v37, %v2075_v23 }
 0x214   : > { %v1450_v54 = vadd.f32 %v1446_v36, %v1408_v11  ;;  %v2131_v38 = vrot.slane %v4666_v3, 1  ;;  %v4680_v32 = vmul.f32 %v4648_v37, %v2145_v10  ;;  %v2064_v29 = vsel %vm647_vm9, %v2061_v50, %v2063_v61 }
 0x215   : > { %2080 = vrot.lane.b32.xlu0 %v2076_v57, %s2827_s5  ;;  %v1521_v27 = vpop.permute.xlu0 %1520  ;;  %v2112_v49 = vsel %vm472_vm4, %v2110_v21, %v2111_v39  ;;  %v2130_v20 = vrot.slane %v2124_v53, 1  ;;  %v2146_v47 = vmul.f32 %v4523_v14, %v2145_v10  ;;  %v2165_v55 = vstv %s2573_s9 }
 0x216   : > { %2025 = vrot.lane.b32.xlu1 %v2022_v25, %s2826_s2  ;;  %v1526_v58 = vadd.f32 %v1521_v27, %v1491_v9  ;;  %v1466_v1 = vpop.permute.xlu1 %1465  ;;  %v2153_v6 = vrot.slane %v4680_v32, 2  ;;  %v4694_v50 = vmul.f32 %v4663_v63, %v2165_v55  ;;  %v2106_v31 = vmul.f32 %v4697_v52, %v2103_v46 }
 0x217   : > { %v1470_v5 = vadd.f32 %v1466_v1, %v1428_v45  ;;  %v2132_v2 = vsel %vm472_vm4, %v2130_v20, %v2131_v38  ;;  %v2152_v40 = vrot.slane %v2146_v47, 2  ;;  %v2166_v43 = vmul.f32 %v4559_v0, %v2165_v55 }
 0x218   : > { %v2090_v9 = vmul.f32 %v4663_v63, %v2088_v30  ;;  %v2187_v16 = vstv %s2574_s11  ;;  %v2173_v35 = vrot.slane %v4694_v50, 2  ;;  %v2113_v51 = vrot.slane %v2106_v31, 1 }
 0x219   : > { %2093 = vrot.lane.b32.xlu0 %v2089_v24, %s2827_s5  ;;  %v1534_v12 = vpop.permute.xlu0 %1533  ;;  %v2154_v15 = vsel %vm507_vm5, %v2152_v40, %v2153_v6  ;;  %v4708_v45 = vmul.f32 %v4648_v37, %v2187_v16  ;;  %v2126_v11 = vmul.f32 %v4035_v19, %v2123_v41  ;;  %v2172_v22 = vrot.slane %v2166_v43, 2 }
 0x21a   : > { %2047 = vrot.lane.b32.xlu1 %v2044_v60, %s2826_s2  ;;  %v1539_v34 = vadd.f32 %v1534_v12, %v1511_v18  ;;  %v1488_v48 = vpop.permute.xlu1 %1487  ;;  %v2188_v57 = vmul.f32 %v4523_v14, %v2187_v16  ;;  %v2207_v18 = vstv %s2575_s10  ;;  %v2114_v28 = vsel %vm472_vm4, %v2111_v39, %v2113_v51 }
 0x21b   : > { %v1492_v7 = vadd.f32 %v1488_v48, %v1450_v54  ;;  %v2174_v54 = vsel %vm507_vm5, %v2172_v22, %v2173_v35  ;;  %v2195_v25 = vrot.slane %v4708_v45, 3  ;;  %v4721_v62 = vmul.f32 %v4663_v63, %v2207_v18 }
 0x21c   : > { %v2133_v27 = vrot.slane %v2126_v11, 1  ;;  %v2148_v24 = vmul.f32 %v4697_v52, %v2145_v10  ;;  %v2194_v41 = vrot.slane %v2188_v57, 3  ;;  %v2271_v31 = vstv %s4730_s7 }
 0x21d   : > { %2115 = vrot.lane.b32.xlu0 %v2112_v49, %s2827_s5  ;;  %v1556_v56 = vpop.permute.xlu0 %1555  ;;  %v2215_v39 = vrot.slane %v4721_v62, 3  ;;  %v2272_v51 = vmul.f32 %v4523_v14, %v2271_v31  ;;  %v2291_v22 = vstv %s4747_s20 }
 0x21e   : > { %2067 = vrot.lane.b32.xlu1 %v2064_v29, %s2826_s2  ;;  %v1561_v33 = vadd.f32 %v1556_v56, %v1526_v58  ;;  %v1508_v26 = vpop.permute.xlu1 %1507  ;;  %v2208_v58 = vmul.f32 %v4559_v0, %v2207_v18  ;;  %v2196_v42 = vsel %vm542_vm6, %v2194_v41, %v2195_v25  ;;  %v2134_v12 = vsel %vm472_vm4, %v2131_v38, %v2133_v27  ;;  %s2387_s2 = sshll.u32 %s153_s19, 4  ;;  %s4846_s2 = int_to_ptr.vmem [resolvable:$true] %s2387_s2 }
 0x21f   : > { %v1512_v44 = vadd.f32 %v1508_v26, %v1470_v5  ;;  %v2229_v5 = vstv %s2576_s27  ;;  %v2155_v10 = vrot.slane %v2148_v24, 2  ;;  %v2249_v29 = vstv %s4714_s30  ;;  %s2727_s25 = scalar_lea.vmem %s4846_s2, 256  ;;  %p2734_p0 = scmp.lt.s32.totalorder %s4846_s2, %s2732_s26 }
 0x220   : > { %v4737_v21 = vmul.f32 %v4648_v37, %v2229_v5  ;;  %v2214_v48 = vrot.slane %v2208_v58, 3  ;;  %v2230_v49 = vmul.f32 %v4523_v14, %v2229_v5  ;;  %v2292_v27 = vmul.f32 %v4559_v0, %v2291_v22  ;;  %p2728_p8 = scmp.ne.s32.totalorder %s4846_s2, %s2727_s25  ;;  %p2735_p1 = scmp.lt.s32.totalorder %s2733_s0, %s2727_s25 }
 0x221   : > { %2135 = vrot.lane.b32.xlu0 %v2132_v2, %s2827_s5  ;;  %v1576_v59 = vpop.permute.xlu0 %1575  ;;  %v2250_v2 = vmul.f32 %v4559_v0, %v2249_v29  ;;  %v2313_v41 = vstv %s4764_s21 }
 0x222   : > { %2082 = vrot.lane.b32.xlu1 %v2077_v17, %s2827_s5  ;;  %v1581_v4 = vadd.f32 %v1576_v59, %v1539_v34  ;;  %v1523_v23 = vpop.permute.xlu1 %1522  ;;  %v2168_v34 = vmul.f32 %v4035_v19, %v2165_v55  ;;  %v2216_v3 = vsel %vm542_vm6, %v2214_v48, %v2215_v39  ;;  %v2237_v38 = vrot.slane %v4737_v21, 4  ;;  %p2729_p11 = pnand %p2728_p8, %p2900_p9  ;;  %p2736_p2 = por %p2735_p1, %p2734_p0 }
 0x223   : > { %v1527_v13 = vadd.f32 %v1523_v23, %v1492_v7  ;;  %v4754_v19 = vmul.f32 %v4663_v63, %v2249_v29  ;;  %v2156_v17 = vsel %vm507_vm5, %v2153_v6, %v2155_v10  ;;  %v2236_v26 = vrot.slane %v2230_v49, 4  ;;  %v4777_v23 = vld [vmem:[#allocation5 + $0x10] sm:$0x3f] }
 0x224   : > { %v2175_v55 = vrot.slane %v2168_v34, 2  ;;  %v4771_v59 = vmul.f32 %v4648_v37, %v2271_v31  ;;  %v2315_v45 = vmul.f32 %v4648_v37, %v2313_v41  ;;  %v2314_v10 = vmul.f32 %v4523_v14, %v2313_v41  ;;  %p2730_p12 = pneg %p2729_p11 }
 0x225   : > { %2157 = vrot.lane.b32.xlu0 %v2154_v15, %s2827_s5  ;;  %v1598_v46 = vpop.permute.xlu0 %1597  ;;  %v2238_v32 = vsel %vm577_vm7, %v2236_v26, %v2237_v38  ;;  %v2257_v6 = vrot.slane %v4754_v19, 4  ;;  %v2210_v15 = vmul.f32 %v4777_v23, %v2207_v18  ;;  %v2333_v48 = vstv %s2581_s22 }
 0x226   : > { %2095 = vrot.lane.b32.xlu1 %v2090_v9, %s2827_s5  ;;  %v1603_v36 = vadd.f32 %v1598_v46, %v1561_v33  ;;  %v1536_v30 = vpop.permute.xlu1 %1535  ;;  %v2190_v33 = vmul.f32 %v4697_v52, %v2187_v16  ;;  %v2176_v16 = vsel %vm507_vm5, %v2173_v35, %v2175_v55  ;;  %v2279_v35 = vrot.slane %v4771_v59, 5  ;;  %p2737_p3 = pnand %p2736_p2, %p2730_p12 }
 0x227   : > { %v1540_v8 = vadd.f32 %v1536_v30, %v1512_v44  ;;  %v2320_v14 = vrot.slane %v2314_v10, 6  ;;  %v2316_v19 = vmul.f32 %v4697_v52, %v2313_v41 }
 0x229   : > { %2177 = vrot.lane.b32.xlu0 %v2174_v54, %s2827_s5  ;;  %v1618_v1 = vpop.permute.xlu0 %1617  ;;  %v2217_v54 = vrot.slane %v2210_v15, 3 }
 0x22a   : > { %2117 = vrot.lane.b32.xlu1 %v2114_v28, %s2827_s5  ;;  %v1623_v60 = vadd.f32 %v1618_v1, %v1581_v4  ;;  %v1558_v61 = vpop.permute.xlu1 %1557  ;;  %v2197_v4 = vrot.slane %v2190_v33, 3  ;;  %v2278_v28 = vrot.slane %v2272_v51, 5 }
 0x22b   : > { %v1562_v53 = vadd.f32 %v1558_v61, %v1527_v13  ;;  %v2256_v13 = vrot.slane %v2250_v2, 4 }
 0x22c   : > { %v2198_v30 = vsel %vm542_vm6, %v2195_v25, %v2197_v4  ;;  %v2218_v25 = vsel %vm542_vm6, %v2215_v39, %v2217_v54 }
 0x22d   : > { %2199 = vrot.lane.b32.xlu0 %v2196_v42, %s2827_s5  ;;  %v1640_v7 = vpop.permute.xlu0 %1639  ;;  %v2258_v50 = vsel %vm577_vm7, %v2256_v13, %v2257_v6 }
 0x22e   : > { %2137 = vrot.lane.b32.xlu1 %v2134_v12, %s2827_s5  ;;  %v1645_v20 = vadd.f32 %v1640_v7, %v1603_v36  ;;  %v1578_v47 = vpop.permute.xlu1 %1577  ;;  %v4788_v36 = vmul.f32 %v4663_v63, %v2291_v22  ;;  %v2298_v12 = vrot.slane %v2292_v27, 5 }
 0x22f   : > { %v1582_v56 = vadd.f32 %v1578_v47, %v1540_v8  ;;  %v2232_v8 = vmul.f32 %v4697_v52, %v2229_v5  ;;  %v2335_v47 = vmul.f32 %v4663_v63, %v2333_v48 }
 0x230   : > { %v2299_v61 = vrot.slane %v4788_v36, 5 }
 0x231   : > { %2219 = vrot.lane.b32.xlu0 %v2216_v3, %s2827_s5  ;;  %v1660_v44 = vpop.permute.xlu0 %1659  ;;  %v2239_v5 = vrot.slane %v2232_v8, 4  ;;  %v2274_v3 = vmul.f32 %v4697_v52, %v2271_v31  ;;  %v2341_v26 = vrot.slane %v2335_v47, 6 }
 0x232   : > { %2159 = vrot.lane.b32.xlu1 %v2156_v17, %s2827_s5  ;;  %v1665_v40 = vadd.f32 %v1660_v44, %v1623_v60  ;;  %v1600_v43 = vpop.permute.xlu1 %1599  ;;  %v2280_v60 = vsel %vm612_vm8, %v2278_v28, %v2279_v35  ;;  %v2300_v37 = vsel %vm612_vm8, %v2298_v12, %v2299_v61  ;;  %v2294_v44 = vmul.f32 %v4777_v23, %v2291_v22 }
 0x233   : > { %v1604_v9 = vadd.f32 %v1600_v43, %v1562_v53  ;;  %v2252_v53 = vmul.f32 %v4777_v23, %v2249_v29  ;;  %v2240_v39 = vsel %vm577_vm7, %v2237_v38, %v2239_v5  ;;  %v2281_v38 = vrot.slane %v2274_v3, 5 }
 0x234   : > { %v2336_v22 = vmul.f32 %v4777_v23, %v2333_v48 }
 0x235   : > { %2241 = vrot.lane.b32.xlu0 %v2238_v32, %s2827_s5  ;;  %v1682_v11 = vpop.permute.xlu0 %1681  ;;  %v2259_v29 = vrot.slane %v2252_v53, 4 }
 0x236   : > { %2179 = vrot.lane.b32.xlu1 %v2176_v16, %s2827_s5  ;;  %v1687_v57 = vadd.f32 %v1682_v11, %v1645_v20  ;;  %v1620_v46 = vpop.permute.xlu1 %1619  ;;  %v2321_v20 = vrot.slane %v2315_v45, 6  ;;  %v2301_v16 = vrot.slane %v2294_v44, 5  ;;  %v2323_v11 = vrot.slane %v2316_v19, 6 }
 0x237   : > { %v1624_v18 = vadd.f32 %v1620_v46, %v1582_v56  ;;  %v2334_v56 = vmul.f32 %v4559_v0, %v2333_v48  ;;  %v2260_v21 = vsel %vm577_vm7, %v2257_v6, %v2259_v29  ;;  %v2343_v52 = vrot.slane %v2336_v22, 6 }
 0x238   : > { %v2322_v63 = vsel %vm647_vm9, %v2320_v14, %v2321_v20  ;;  %v2302_v51 = vsel %vm612_vm8, %v2299_v61, %v2301_v16  ;;  %v2324_v36 = vsel %vm647_vm9, %v2321_v20, %v2323_v11 }
 0x239   : > { %2261 = vrot.lane.b32.xlu0 %v2258_v50, %s2827_s5  ;;  %v1702_v24 = vpop.permute.xlu0 %1701  ;;  %v2340_v31 = vrot.slane %v2334_v56, 6  ;;  %v2344_v28 = vsel %vm647_vm9, %v2341_v26, %v2343_v52 }
 0x23a   : > { %2201 = vrot.lane.b32.xlu1 %v2198_v30, %s2827_s5  ;;  %v1707_v58 = vadd.f32 %v1702_v24, %v1665_v40  ;;  %v1642_v1 = vpop.permute.xlu1 %1641 }
 0x23b   : > { %v1646_v42 = vadd.f32 %v1642_v1, %v1604_v9  ;;  %v2342_v32 = vsel %vm647_vm9, %v2340_v31, %v2341_v26  ;;  %v2282_v9 = vsel %vm612_vm8, %v2279_v35, %v2281_v38 }
 0x23d   : > { %2283 = vrot.lane.b32.xlu0 %v2280_v60, %s2827_s5  ;;  %v1724_v34 = vpop.permute.xlu0 %1723 }
 0x23e   : > { %2221 = vrot.lane.b32.xlu1 %v2218_v25, %s2827_s5  ;;  %v1729_v49 = vadd.f32 %v1724_v34, %v1687_v57  ;;  %v1662_v7 = vpop.permute.xlu1 %1661 }
 0x23f   : > { %v1666_v62 = vadd.f32 %v1662_v7, %v1624_v18 }
 0x241   : > { %2303 = vrot.lane.b32.xlu0 %v2300_v37, %s2827_s5  ;;  %v1744_v17 = vpop.permute.xlu0 %1743 }
 0x242   : > { %2243 = vrot.lane.b32.xlu1 %v2240_v39, %s2827_s5  ;;  %v1749_v55 = vadd.f32 %v1744_v17, %v1707_v58  ;;  %v1684_v33 = vpop.permute.xlu1 %1683 }
 0x243   : > { %v1688_v2 = vadd.f32 %v1684_v33, %v1646_v42 }
 0x245   : > { %2325 = vrot.lane.b32.xlu0 %v2322_v63, %s2827_s5  ;;  %v1766_v0 = vpop.permute.xlu0 %1765 }
 0x246   : > { %2263 = vrot.lane.b32.xlu1 %v2260_v21, %s2827_s5  ;;  %v1771_v40 = vadd.f32 %v1766_v0, %v1729_v49  ;;  %v1704_v43 = vpop.permute.xlu1 %1703 }
 0x247   : > { %v1708_v59 = vadd.f32 %v1704_v43, %v1666_v62 }
 0x249   : > { %2345 = vrot.lane.b32.xlu0 %v2342_v32, %s2827_s5 }
 0x24a   : > { %2285 = vrot.lane.b32.xlu1 %v2282_v9, %s2827_s5  ;;  %v1786_v6 = vpop.permute.xlu0 %1785 }
 0x24b   : > { %v1791_v4 = vadd.f32 %v1786_v6, %v1749_v55  ;;  %v1726_v15 = vpop.permute.xlu1 %1725 }
 0x24c   : > { %v1730_v13 = vadd.f32 %v1726_v15, %v1688_v2 }
 0x24e   : > { %2305 = vrot.lane.b32.xlu1 %v2302_v51, %s2827_s5  ;;  %v1801_v57 = vpop.permute.xlu0 %1800 }
 0x24f   : > { %v1806_v46 = vadd.f32 %v1801_v57, %v1771_v40  ;;  %v1746_v50 = vpop.permute.xlu1 %1745 }
 0x250   : > { %v1750_v35 = vadd.f32 %v1746_v50, %v1708_v59 }
 0x252   : > { %2327 = vrot.lane.b32.xlu1 %v2324_v36, %s2827_s5  ;;  %v1814_v18 = vpop.permute.xlu0 %1813 }
 0x253   : > { %v1819_v30 = vadd.f32 %v1814_v18, %v1791_v4  ;;  %v1768_v54 = vpop.permute.xlu1 %1767 }
 0x254   : > { %v1772_v8 = vadd.f32 %v1768_v54, %v1730_v13 }
 0x256   : > { %2347 = vrot.lane.b32.xlu1 %v2344_v28, %s2827_s5 }
 0x257   : > { %v1836_v23 = vpop.permute.xlu0 %1835  ;;  %v1788_v24 = vpop.permute.xlu1 %1787 }
 0x258   : > { %v1841_v27 = vadd.f32 %v1836_v23, %v1806_v46  ;;  %v1792_v41 = vadd.f32 %v1788_v24, %v1750_v35 }
 0x25b   : > { %v1856_v58 = vpop.permute.xlu0 %1855 }
 0x25c   : > { %v1861_v1 = vadd.f32 %v1856_v58, %v1819_v30  ;;  %v1803_v60 = vpop.permute.xlu1 %1802 }
 0x25d   : > { %v1807_v61 = vadd.f32 %v1803_v60, %v1772_v8 }
 0x25f   : > { %v1878_v45 = vpop.permute.xlu0 %1877 }
 0x260   : > { %v1883_v42 = vadd.f32 %v1878_v45, %v1841_v27  ;;  %v1816_v25 = vpop.permute.xlu1 %1815 }
 0x261   : > { %v1820_v5 = vadd.f32 %v1816_v25, %v1792_v41 }
 0x263   : > { %v1898_v53 = vpop.permute.xlu0 %1897 }
 0x264   : > { %v1903_v12 = vadd.f32 %v1898_v53, %v1861_v1  ;;  %v1838_v10 = vpop.permute.xlu1 %1837 }
 0x265   : > { %v1842_v34 = vadd.f32 %v1838_v10, %v1807_v61 }
 0x267   : > { %v1920_v48 = vpop.permute.xlu0 %1919 }
 0x268   : > { %v1925_v49 = vadd.f32 %v1920_v48, %v1883_v42  ;;  %v1858_v7 = vpop.permute.xlu1 %1857 }
 0x269   : > { %v1862_v37 = vadd.f32 %v1858_v7, %v1820_v5 }
 0x26b   : > { %v1940_v20 = vpop.permute.xlu0 %1939 }
 0x26c   : > { %v1880_v47 = vpop.permute.xlu1 %1879  ;;  %v1945_v46 = vadd.f32 %v1940_v20, %v1903_v12 }
 0x26d   : > { %v1884_v62 = vadd.f32 %v1880_v47, %v1842_v34 }
 0x26f   : > { %v1962_v39 = vpop.permute.xlu0 %1961 }
 0x270   : > { %v1900_v29 = vpop.permute.xlu1 %1899  ;;  %v1967_v35 = vadd.f32 %v1962_v39, %v1925_v49 }
 0x271   : > { %v1904_v3 = vadd.f32 %v1900_v29, %v1862_v37 }
 0x273   : > { %v1982_v14 = vpop.permute.xlu0 %1981 }
 0x274   : > { %v1922_v56 = vpop.permute.xlu1 %1921  ;;  %v1987_v36 = vadd.f32 %v1982_v14, %v1945_v46 }
 0x275   : > { %v1926_v17 = vadd.f32 %v1922_v56, %v1884_v62 }
 0x277   : > { %v2004_v55 = vpop.permute.xlu0 %2003 }
 0x278   : > { %v1942_v33 = vpop.permute.xlu1 %1941  ;;  %v2009_v18 = vadd.f32 %v2004_v55, %v1967_v35 }
 0x279   : > { %v1946_v25 = vadd.f32 %v1942_v33, %v1904_v3 }
 0x27b   : > { %v2024_v63 = vpop.permute.xlu0 %2023 }
 0x27c   : > { %v1964_v26 = vpop.permute.xlu1 %1963  ;;  %v2029_v30 = vadd.f32 %v2024_v63, %v1987_v36 }
 0x27d   : > { %v1968_v12 = vadd.f32 %v1964_v26, %v1926_v17 }
 0x27f   : > { %v2046_v2 = vpop.permute.xlu0 %2045 }
 0x280   : > { %v1984_v21 = vpop.permute.xlu1 %1983  ;;  %v2051_v8 = vadd.f32 %v2046_v2, %v2009_v18  ;;  %v2355_v2 = vstv %s4836_s23 }
 0x281   : > { %v1988_v10 = vadd.f32 %v1984_v21, %v1946_v25 }
 0x283   : > { %v2066_v38 = vpop.permute.xlu0 %2065 }
 0x284   : > { %v2006_v44 = vpop.permute.xlu1 %2005  ;;  %v2071_v28 = vadd.f32 %v2066_v38, %v2029_v30 }
 0x285   : > { %v2010_v37 = vadd.f32 %v2006_v44, %v1968_v12 }
 0x287   : > { %v2081_v31 = vpop.permute.xlu0 %2080 }
 0x288   : > { %v2026_v0 = vpop.permute.xlu1 %2025  ;;  %v2086_v27 = vadd.f32 %v2081_v31, %v2051_v8 }
 0x289   : > { %v2030_v20 = vadd.f32 %v2026_v0, %v1988_v10 }
 0x28b   : > { %v2094_v40 = vpop.permute.xlu0 %2093 }
 0x28c   : > { %v2048_v43 = vpop.permute.xlu1 %2047  ;;  %v2099_v24 = vadd.f32 %v2094_v40, %v2071_v28 }
 0x28d   : > { %v2052_v39 = vadd.f32 %v2048_v43, %v2010_v37 }
 0x28f   : > { %v2116_v32 = vpop.permute.xlu0 %2115 }
 0x290   : > { %v2068_v59 = vpop.permute.xlu1 %2067  ;;  %v2121_v58 = vadd.f32 %v2116_v32, %v2086_v27 }
 0x291   : > { %v2072_v29 = vadd.f32 %v2068_v59, %v2030_v20 }
 0x293   : > { %v2136_v9 = vpop.permute.xlu0 %2135 }
 0x294   : > { %v2083_v16 = vpop.permute.xlu1 %2082  ;;  %v2141_v1 = vadd.f32 %v2136_v9, %v2099_v24 }
 0x295   : > { %v2087_v33 = vadd.f32 %v2083_v16, %v2052_v39 }
 0x297   : > { %v2158_v19 = vpop.permute.xlu0 %2157 }
 0x298   : > { %v2096_v6 = vpop.permute.xlu1 %2095  ;;  %v2163_v61 = vadd.f32 %v2158_v19, %v2121_v58 }
 0x299   : > { %v2100_v63 = vadd.f32 %v2096_v6, %v2072_v29 }
 0x29b   : > { %v2178_v4 = vpop.permute.xlu0 %2177 }
 0x29c   : > { %v2118_v15 = vpop.permute.xlu1 %2117  ;;  %v2183_v45 = vadd.f32 %v2178_v4, %v2141_v1 }
 0x29d   : > { %v2122_v26 = vadd.f32 %v2118_v15, %v2087_v33 }
 0x29f   : > { %v2200_v13 = vpop.permute.xlu0 %2199 }
 0x2a0   : > { %v2138_v51 = vpop.permute.xlu1 %2137  ;;  %v2205_v5 = vadd.f32 %v2200_v13, %v2163_v61 }
 0x2a1   : > { %v2142_v21 = vadd.f32 %v2138_v51, %v2100_v63 }
 0x2a3   : > { %v2220_v11 = vpop.permute.xlu0 %2219 }
 0x2a4   : > { %v2160_v22 = vpop.permute.xlu1 %2159  ;;  %v2225_v53 = vadd.f32 %v2220_v11, %v2183_v45 }
 0x2a5   : > { %v2164_v40 = vadd.f32 %v2160_v22, %v2122_v26 }
 0x2a7   : > { %v2242_v57 = vpop.permute.xlu0 %2241 }
 0x2a8   : > { %v2180_v50 = vpop.permute.xlu1 %2179  ;;  %v2247_v48 = vadd.f32 %v2242_v57, %v2205_v5 }
 0x2a9   : > { %v2184_v32 = vadd.f32 %v2180_v50, %v2142_v21 }
 0x2ab   : > { %v2262_v52 = vpop.permute.xlu0 %2261 }
 0x2ac   : > { %v2202_v54 = vpop.permute.xlu1 %2201  ;;  %v2267_v49 = vadd.f32 %v2262_v52, %v2225_v53 }
 0x2ad   : > { %v2206_v0 = vadd.f32 %v2202_v54, %v2164_v40 }
 0x2af   : > { %v2284_v23 = vpop.permute.xlu0 %2283 }
 0x2b0   : > { %v2222_v41 = vpop.permute.xlu1 %2221  ;;  %v2289_v47 = vadd.f32 %v2284_v23, %v2247_v48 }
 0x2b1   : > { %v2226_v9 = vadd.f32 %v2222_v41, %v2184_v32 }
 0x2b3   : > { %v2304_v60 = vpop.permute.xlu0 %2303 }
 0x2b4   : > { %v2244_v42 = vpop.permute.xlu1 %2243  ;;  %v2309_v62 = vadd.f32 %v2304_v60, %v2267_v49 }
 0x2b5   : > { %v2248_v59 = vadd.f32 %v2244_v42, %v2206_v0 }
 0x2b7   : > { %v2326_v34 = vpop.permute.xlu0 %2325 }
 0x2b8   : > { %v2264_v7 = vpop.permute.xlu1 %2263  ;;  %v2331_v56 = vadd.f32 %v2326_v34, %v2289_v47 }
 0x2b9   : > { %v2268_v19 = vadd.f32 %v2264_v7, %v2226_v9 }
 0x2bb   : > { %v2346_v14 = vpop.permute.xlu0 %2345 }
 0x2bc   : > { %v2351_v3 = vadd.f32 %v2346_v14, %v2309_v62  ;;  %v2286_v55 = vpop.permute.xlu1 %2285 }
 0x2bd   : > { %v2290_v4 = vadd.f32 %v2286_v55, %v2248_v59 }
 0x2be   : > { %v2353_v17 = vadd.f32 %v2351_v3, %v2331_v56 }
 0x2c0   : > { %v2356_v38 = vadd.f32 %v2355_v2, %v2353_v17  ;;  %v2306_v31 = vpop.permute.xlu1 %2305 }
 0x2c1   : > { %v2310_v13 = vadd.f32 %v2306_v31, %v2268_v19 }
 0x2c2   : > { %v2582_v44 = vmul.f32 -1.442695, %v2356_v38 }
 0x2c4   : > { %2671 = vpow2.f32 %v2582_v44  ;;  %v2328_v43 = vpop.permute.xlu1 %2327 }
 0x2c5   : > { %v2332_v6 = vadd.f32 %v2328_v43, %v2290_v4 }
 0x2c8   : > { %v2348_v16 = vpop.permute.xlu1 %2347 }
 0x2c9   : > { %v2352_v11 = vadd.f32 %v2348_v16, %v2310_v13 }
 0x2cb   : > { %v2354_v15 = vadd.f32 %v2352_v11, %v2332_v6 }
 0x2cd   : > { %v2357_v51 = vadd.f32 %v2355_v2, %v2354_v15 }
 0x2cf   : > { %v2583_v57 = vmul.f32 -1.442695, %v2357_v51 }
 0x2d1   : > { %v2672_v46 = vpop.eup %2671  ;;  %2673 = vpow2.f32 %v2583_v57 }
 0x2d2   : > { %v2364_v22 = vadd.f32 1.0, %v2672_v46 }
 0x2d4   : > { %2675 = vrcp.f32 %v2364_v22 }
 0x2de   : > { %v2674_v50 = vpop.eup %2673 }
 0x2df   : > { %v2365_v35 = vadd.f32 1.0, %v2674_v50 }
 0x2e1   : > { %v2676_v36 = vpop.eup %2675  ;;  %2677 = vrcp.f32 %v2365_v35 }
 0x2e2   : > { %2371 = vst.msk [vmem:[%s153_s19] sm:$0xff] %vm2370_vm10, %v2676_v36 }
 0x2ee   : > { %v2678_v52 = vpop.eup %2677 }
 0x2ef   : > { %2372 = vst.msk [vmem:[%s153_s19 + $0x8] sm:$0xff] %vm2370_vm10, %v2678_v52 }
 0x2f0   : > { %2740 = shalt.err (!%p2737_p3)
}
 0x2f1   : > { %s2741_s29 = scalar_lea.hbm %s4844_s16, 256  ;;  %s2745_s4 = scalar_lea.hbm %s5125_s24, 512 }
 0x2f2   : > { %p2742_p5 = scmp.ne.s32.totalorder %s4844_s16, %s2741_s29  ;;  %p2746_p10 = scmp.lt.s32.totalorder %s4844_s16, %s5125_s24 }
 0x2f3   : > { %p2747_p4 = scmp.lt.s32.totalorder %s2745_s4, %s2741_s29 }
 0x2f4   : > { %p2743_p6 = pnand %p2742_p5, %p2900_p9 }
 0x2f5   : > { %p2748_p13 = por %p2747_p4, %p2746_p10 }
 0x2f6   : > { %p2744_p7 = pneg %p2743_p6 }
 0x2f8   : > { %p2749_p8 = pnand %p2748_p13, %p2744_p7 }
 0x2fa   : > { %2752 = shalt.err (!%p2749_p8)
}
 0x2fb   : > { %s2829_s11 = smov 128   ;;  %s2830_s10 = smov 8  }
 0x2fc   : > { %2593 = dma.vmem_to_hbm [thread:$0]  (%p2900_p9), %s4846_s2, 256, %s4844_s16, %s2374_s17, %s2829_s11, %s2829_s11, %s2830_s10  }
 0x2fd PF: > { %s5126_s27 = sld [smem:[#allocation15_spill]] }
 0x2fe   : > { %s5127_s30 = sld [smem:[#allocation23_spill]] }
 0x2ff   : > { %s5128_s7 = sld [smem:[#allocation19_spill]] }
 0x303   : > { %s2402_s20 = sand.u32 1, %s5126_s27  }
 0x304   : > { %p5129_p11 = scmp.ne.s32.totalorder %s5127_s30, 0  ;;  %s2403_s21 = scalar_lea.sflag [#allocation10], %s2402_s20 }
 0x305   : > { %p5130_p12 = scmp.ge.s32.totalorder %s5128_s7, 2 }
 0x307   : > { %p2600_p0 = pnand %p5130_p12, %p5129_p11 }
 0x309   : > { %p2601_p1 = pneg %p2600_p0 }
 0x30b   : > { %2784 = dma.done.wait (%p2601_p1), %s2403_s21, 256  }
 0x30c   : > { %2786 = vsyncadd (%p2601_p1), %s2403_s21, 4294967040  ;;  %s22_s17 = sadd.s32 1, %s5128_s7   ;;  %s5131_s12 = sld [smem:[#allocation16_spill]] }
 0x30d   : > { %p19_p2 = scmp.ge.s32.totalorder %s22_s17, 4   ;;  %s5132_s13 = sld [smem:[#allocation17_spill]] }
 0x30e   : > { %s5133_s14 = sld [smem:[#allocation22_spill]] }
 0x30f   : > { %s5134_s15 = sld [smem:[#allocation18_spill]]  ;;  %21 = sbr.rel (!%p19_p2) target bundleno = 13 (0xd), region = 80 }
 0x310   : > { %s5135_s16 = sld [smem:[#allocation20_spill]] }
 0x314   :  { %2408 = vsyncpa [#allocation9], 1 }
 0x315   :  { %2410 = vsyncpa [#allocation9 + $0x1], 1 }
 0x316   :  { %2411 = vsyncpa [#allocation10], 1 }
 0x317   :  { %2413 = vsyncpa [#allocation10 + $0x1], 1 }

</bundles_post_ra>
